<compile_context>
chip_gen: v5e
topology: v5e:2x2
jax: 0.10.0
libtpu: 0.0.40
codegen_flags: <defaults>
</compile_context>

<pallas_src>
import jax
import jax.numpy as jnp
from jax.experimental import pallas as pl
from jax.experimental.pallas import tpu as pltpu


def _round_up(x, m):
    return ((x + m - 1) // m) * m


def _pad_to(a, shape):
    pads = [(0, s - d) for d, s in zip(a.shape, shape)]
    return jnp.pad(a, pads)


# ----------------------------------------------------------------------------
# Single fused kernel: input projection + fwd/bwd LSTM recurrence + combiner.
# Everything (x, packed weights, per-step gate inputs, per-step hidden states)
# is VMEM-resident for the whole call.
# ----------------------------------------------------------------------------
def _bilstm_encoder_kernel(x_ref,
                           wih_f_ref, b_f_ref, whh_f_ref,
                           wih_b_ref, b_b_ref, whh_b_ref,
                           wcf_ref, wcb_ref,
                           o_ref,
                           gf_sc, gb_sc, hf_sc, hb_sc):
    T, B, D = x_ref.shape          # B, and H below, are the padded sizes
    H = whh_f_ref.shape[0]

    # ---- hoisted input projection: one big matmul per direction, bias folded
    x_flat = x_ref[...].reshape(T * B, D)
    gf_sc[...] = (jnp.dot(x_flat, wih_f_ref[...],
                          preferred_element_type=jnp.float32)
                  + b_f_ref[...]).reshape(T, B, 4 * H)
    gb_sc[...] = (jnp.dot(x_flat, wih_b_ref[...],
                          preferred_element_type=jnp.float32)
                  + b_b_ref[...]).reshape(T, B, 4 * H)

    whh_f = whh_f_ref[...]
    whh_b = whh_b_ref[...]

    def lstm_cell(gates_in, h, c, whh):
        # one (B, H) @ (H, 4H) dot per step; gate order [i, f, g, o] (PyTorch)
        gates = gates_in + jnp.dot(h, whh, preferred_element_type=jnp.float32)
        i = jax.nn.sigmoid(gates[:, 0 * H:1 * H])
        f = jax.nn.sigmoid(gates[:, 1 * H:2 * H])
        g = jnp.tanh(gates[:, 2 * H:3 * H])
        o = jax.nn.sigmoid(gates[:, 3 * H:4 * H])
        c_new = f * c + i * g
        h_new = o * jnp.tanh(c_new)
        return h_new, c_new

    def fwd_body(t, carry):
        h, c = carry
        h, c = lstm_cell(gf_sc[t], h, c, whh_f)
        hf_sc[t] = h
        return (h, c)

    def bwd_body(t, carry):
        tr = T - 1 - t
        h, c = carry
        h, c = lstm_cell(gb_sc[tr], h, c, whh_b)
        hb_sc[tr] = h
        return (h, c)

    def run_direction(body):
        carry = (jnp.zeros((B, H), jnp.float32),
                 jnp.zeros((B, H), jnp.float32))
        if T <= 64:                      # T is a trace-time constant: unroll
            for t in range(T):
                carry = body(t, carry)
        else:
            carry = jax.lax.fori_loop(0, T, body, carry)
        return carry

    run_direction(fwd_body)
    run_direction(bwd_body)

    # ---- fused combiner: Linear(2H -> H, bias=False) + ReLU, flattened -----
    hf_flat = hf_sc[...].reshape(T * B, H)
    hb_flat = hb_sc[...].reshape(T * B, H)
    y = (jnp.dot(hf_flat, wcf_ref[...], preferred_element_type=jnp.float32)
         + jnp.dot(hb_flat, wcb_ref[...], preferred_element_type=jnp.float32))
    o_ref[...] = jnp.maximum(y, 0.0).reshape(T, B, H)


# ----------------------------------------------------------------------------
# Wrapper: packs per-gate weights into (D, 4H)/(H, 4H), zero-pads B -> mult of
# 8 and H -> mult of 128 (padded hidden units stay exactly 0), runs the fused
# kernel once, and crops the padding.
# ----------------------------------------------------------------------------
def bilstm_encoder(x, params):
    """x: (T, B, D_in) float32 -> (T, B, H) float32."""
    T, B, D = x.shape
    H = params["w_hh_f"].shape[-1]

    Bp = _round_up(max(B, 8), 8)
    Hp = _round_up(max(H, 128), 128)

    def pack_ih(w, b):                    # (4, D, H), (4, 1, H)
        w = _pad_to(w, (4, D, Hp))
        b = _pad_to(b, (4, 1, Hp))
        return (jnp.transpose(w, (1, 0, 2)).reshape(D, 4 * Hp),
                jnp.transpose(b, (1, 0, 2)).reshape(1, 4 * Hp))

    def pack_hh(w):                       # (4, H, H)
        w = _pad_to(w, (4, Hp, Hp))
        return jnp.transpose(w, (1, 0, 2)).reshape(Hp, 4 * Hp)

    wih_f, b_f = pack_ih(params["w_ih_f"], params["b_f"])
    wih_b, b_b = pack_ih(params["w_ih_b"], params["b_b"])
    whh_f = pack_hh(params["w_hh_f"])
    whh_b = pack_hh(params["w_hh_b"])
    wcf = _pad_to(params["w_cf"], (Hp, Hp))
    wcb = _pad_to(params["w_cb"], (Hp, Hp))
    xp = _pad_to(x, (T, Bp, D))

    def full(shape):
        n = len(shape)
        return pl.BlockSpec(shape, lambda i, n=n: (0,) * n)

    out = pl.pallas_call(
        _bilstm_encoder_kernel,
        out_shape=jax.ShapeDtypeStruct((T, Bp, Hp), jnp.float32),
        grid=(1,),
        in_specs=[
            full((T, Bp, D)),                                       # x
            full((D, 4 * Hp)), full((1, 4 * Hp)), full((Hp, 4 * Hp)),  # fwd
            full((D, 4 * Hp)), full((1, 4 * Hp)), full((Hp, 4 * Hp)),  # bwd
            full((Hp, Hp)), full((Hp, Hp)),                         # combiner
        ],
        out_specs=full((T, Bp, Hp)),
        scratch_shapes=[
            pltpu.VMEM((T, Bp, 4 * Hp), jnp.float32),   # gate inputs (fwd)
            pltpu.VMEM((T, Bp, 4 * Hp), jnp.float32),   # gate inputs (bwd)
            pltpu.VMEM((T, Bp, Hp), jnp.float32),       # h_fwd, all steps
            pltpu.VMEM((T, Bp, Hp), jnp.float32),       # h_bwd, all steps
        ],
        compiler_params=pltpu.CompilerParams(
            dimension_semantics=("arbitrary",)),
    )(xp, wih_f, b_f, whh_f, wih_b, b_b, whh_b, wcf, wcb)

    return out[:, :B, :H]


# ----------------------------------------------------------------------------
# Pure-JAX reference (mirrors PyTorch nn.LSTM + Linear + ReLU semantics).
# ----------------------------------------------------------------------------
def _lstm_dir_ref(x, w_ih, w_hh, b, reverse):
    T, B, _ = x.shape
    H = w_hh.shape[-1]
    h = jnp.zeros((B, H), jnp.float32)
    c = jnp.zeros((B, H), jnp.float32)
    outs = [None] * T
    ts = range(T - 1, -1, -1) if reverse else range(T)
    for t in ts:
        xt = x[t]
        i = jax.nn.sigmoid(xt @ w_ih[0] + h @ w_hh[0] + b[0])
        f = jax.nn.sigmoid(xt @ w_ih[1] + h @ w_hh[1] + b[1])
        g = jnp.tanh(xt @ w_ih[2] + h @ w_hh[2] + b[2])
        o = jax.nn.sigmoid(xt @ w_ih[3] + h @ w_hh[3] + b[3])
        c = f * c + i * g
        h = o * jnp.tanh(c)
        outs[t] = h
    return jnp.stack(outs, axis=0)


def bilstm_encoder_ref(x, params):
    hf = _lstm_dir_ref(x, params["w_ih_f"], params["w_hh_f"], params["b_f"],
                       reverse=False)
    hb = _lstm_dir_ref(x, params["w_ih_b"], params["w_hh_b"], params["b_b"],
                       reverse=True)
    return jnp.maximum(hf @ params["w_cf"] + hb @ params["w_cb"], 0.0)


if __name__ == "__main__":
    T, B, D_in, H = 8, 4, 16, 32   # seq=8, batch=4, input_dim=16, output_dim=32

    key = jax.random.PRNGKey(0)
    ks = jax.random.split(key, 10)
    s = 0.2
    params = {
        "w_ih_f": jax.random.normal(ks[0], (4, D_in, H), jnp.float32) * s,
        "w_hh_f": jax.random.normal(ks[1], (4, H, H), jnp.float32) * s,
        "b_f":    jax.random.normal(ks[2], (4, 1, H), jnp.float32) * s,
        "w_ih_b": jax.random.normal(ks[3], (4, D_in, H), jnp.float32) * s,
        "w_hh_b": jax.random.normal(ks[4], (4, H, H), jnp.float32) * s,
        "b_b":    jax.random.normal(ks[5], (4, 1, H), jnp.float32) * s,
        "w_cf":   jax.random.normal(ks[6], (H, H), jnp.float32) * s,
        "w_cb":   jax.random.normal(ks[7], (H, H), jnp.float32) * s,
    }
    x = jax.random.normal(ks[8], (T, B, D_in), jnp.float32)

    out = jax.block_until_ready(bilstm_encoder(x, params))
    ref = bilstm_encoder_ref(x, params)

    assert out.shape == (T, B, H), out.shape
    max_err = float(jnp.max(jnp.abs(out - ref)))
    assert max_err < 1e-3, f"mismatch vs reference: max_err={max_err}"
    print("KERNEL_OK")
</pallas_src>

<mosaic_0001>
module attributes {stable_mosaic.version = 11 : i64} {
  func.func @_bilstm_encoder_kernel(%arg0: i32, %arg1: memref<8x8x16xf32, #tpu.memory_space<vmem>>, %arg2: memref<16x512xf32, #tpu.memory_space<vmem>>, %arg3: memref<1x512xf32, #tpu.memory_space<vmem>>, %arg4: memref<128x512xf32, #tpu.memory_space<vmem>>, %arg5: memref<16x512xf32, #tpu.memory_space<vmem>>, %arg6: memref<1x512xf32, #tpu.memory_space<vmem>>, %arg7: memref<128x512xf32, #tpu.memory_space<vmem>>, %arg8: memref<128x128xf32, #tpu.memory_space<vmem>>, %arg9: memref<128x128xf32, #tpu.memory_space<vmem>>, %arg10: memref<8x8x128xf32, #tpu.memory_space<vmem>>, %arg11: memref<8x8x512xf32, #tpu.memory_space<vmem>>, %arg12: memref<8x8x512xf32, #tpu.memory_space<vmem>>, %arg13: memref<8x8x128xf32, #tpu.memory_space<vmem>>, %arg14: memref<8x8x128xf32, #tpu.memory_space<vmem>>) attributes {dimension_semantics = [#tpu.dimension_semantics<arbitrary>], iteration_bounds = array<i64: 1>, scalar_prefetch = 0 : i64, scratch_operands = 4 : i64, tpu.core_type = #tpu.core_type<tc>, window_params = [{pipeline_mode = #tpu.pipeline_mode<synchronous>, transform_indices = @transform_0, window_bounds = array<i64: 8, 8, 16>}, {pipeline_mode = #tpu.pipeline_mode<synchronous>, transform_indices = @transform_1, window_bounds = array<i64: 16, 512>}, {pipeline_mode = #tpu.pipeline_mode<synchronous>, transform_indices = @transform_2, window_bounds = array<i64: 1, 512>}, {pipeline_mode = #tpu.pipeline_mode<synchronous>, transform_indices = @transform_3, window_bounds = array<i64: 128, 512>}, {pipeline_mode = #tpu.pipeline_mode<synchronous>, transform_indices = @transform_4, window_bounds = array<i64: 16, 512>}, {pipeline_mode = #tpu.pipeline_mode<synchronous>, transform_indices = @transform_5, window_bounds = array<i64: 1, 512>}, {pipeline_mode = #tpu.pipeline_mode<synchronous>, transform_indices = @transform_6, window_bounds = array<i64: 128, 512>}, {pipeline_mode = #tpu.pipeline_mode<synchronous>, transform_indices = @transform_7, window_bounds = array<i64: 128, 128>}, {pipeline_mode = #tpu.pipeline_mode<synchronous>, transform_indices = @transform_8, window_bounds = array<i64: 128, 128>}, {pipeline_mode = #tpu.pipeline_mode<synchronous>, transform_indices = @transform_9, window_bounds = array<i64: 8, 8, 128>}]} {
    %c0 = arith.constant 0 : index
    %c0_0 = arith.constant 0 : index
    %c0_1 = arith.constant 0 : index
    %0 = vector.load %arg1[%c0, %c0_0, %c0_1] : memref<8x8x16xf32, #tpu.memory_space<vmem>>, vector<8x8x16xf32>
    %1 = vector.shape_cast %0 : vector<8x8x16xf32> to vector<64x16xf32>
    %c0_2 = arith.constant 0 : index
    %c0_3 = arith.constant 0 : index
    %2 = vector.load %arg2[%c0_2, %c0_3] : memref<16x512xf32, #tpu.memory_space<vmem>>, vector<16x512xf32>
    %cst = arith.constant dense<0.000000e+00> : vector<64x512xf32>
    %3 = tpu.matmul %1, %2, %cst {dimension_numbers = #tpu.dot_dimension_numbers<[1], [0], [0], [1], [0, 0, 1, 1], [], []>} : vector<64x16xf32>, vector<16x512xf32>, vector<64x512xf32> -> vector<64x512xf32>
    %c0_4 = arith.constant 0 : index
    %c0_5 = arith.constant 0 : index
    %4 = vector.load %arg3[%c0_4, %c0_5] : memref<1x512xf32, #tpu.memory_space<vmem>>, vector<1x512xf32>
    %5 = vector.broadcast %4 : vector<1x512xf32> to vector<64x512xf32>
    %6 = arith.addf %3, %5 : vector<64x512xf32>
    %7 = vector.shape_cast %6 : vector<64x512xf32> to vector<8x8x512xf32>
    %c0_6 = arith.constant 0 : index
    %c0_7 = arith.constant 0 : index
    %c0_8 = arith.constant 0 : index
    %8 = vector.load %arg11[%c0_6, %c0_7, %c0_8] : memref<8x8x512xf32, #tpu.memory_space<vmem>>, vector<8x8x512xf32>
    tpu.vector_store %arg11[%c0_6, %c0_7, %c0_8], %7 {strides = array<i32>} : memref<8x8x512xf32, #tpu.memory_space<vmem>>, vector<8x8x512xf32>,
    %c0_9 = arith.constant 0 : index
    %c0_10 = arith.constant 0 : index
    %9 = vector.load %arg5[%c0_9, %c0_10] : memref<16x512xf32, #tpu.memory_space<vmem>>, vector<16x512xf32>
    %cst_11 = arith.constant dense<0.000000e+00> : vector<64x512xf32>
    %10 = tpu.matmul %1, %9, %cst_11 {dimension_numbers = #tpu.dot_dimension_numbers<[1], [0], [0], [1], [0, 0, 1, 1], [], []>} : vector<64x16xf32>, vector<16x512xf32>, vector<64x512xf32> -> vector<64x512xf32>
    %c0_12 = arith.constant 0 : index
    %c0_13 = arith.constant 0 : index
    %11 = vector.load %arg6[%c0_12, %c0_13] : memref<1x512xf32, #tpu.memory_space<vmem>>, vector<1x512xf32>
    %12 = vector.broadcast %11 : vector<1x512xf32> to vector<64x512xf32>
    %13 = arith.addf %10, %12 : vector<64x512xf32>
    %14 = vector.shape_cast %13 : vector<64x512xf32> to vector<8x8x512xf32>
    %c0_14 = arith.constant 0 : index
    %c0_15 = arith.constant 0 : index
    %c0_16 = arith.constant 0 : index
    %15 = vector.load %arg12[%c0_14, %c0_15, %c0_16] : memref<8x8x512xf32, #tpu.memory_space<vmem>>, vector<8x8x512xf32>
    tpu.vector_store %arg12[%c0_14, %c0_15, %c0_16], %14 {strides = array<i32>} : memref<8x8x512xf32, #tpu.memory_space<vmem>>, vector<8x8x512xf32>,
    %c0_17 = arith.constant 0 : index
    %c0_18 = arith.constant 0 : index
    %16 = vector.load %arg4[%c0_17, %c0_18] : memref<128x512xf32, #tpu.memory_space<vmem>>, vector<128x512xf32>
    %c0_19 = arith.constant 0 : index
    %c0_20 = arith.constant 0 : index
    %17 = vector.load %arg7[%c0_19, %c0_20] : memref<128x512xf32, #tpu.memory_space<vmem>>, vector<128x512xf32>
    %cst_21 = arith.constant 0.000000e+00 : f32
    %18 = vector.broadcast %cst_21 : f32 to vector<8x128xf32>
    %cst_22 = arith.constant 0.000000e+00 : f32
    %19 = vector.broadcast %cst_22 : f32 to vector<8x128xf32>
    %c0_23 = arith.constant 0 : index
    %c0_24 = arith.constant 0 : index
    %c0_25 = arith.constant 0 : index
    %20 = vector.load %arg11[%c0_23, %c0_24, %c0_25] : memref<8x8x512xf32, #tpu.memory_space<vmem>>, vector<1x8x512xf32>
    %21 = vector.shape_cast %20 : vector<1x8x512xf32> to vector<8x512xf32>
    %cst_26 = arith.constant dense<0.000000e+00> : vector<8x512xf32>
    %22 = tpu.matmul %18, %16, %cst_26 {dimension_numbers = #tpu.dot_dimension_numbers<[1], [0], [0], [1], [0, 0, 1, 1], [], []>} : vector<8x128xf32>, vector<128x512xf32>, vector<8x512xf32> -> vector<8x512xf32>
    %23 = arith.addf %21, %22 : vector<8x512xf32>
    %24 = vector.extract_strided_slice %23 {offsets = [0, 0], sizes = [8, 128], strides = [1, 1]} : vector<8x512xf32> to vector<8x128xf32>
    %25 = arith.negf %24 : vector<8x128xf32>
    %26 = math.exp %25 : vector<8x128xf32>
    %cst_27 = arith.constant 1.000000e+00 : f32
    %27 = vector.broadcast %cst_27 : f32 to vector<8x128xf32>
    %28 = arith.addf %27, %26 : vector<8x128xf32>
    %29 = arith.divf %27, %28 : vector<8x128xf32>
    %30 = vector.extract_strided_slice %23 {offsets = [0, 128], sizes = [8, 128], strides = [1, 1]} : vector<8x512xf32> to vector<8x128xf32>
    %31 = arith.negf %30 : vector<8x128xf32>
    %32 = math.exp %31 : vector<8x128xf32>
    %cst_28 = arith.constant 1.000000e+00 : f32
    %33 = vector.broadcast %cst_28 : f32 to vector<8x128xf32>
    %34 = arith.addf %33, %32 : vector<8x128xf32>
    %35 = arith.divf %33, %34 : vector<8x128xf32>
    %36 = vector.extract_strided_slice %23 {offsets = [0, 256], sizes = [8, 128], strides = [1, 1]} : vector<8x512xf32> to vector<8x128xf32>
    %37 = math.tanh %36 : vector<8x128xf32>
    %38 = vector.extract_strided_slice %23 {offsets = [0, 384], sizes = [8, 128], strides = [1, 1]} : vector<8x512xf32> to vector<8x128xf32>
    %39 = arith.negf %38 : vector<8x128xf32>
    %40 = math.exp %39 : vector<8x128xf32>
    %cst_29 = arith.constant 1.000000e+00 : f32
    %41 = vector.broadcast %cst_29 : f32 to vector<8x128xf32>
    %42 = arith.addf %41, %40 : vector<8x128xf32>
    %43 = arith.divf %41, %42 : vector<8x128xf32>
    %44 = arith.mulf %35, %19 : vector<8x128xf32>
    %45 = arith.mulf %29, %37 : vector<8x128xf32>
    %46 = arith.addf %44, %45 : vector<8x128xf32>
    %47 = math.tanh %46 : vector<8x128xf32>
    %48 = arith.mulf %43, %47 : vector<8x128xf32>
    %c0_30 = arith.constant 0 : index
    %c0_31 = arith.constant 0 : index
    %c0_32 = arith.constant 0 : index
    %49 = vector.load %arg13[%c0_30, %c0_31, %c0_32] : memref<8x8x128xf32, #tpu.memory_space<vmem>>, vector<1x8x128xf32>
    %50 = vector.shape_cast %49 : vector<1x8x128xf32> to vector<8x128xf32>
    %51 = vector.shape_cast %48 : vector<8x128xf32> to vector<1x8x128xf32>
    tpu.vector_store %arg13[%c0_30, %c0_31, %c0_32], %51 {strides = array<i32>} : memref<8x8x128xf32, #tpu.memory_space<vmem>>, vector<1x8x128xf32>,
    %c1 = arith.constant 1 : index
    %c0_33 = arith.constant 0 : index
    %c0_34 = arith.constant 0 : index
    %52 = vector.load %arg11[%c1, %c0_33, %c0_34] : memref<8x8x512xf32, #tpu.memory_space<vmem>>, vector<1x8x512xf32>
    %53 = vector.shape_cast %52 : vector<1x8x512xf32> to vector<8x512xf32>
    %cst_35 = arith.constant dense<0.000000e+00> : vector<8x512xf32>
    %54 = tpu.matmul %48, %16, %cst_35 {dimension_numbers = #tpu.dot_dimension_numbers<[1], [0], [0], [1], [0, 0, 1, 1], [], []>} : vector<8x128xf32>, vector<128x512xf32>, vector<8x512xf32> -> vector<8x512xf32>
    %55 = arith.addf %53, %54 : vector<8x512xf32>
    %56 = vector.extract_strided_slice %55 {offsets = [0, 0], sizes = [8, 128], strides = [1, 1]} : vector<8x512xf32> to vector<8x128xf32>
    %57 = arith.negf %56 : vector<8x128xf32>
    %58 = math.exp %57 : vector<8x128xf32>
    %cst_36 = arith.constant 1.000000e+00 : f32
    %59 = vector.broadcast %cst_36 : f32 to vector<8x128xf32>
    %60 = arith.addf %59, %58 : vector<8x128xf32>
    %61 = arith.divf %59, %60 : vector<8x128xf32>
    %62 = vector.extract_strided_slice %55 {offsets = [0, 128], sizes = [8, 128], strides = [1, 1]} : vector<8x512xf32> to vector<8x128xf32>
    %63 = arith.negf %62 : vector<8x128xf32>
    %64 = math.exp %63 : vector<8x128xf32>
    %cst_37 = arith.constant 1.000000e+00 : f32
    %65 = vector.broadcast %cst_37 : f32 to vector<8x128xf32>
    %66 = arith.addf %65, %64 : vector<8x128xf32>
    %67 = arith.divf %65, %66 : vector<8x128xf32>
    %68 = vector.extract_strided_slice %55 {offsets = [0, 256], sizes = [8, 128], strides = [1, 1]} : vector<8x512xf32> to vector<8x128xf32>
    %69 = math.tanh %68 : vector<8x128xf32>
    %70 = vector.extract_strided_slice %55 {offsets = [0, 384], sizes = [8, 128], strides = [1, 1]} : vector<8x512xf32> to vector<8x128xf32>
    %71 = arith.negf %70 : vector<8x128xf32>
    %72 = math.exp %71 : vector<8x128xf32>
    %cst_38 = arith.constant 1.000000e+00 : f32
    %73 = vector.broadcast %cst_38 : f32 to vector<8x128xf32>
    %74 = arith.addf %73, %72 : vector<8x128xf32>
    %75 = arith.divf %73, %74 : vector<8x128xf32>
    %76 = arith.mulf %67, %46 : vector<8x128xf32>
    %77 = arith.mulf %61, %69 : vector<8x128xf32>
    %78 = arith.addf %76, %77 : vector<8x128xf32>
    %79 = math.tanh %78 : vector<8x128xf32>
    %80 = arith.mulf %75, %79 : vector<8x128xf32>
    %c1_39 = arith.constant 1 : index
    %c0_40 = arith.constant 0 : index
    %c0_41 = arith.constant 0 : index
    %81 = vector.load %arg13[%c1_39, %c0_40, %c0_41] : memref<8x8x128xf32, #tpu.memory_space<vmem>>, vector<1x8x128xf32>
    %82 = vector.shape_cast %81 : vector<1x8x128xf32> to vector<8x128xf32>
    %83 = vector.shape_cast %80 : vector<8x128xf32> to vector<1x8x128xf32>
    tpu.vector_store %arg13[%c1_39, %c0_40, %c0_41], %83 {strides = array<i32>} : memref<8x8x128xf32, #tpu.memory_space<vmem>>, vector<1x8x128xf32>,
    %c2 = arith.constant 2 : index
    %c0_42 = arith.constant 0 : index
    %c0_43 = arith.constant 0 : index
    %84 = vector.load %arg11[%c2, %c0_42, %c0_43] : memref<8x8x512xf32, #tpu.memory_space<vmem>>, vector<1x8x512xf32>
    %85 = vector.shape_cast %84 : vector<1x8x512xf32> to vector<8x512xf32>
    %cst_44 = arith.constant dense<0.000000e+00> : vector<8x512xf32>
    %86 = tpu.matmul %80, %16, %cst_44 {dimension_numbers = #tpu.dot_dimension_numbers<[1], [0], [0], [1], [0, 0, 1, 1], [], []>} : vector<8x128xf32>, vector<128x512xf32>, vector<8x512xf32> -> vector<8x512xf32>
    %87 = arith.addf %85, %86 : vector<8x512xf32>
    %88 = vector.extract_strided_slice %87 {offsets = [0, 0], sizes = [8, 128], strides = [1, 1]} : vector<8x512xf32> to vector<8x128xf32>
    %89 = arith.negf %88 : vector<8x128xf32>
    %90 = math.exp %89 : vector<8x128xf32>
    %cst_45 = arith.constant 1.000000e+00 : f32
    %91 = vector.broadcast %cst_45 : f32 to vector<8x128xf32>
    %92 = arith.addf %91, %90 : vector<8x128xf32>
    %93 = arith.divf %91, %92 : vector<8x128xf32>
    %94 = vector.extract_strided_slice %87 {offsets = [0, 128], sizes = [8, 128], strides = [1, 1]} : vector<8x512xf32> to vector<8x128xf32>
    %95 = arith.negf %94 : vector<8x128xf32>
    %96 = math.exp %95 : vector<8x128xf32>
    %cst_46 = arith.constant 1.000000e+00 : f32
    %97 = vector.broadcast %cst_46 : f32 to vector<8x128xf32>
    %98 = arith.addf %97, %96 : vector<8x128xf32>
    %99 = arith.divf %97, %98 : vector<8x128xf32>
    %100 = vector.extract_strided_slice %87 {offsets = [0, 256], sizes = [8, 128], strides = [1, 1]} : vector<8x512xf32> to vector<8x128xf32>
    %101 = math.tanh %100 : vector<8x128xf32>
    %102 = vector.extract_strided_slice %87 {offsets = [0, 384], sizes = [8, 128], strides = [1, 1]} : vector<8x512xf32> to vector<8x128xf32>
    %103 = arith.negf %102 : vector<8x128xf32>
    %104 = math.exp %103 : vector<8x128xf32>
    %cst_47 = arith.constant 1.000000e+00 : f32
    %105 = vector.broadcast %cst_47 : f32 to vector<8x128xf32>
    %106 = arith.addf %105, %104 : vector<8x128xf32>
    %107 = arith.divf %105, %106 : vector<8x128xf32>
    %108 = arith.mulf %99, %78 : vector<8x128xf32>
    %109 = arith.mulf %93, %101 : vector<8x128xf32>
    %110 = arith.addf %108, %109 : vector<8x128xf32>
    %111 = math.tanh %110 : vector<8x128xf32>
    %112 = arith.mulf %107, %111 : vector<8x128xf32>
    %c2_48 = arith.constant 2 : index
    %c0_49 = arith.constant 0 : index
    %c0_50 = arith.constant 0 : index
    %113 = vector.load %arg13[%c2_48, %c0_49, %c0_50] : memref<8x8x128xf32, #tpu.memory_space<vmem>>, vector<1x8x128xf32>
    %114 = vector.shape_cast %113 : vector<1x8x128xf32> to vector<8x128xf32>
    %115 = vector.shape_cast %112 : vector<8x128xf32> to vector<1x8x128xf32>
    tpu.vector_store %arg13[%c2_48, %c0_49, %c0_50], %115 {strides = array<i32>} : memref<8x8x128xf32, #tpu.memory_space<vmem>>, vector<1x8x128xf32>,
    %c3 = arith.constant 3 : index
    %c0_51 = arith.constant 0 : index
    %c0_52 = arith.constant 0 : index
    %116 = vector.load %arg11[%c3, %c0_51, %c0_52] : memref<8x8x512xf32, #tpu.memory_space<vmem>>, vector<1x8x512xf32>
    %117 = vector.shape_cast %116 : vector<1x8x512xf32> to vector<8x512xf32>
    %cst_53 = arith.constant dense<0.000000e+00> : vector<8x512xf32>
    %118 = tpu.matmul %112, %16, %cst_53 {dimension_numbers = #tpu.dot_dimension_numbers<[1], [0], [0], [1], [0, 0, 1, 1], [], []>} : vector<8x128xf32>, vector<128x512xf32>, vector<8x512xf32> -> vector<8x512xf32>
    %119 = arith.addf %117, %118 : vector<8x512xf32>
    %120 = vector.extract_strided_slice %119 {offsets = [0, 0], sizes = [8, 128], strides = [1, 1]} : vector<8x512xf32> to vector<8x128xf32>
    %121 = arith.negf %120 : vector<8x128xf32>
    %122 = math.exp %121 : vector<8x128xf32>
    %cst_54 = arith.constant 1.000000e+00 : f32
    %123 = vector.broadcast %cst_54 : f32 to vector<8x128xf32>
    %124 = arith.addf %123, %122 : vector<8x128xf32>
    %125 = arith.divf %123, %124 : vector<8x128xf32>
    %126 = vector.extract_strided_slice %119 {offsets = [0, 128], sizes = [8, 128], strides = [1, 1]} : vector<8x512xf32> to vector<8x128xf32>
    %127 = arith.negf %126 : vector<8x128xf32>
    %128 = math.exp %127 : vector<8x128xf32>
    %cst_55 = arith.constant 1.000000e+00 : f32
    %129 = vector.broadcast %cst_55 : f32 to vector<8x128xf32>
    %130 = arith.addf %129, %128 : vector<8x128xf32>
    %131 = arith.divf %129, %130 : vector<8x128xf32>
    %132 = vector.extract_strided_slice %119 {offsets = [0, 256], sizes = [8, 128], strides = [1, 1]} : vector<8x512xf32> to vector<8x128xf32>
    %133 = math.tanh %132 : vector<8x128xf32>
    %134 = vector.extract_strided_slice %119 {offsets = [0, 384], sizes = [8, 128], strides = [1, 1]} : vector<8x512xf32> to vector<8x128xf32>
    %135 = arith.negf %134 : vector<8x128xf32>
    %136 = math.exp %135 : vector<8x128xf32>
    %cst_56 = arith.constant 1.000000e+00 : f32
    %137 = vector.broadcast %cst_56 : f32 to vector<8x128xf32>
    %138 = arith.addf %137, %136 : vector<8x128xf32>
    %139 = arith.divf %137, %138 : vector<8x128xf32>
    %140 = arith.mulf %131, %110 : vector<8x128xf32>
    %141 = arith.mulf %125, %133 : vector<8x128xf32>
    %142 = arith.addf %140, %141 : vector<8x128xf32>
    %143 = math.tanh %142 : vector<8x128xf32>
    %144 = arith.mulf %139, %143 : vector<8x128xf32>
    %c3_57 = arith.constant 3 : index
    %c0_58 = arith.constant 0 : index
    %c0_59 = arith.constant 0 : index
    %145 = vector.load %arg13[%c3_57, %c0_58, %c0_59] : memref<8x8x128xf32, #tpu.memory_space<vmem>>, vector<1x8x128xf32>
    %146 = vector.shape_cast %145 : vector<1x8x128xf32> to vector<8x128xf32>
    %147 = vector.shape_cast %144 : vector<8x128xf32> to vector<1x8x128xf32>
    tpu.vector_store %arg13[%c3_57, %c0_58, %c0_59], %147 {strides = array<i32>} : memref<8x8x128xf32, #tpu.memory_space<vmem>>, vector<1x8x128xf32>,
    %c4 = arith.constant 4 : index
    %c0_60 = arith.constant 0 : index
    %c0_61 = arith.constant 0 : index
    %148 = vector.load %arg11[%c4, %c0_60, %c0_61] : memref<8x8x512xf32, #tpu.memory_space<vmem>>, vector<1x8x512xf32>
    %149 = vector.shape_cast %148 : vector<1x8x512xf32> to vector<8x512xf32>
    %cst_62 = arith.constant dense<0.000000e+00> : vector<8x512xf32>
    %150 = tpu.matmul %144, %16, %cst_62 {dimension_numbers = #tpu.dot_dimension_numbers<[1], [0], [0], [1], [0, 0, 1, 1], [], []>} : vector<8x128xf32>, vector<128x512xf32>, vector<8x512xf32> -> vector<8x512xf32>
    %151 = arith.addf %149, %150 : vector<8x512xf32>
    %152 = vector.extract_strided_slice %151 {offsets = [0, 0], sizes = [8, 128], strides = [1, 1]} : vector<8x512xf32> to vector<8x128xf32>
    %153 = arith.negf %152 : vector<8x128xf32>
    %154 = math.exp %153 : vector<8x128xf32>
    %cst_63 = arith.constant 1.000000e+00 : f32
    %155 = vector.broadcast %cst_63 : f32 to vector<8x128xf32>
    %156 = arith.addf %155, %154 : vector<8x128xf32>
    %157 = arith.divf %155, %156 : vector<8x128xf32>
    %158 = vector.extract_strided_slice %151 {offsets = [0, 128], sizes = [8, 128], strides = [1, 1]} : vector<8x512xf32> to vector<8x128xf32>
    %159 = arith.negf %158 : vector<8x128xf32>
    %160 = math.exp %159 : vector<8x128xf32>
    %cst_64 = arith.constant 1.000000e+00 : f32
    %161 = vector.broadcast %cst_64 : f32 to vector<8x128xf32>
    %162 = arith.addf %161, %160 : vector<8x128xf32>
    %163 = arith.divf %161, %162 : vector<8x128xf32>
    %164 = vector.extract_strided_slice %151 {offsets = [0, 256], sizes = [8, 128], strides = [1, 1]} : vector<8x512xf32> to vector<8x128xf32>
    %165 = math.tanh %164 : vector<8x128xf32>
    %166 = vector.extract_strided_slice %151 {offsets = [0, 384], sizes = [8, 128], strides = [1, 1]} : vector<8x512xf32> to vector<8x128xf32>
    %167 = arith.negf %166 : vector<8x128xf32>
    %168 = math.exp %167 : vector<8x128xf32>
    %cst_65 = arith.constant 1.000000e+00 : f32
    %169 = vector.broadcast %cst_65 : f32 to vector<8x128xf32>
    %170 = arith.addf %169, %168 : vector<8x128xf32>
    %171 = arith.divf %169, %170 : vector<8x128xf32>
    %172 = arith.mulf %163, %142 : vector<8x128xf32>
    %173 = arith.mulf %157, %165 : vector<8x128xf32>
    %174 = arith.addf %172, %173 : vector<8x128xf32>
    %175 = math.tanh %174 : vector<8x128xf32>
    %176 = arith.mulf %171, %175 : vector<8x128xf32>
    %c4_66 = arith.constant 4 : index
    %c0_67 = arith.constant 0 : index
    %c0_68 = arith.constant 0 : index
    %177 = vector.load %arg13[%c4_66, %c0_67, %c0_68] : memref<8x8x128xf32, #tpu.memory_space<vmem>>, vector<1x8x128xf32>
    %178 = vector.shape_cast %177 : vector<1x8x128xf32> to vector<8x128xf32>
    %179 = vector.shape_cast %176 : vector<8x128xf32> to vector<1x8x128xf32>
    tpu.vector_store %arg13[%c4_66, %c0_67, %c0_68], %179 {strides = array<i32>} : memref<8x8x128xf32, #tpu.memory_space<vmem>>, vector<1x8x128xf32>,
    %c5 = arith.constant 5 : index
    %c0_69 = arith.constant 0 : index
    %c0_70 = arith.constant 0 : index
    %180 = vector.load %arg11[%c5, %c0_69, %c0_70] : memref<8x8x512xf32, #tpu.memory_space<vmem>>, vector<1x8x512xf32>
    %181 = vector.shape_cast %180 : vector<1x8x512xf32> to vector<8x512xf32>
    %cst_71 = arith.constant dense<0.000000e+00> : vector<8x512xf32>
    %182 = tpu.matmul %176, %16, %cst_71 {dimension_numbers = #tpu.dot_dimension_numbers<[1], [0], [0], [1], [0, 0, 1, 1], [], []>} : vector<8x128xf32>, vector<128x512xf32>, vector<8x512xf32> -> vector<8x512xf32>
    %183 = arith.addf %181, %182 : vector<8x512xf32>
    %184 = vector.extract_strided_slice %183 {offsets = [0, 0], sizes = [8, 128], strides = [1, 1]} : vector<8x512xf32> to vector<8x128xf32>
    %185 = arith.negf %184 : vector<8x128xf32>
    %186 = math.exp %185 : vector<8x128xf32>
    %cst_72 = arith.constant 1.000000e+00 : f32
    %187 = vector.broadcast %cst_72 : f32 to vector<8x128xf32>
    %188 = arith.addf %187, %186 : vector<8x128xf32>
    %189 = arith.divf %187, %188 : vector<8x128xf32>
    %190 = vector.extract_strided_slice %183 {offsets = [0, 128], sizes = [8, 128], strides = [1, 1]} : vector<8x512xf32> to vector<8x128xf32>
    %191 = arith.negf %190 : vector<8x128xf32>
    %192 = math.exp %191 : vector<8x128xf32>
    %cst_73 = arith.constant 1.000000e+00 : f32
    %193 = vector.broadcast %cst_73 : f32 to vector<8x128xf32>
    %194 = arith.addf %193, %192 : vector<8x128xf32>
    %195 = arith.divf %193, %194 : vector<8x128xf32>
    %196 = vector.extract_strided_slice %183 {offsets = [0, 256], sizes = [8, 128], strides = [1, 1]} : vector<8x512xf32> to vector<8x128xf32>
    %197 = math.tanh %196 : vector<8x128xf32>
    %198 = vector.extract_strided_slice %183 {offsets = [0, 384], sizes = [8, 128], strides = [1, 1]} : vector<8x512xf32> to vector<8x128xf32>
    %199 = arith.negf %198 : vector<8x128xf32>
    %200 = math.exp %199 : vector<8x128xf32>
    %cst_74 = arith.constant 1.000000e+00 : f32
    %201 = vector.broadcast %cst_74 : f32 to vector<8x128xf32>
    %202 = arith.addf %201, %200 : vector<8x128xf32>
    %203 = arith.divf %201, %202 : vector<8x128xf32>
    %204 = arith.mulf %195, %174 : vector<8x128xf32>
    %205 = arith.mulf %189, %197 : vector<8x128xf32>
    %206 = arith.addf %204, %205 : vector<8x128xf32>
    %207 = math.tanh %206 : vector<8x128xf32>
    %208 = arith.mulf %203, %207 : vector<8x128xf32>
    %c5_75 = arith.constant 5 : index
    %c0_76 = arith.constant 0 : index
    %c0_77 = arith.constant 0 : index
    %209 = vector.load %arg13[%c5_75, %c0_76, %c0_77] : memref<8x8x128xf32, #tpu.memory_space<vmem>>, vector<1x8x128xf32>
    %210 = vector.shape_cast %209 : vector<1x8x128xf32> to vector<8x128xf32>
    %211 = vector.shape_cast %208 : vector<8x128xf32> to vector<1x8x128xf32>
    tpu.vector_store %arg13[%c5_75, %c0_76, %c0_77], %211 {strides = array<i32>} : memref<8x8x128xf32, #tpu.memory_space<vmem>>, vector<1x8x128xf32>,
    %c6 = arith.constant 6 : index
    %c0_78 = arith.constant 0 : index
    %c0_79 = arith.constant 0 : index
    %212 = vector.load %arg11[%c6, %c0_78, %c0_79] : memref<8x8x512xf32, #tpu.memory_space<vmem>>, vector<1x8x512xf32>
    %213 = vector.shape_cast %212 : vector<1x8x512xf32> to vector<8x512xf32>
    %cst_80 = arith.constant dense<0.000000e+00> : vector<8x512xf32>
    %214 = tpu.matmul %208, %16, %cst_80 {dimension_numbers = #tpu.dot_dimension_numbers<[1], [0], [0], [1], [0, 0, 1, 1], [], []>} : vector<8x128xf32>, vector<128x512xf32>, vector<8x512xf32> -> vector<8x512xf32>
    %215 = arith.addf %213, %214 : vector<8x512xf32>
    %216 = vector.extract_strided_slice %215 {offsets = [0, 0], sizes = [8, 128], strides = [1, 1]} : vector<8x512xf32> to vector<8x128xf32>
    %217 = arith.negf %216 : vector<8x128xf32>
    %218 = math.exp %217 : vector<8x128xf32>
    %cst_81 = arith.constant 1.000000e+00 : f32
    %219 = vector.broadcast %cst_81 : f32 to vector<8x128xf32>
    %220 = arith.addf %219, %218 : vector<8x128xf32>
    %221 = arith.divf %219, %220 : vector<8x128xf32>
    %222 = vector.extract_strided_slice %215 {offsets = [0, 128], sizes = [8, 128], strides = [1, 1]} : vector<8x512xf32> to vector<8x128xf32>
    %223 = arith.negf %222 : vector<8x128xf32>
    %224 = math.exp %223 : vector<8x128xf32>
    %cst_82 = arith.constant 1.000000e+00 : f32
    %225 = vector.broadcast %cst_82 : f32 to vector<8x128xf32>
    %226 = arith.addf %225, %224 : vector<8x128xf32>
    %227 = arith.divf %225, %226 : vector<8x128xf32>
    %228 = vector.extract_strided_slice %215 {offsets = [0, 256], sizes = [8, 128], strides = [1, 1]} : vector<8x512xf32> to vector<8x128xf32>
    %229 = math.tanh %228 : vector<8x128xf32>
    %230 = vector.extract_strided_slice %215 {offsets = [0, 384], sizes = [8, 128], strides = [1, 1]} : vector<8x512xf32> to vector<8x128xf32>
    %231 = arith.negf %230 : vector<8x128xf32>
    %232 = math.exp %231 : vector<8x128xf32>
    %cst_83 = arith.constant 1.000000e+00 : f32
    %233 = vector.broadcast %cst_83 : f32 to vector<8x128xf32>
    %234 = arith.addf %233, %232 : vector<8x128xf32>
    %235 = arith.divf %233, %234 : vector<8x128xf32>
    %236 = arith.mulf %227, %206 : vector<8x128xf32>
    %237 = arith.mulf %221, %229 : vector<8x128xf32>
    %238 = arith.addf %236, %237 : vector<8x128xf32>
    %239 = math.tanh %238 : vector<8x128xf32>
    %240 = arith.mulf %235, %239 : vector<8x128xf32>
    %c6_84 = arith.constant 6 : index
    %c0_85 = arith.constant 0 : index
    %c0_86 = arith.constant 0 : index
    %241 = vector.load %arg13[%c6_84, %c0_85, %c0_86] : memref<8x8x128xf32, #tpu.memory_space<vmem>>, vector<1x8x128xf32>
    %242 = vector.shape_cast %241 : vector<1x8x128xf32> to vector<8x128xf32>
    %243 = vector.shape_cast %240 : vector<8x128xf32> to vector<1x8x128xf32>
    tpu.vector_store %arg13[%c6_84, %c0_85, %c0_86], %243 {strides = array<i32>} : memref<8x8x128xf32, #tpu.memory_space<vmem>>, vector<1x8x128xf32>,
    %c7 = arith.constant 7 : index
    %c0_87 = arith.constant 0 : index
    %c0_88 = arith.constant 0 : index
    %244 = vector.load %arg11[%c7, %c0_87, %c0_88] : memref<8x8x512xf32, #tpu.memory_space<vmem>>, vector<1x8x512xf32>
    %245 = vector.shape_cast %244 : vector<1x8x512xf32> to vector<8x512xf32>
    %cst_89 = arith.constant dense<0.000000e+00> : vector<8x512xf32>
    %246 = tpu.matmul %240, %16, %cst_89 {dimension_numbers = #tpu.dot_dimension_numbers<[1], [0], [0], [1], [0, 0, 1, 1], [], []>} : vector<8x128xf32>, vector<128x512xf32>, vector<8x512xf32> -> vector<8x512xf32>
    %247 = arith.addf %245, %246 : vector<8x512xf32>
    %248 = vector.extract_strided_slice %247 {offsets = [0, 0], sizes = [8, 128], strides = [1, 1]} : vector<8x512xf32> to vector<8x128xf32>
    %249 = arith.negf %248 : vector<8x128xf32>
    %250 = math.exp %249 : vector<8x128xf32>
    %cst_90 = arith.constant 1.000000e+00 : f32
    %251 = vector.broadcast %cst_90 : f32 to vector<8x128xf32>
    %252 = arith.addf %251, %250 : vector<8x128xf32>
    %253 = arith.divf %251, %252 : vector<8x128xf32>
    %254 = vector.extract_strided_slice %247 {offsets = [0, 128], sizes = [8, 128], strides = [1, 1]} : vector<8x512xf32> to vector<8x128xf32>
    %255 = arith.negf %254 : vector<8x128xf32>
    %256 = math.exp %255 : vector<8x128xf32>
    %cst_91 = arith.constant 1.000000e+00 : f32
    %257 = vector.broadcast %cst_91 : f32 to vector<8x128xf32>
    %258 = arith.addf %257, %256 : vector<8x128xf32>
    %259 = arith.divf %257, %258 : vector<8x128xf32>
    %260 = vector.extract_strided_slice %247 {offsets = [0, 256], sizes = [8, 128], strides = [1, 1]} : vector<8x512xf32> to vector<8x128xf32>
    %261 = math.tanh %260 : vector<8x128xf32>
    %262 = vector.extract_strided_slice %247 {offsets = [0, 384], sizes = [8, 128], strides = [1, 1]} : vector<8x512xf32> to vector<8x128xf32>
    %263 = arith.negf %262 : vector<8x128xf32>
    %264 = math.exp %263 : vector<8x128xf32>
    %cst_92 = arith.constant 1.000000e+00 : f32
    %265 = vector.broadcast %cst_92 : f32 to vector<8x128xf32>
    %266 = arith.addf %265, %264 : vector<8x128xf32>
    %267 = arith.divf %265, %266 : vector<8x128xf32>
    %268 = arith.mulf %259, %238 : vector<8x128xf32>
    %269 = arith.mulf %253, %261 : vector<8x128xf32>
    %270 = arith.addf %268, %269 : vector<8x128xf32>
    %271 = math.tanh %270 : vector<8x128xf32>
    %272 = arith.mulf %267, %271 : vector<8x128xf32>
    %c7_93 = arith.constant 7 : index
    %c0_94 = arith.constant 0 : index
    %c0_95 = arith.constant 0 : index
    %273 = vector.load %arg13[%c7_93, %c0_94, %c0_95] : memref<8x8x128xf32, #tpu.memory_space<vmem>>, vector<1x8x128xf32>
    %274 = vector.shape_cast %273 : vector<1x8x128xf32> to vector<8x128xf32>
    %275 = vector.shape_cast %272 : vector<8x128xf32> to vector<1x8x128xf32>
    tpu.vector_store %arg13[%c7_93, %c0_94, %c0_95], %275 {strides = array<i32>} : memref<8x8x128xf32, #tpu.memory_space<vmem>>, vector<1x8x128xf32>,
    %cst_96 = arith.constant 0.000000e+00 : f32
    %276 = vector.broadcast %cst_96 : f32 to vector<8x128xf32>
    %cst_97 = arith.constant 0.000000e+00 : f32
    %277 = vector.broadcast %cst_97 : f32 to vector<8x128xf32>
    %c7_98 = arith.constant 7 : index
    %c0_99 = arith.constant 0 : index
    %c0_100 = arith.constant 0 : index
    %278 = vector.load %arg12[%c7_98, %c0_99, %c0_100] : memref<8x8x512xf32, #tpu.memory_space<vmem>>, vector<1x8x512xf32>
    %279 = vector.shape_cast %278 : vector<1x8x512xf32> to vector<8x512xf32>
    %cst_101 = arith.constant dense<0.000000e+00> : vector<8x512xf32>
    %280 = tpu.matmul %276, %17, %cst_101 {dimension_numbers = #tpu.dot_dimension_numbers<[1], [0], [0], [1], [0, 0, 1, 1], [], []>} : vector<8x128xf32>, vector<128x512xf32>, vector<8x512xf32> -> vector<8x512xf32>
    %281 = arith.addf %279, %280 : vector<8x512xf32>
    %282 = vector.extract_strided_slice %281 {offsets = [0, 0], sizes = [8, 128], strides = [1, 1]} : vector<8x512xf32> to vector<8x128xf32>
    %283 = arith.negf %282 : vector<8x128xf32>
    %284 = math.exp %283 : vector<8x128xf32>
    %cst_102 = arith.constant 1.000000e+00 : f32
    %285 = vector.broadcast %cst_102 : f32 to vector<8x128xf32>
    %286 = arith.addf %285, %284 : vector<8x128xf32>
    %287 = arith.divf %285, %286 : vector<8x128xf32>
    %288 = vector.extract_strided_slice %281 {offsets = [0, 128], sizes = [8, 128], strides = [1, 1]} : vector<8x512xf32> to vector<8x128xf32>
    %289 = arith.negf %288 : vector<8x128xf32>
    %290 = math.exp %289 : vector<8x128xf32>
    %cst_103 = arith.constant 1.000000e+00 : f32
    %291 = vector.broadcast %cst_103 : f32 to vector<8x128xf32>
    %292 = arith.addf %291, %290 : vector<8x128xf32>
    %293 = arith.divf %291, %292 : vector<8x128xf32>
    %294 = vector.extract_strided_slice %281 {offsets = [0, 256], sizes = [8, 128], strides = [1, 1]} : vector<8x512xf32> to vector<8x128xf32>
    %295 = math.tanh %294 : vector<8x128xf32>
    %296 = vector.extract_strided_slice %281 {offsets = [0, 384], sizes = [8, 128], strides = [1, 1]} : vector<8x512xf32> to vector<8x128xf32>
    %297 = arith.negf %296 : vector<8x128xf32>
    %298 = math.exp %297 : vector<8x128xf32>
    %cst_104 = arith.constant 1.000000e+00 : f32
    %299 = vector.broadcast %cst_104 : f32 to vector<8x128xf32>
    %300 = arith.addf %299, %298 : vector<8x128xf32>
    %301 = arith.divf %299, %300 : vector<8x128xf32>
    %302 = arith.mulf %293, %277 : vector<8x128xf32>
    %303 = arith.mulf %287, %295 : vector<8x128xf32>
    %304 = arith.addf %302, %303 : vector<8x128xf32>
    %305 = math.tanh %304 : vector<8x128xf32>
    %306 = arith.mulf %301, %305 : vector<8x128xf32>
    %c7_105 = arith.constant 7 : index
    %c0_106 = arith.constant 0 : index
    %c0_107 = arith.constant 0 : index
    %307 = vector.load %arg14[%c7_105, %c0_106, %c0_107] : memref<8x8x128xf32, #tpu.memory_space<vmem>>, vector<1x8x128xf32>
    %308 = vector.shape_cast %307 : vector<1x8x128xf32> to vector<8x128xf32>
    %309 = vector.shape_cast %306 : vector<8x128xf32> to vector<1x8x128xf32>
    tpu.vector_store %arg14[%c7_105, %c0_106, %c0_107], %309 {strides = array<i32>} : memref<8x8x128xf32, #tpu.memory_space<vmem>>, vector<1x8x128xf32>,
    %c6_108 = arith.constant 6 : index
    %c0_109 = arith.constant 0 : index
    %c0_110 = arith.constant 0 : index
    %310 = vector.load %arg12[%c6_108, %c0_109, %c0_110] : memref<8x8x512xf32, #tpu.memory_space<vmem>>, vector<1x8x512xf32>
    %311 = vector.shape_cast %310 : vector<1x8x512xf32> to vector<8x512xf32>
    %cst_111 = arith.constant dense<0.000000e+00> : vector<8x512xf32>
    %312 = tpu.matmul %306, %17, %cst_111 {dimension_numbers = #tpu.dot_dimension_numbers<[1], [0], [0], [1], [0, 0, 1, 1], [], []>} : vector<8x128xf32>, vector<128x512xf32>, vector<8x512xf32> -> vector<8x512xf32>
    %313 = arith.addf %311, %312 : vector<8x512xf32>
    %314 = vector.extract_strided_slice %313 {offsets = [0, 0], sizes = [8, 128], strides = [1, 1]} : vector<8x512xf32> to vector<8x128xf32>
    %315 = arith.negf %314 : vector<8x128xf32>
    %316 = math.exp %315 : vector<8x128xf32>
    %cst_112 = arith.constant 1.000000e+00 : f32
    %317 = vector.broadcast %cst_112 : f32 to vector<8x128xf32>
    %318 = arith.addf %317, %316 : vector<8x128xf32>
    %319 = arith.divf %317, %318 : vector<8x128xf32>
    %320 = vector.extract_strided_slice %313 {offsets = [0, 128], sizes = [8, 128], strides = [1, 1]} : vector<8x512xf32> to vector<8x128xf32>
    %321 = arith.negf %320 : vector<8x128xf32>
    %322 = math.exp %321 : vector<8x128xf32>
    %cst_113 = arith.constant 1.000000e+00 : f32
    %323 = vector.broadcast %cst_113 : f32 to vector<8x128xf32>
    %324 = arith.addf %323, %322 : vector<8x128xf32>
    %325 = arith.divf %323, %324 : vector<8x128xf32>
    %326 = vector.extract_strided_slice %313 {offsets = [0, 256], sizes = [8, 128], strides = [1, 1]} : vector<8x512xf32> to vector<8x128xf32>
    %327 = math.tanh %326 : vector<8x128xf32>
    %328 = vector.extract_strided_slice %313 {offsets = [0, 384], sizes = [8, 128], strides = [1, 1]} : vector<8x512xf32> to vector<8x128xf32>
    %329 = arith.negf %328 : vector<8x128xf32>
    %330 = math.exp %329 : vector<8x128xf32>
    %cst_114 = arith.constant 1.000000e+00 : f32
    %331 = vector.broadcast %cst_114 : f32 to vector<8x128xf32>
    %332 = arith.addf %331, %330 : vector<8x128xf32>
    %333 = arith.divf %331, %332 : vector<8x128xf32>
    %334 = arith.mulf %325, %304 : vector<8x128xf32>
    %335 = arith.mulf %319, %327 : vector<8x128xf32>
    %336 = arith.addf %334, %335 : vector<8x128xf32>
    %337 = math.tanh %336 : vector<8x128xf32>
    %338 = arith.mulf %333, %337 : vector<8x128xf32>
    %c6_115 = arith.constant 6 : index
    %c0_116 = arith.constant 0 : index
    %c0_117 = arith.constant 0 : index
    %339 = vector.load %arg14[%c6_115, %c0_116, %c0_117] : memref<8x8x128xf32, #tpu.memory_space<vmem>>, vector<1x8x128xf32>
    %340 = vector.shape_cast %339 : vector<1x8x128xf32> to vector<8x128xf32>
    %341 = vector.shape_cast %338 : vector<8x128xf32> to vector<1x8x128xf32>
    tpu.vector_store %arg14[%c6_115, %c0_116, %c0_117], %341 {strides = array<i32>} : memref<8x8x128xf32, #tpu.memory_space<vmem>>, vector<1x8x128xf32>,
    %c5_118 = arith.constant 5 : index
    %c0_119 = arith.constant 0 : index
    %c0_120 = arith.constant 0 : index
    %342 = vector.load %arg12[%c5_118, %c0_119, %c0_120] : memref<8x8x512xf32, #tpu.memory_space<vmem>>, vector<1x8x512xf32>
    %343 = vector.shape_cast %342 : vector<1x8x512xf32> to vector<8x512xf32>
    %cst_121 = arith.constant dense<0.000000e+00> : vector<8x512xf32>
    %344 = tpu.matmul %338, %17, %cst_121 {dimension_numbers = #tpu.dot_dimension_numbers<[1], [0], [0], [1], [0, 0, 1, 1], [], []>} : vector<8x128xf32>, vector<128x512xf32>, vector<8x512xf32> -> vector<8x512xf32>
    %345 = arith.addf %343, %344 : vector<8x512xf32>
    %346 = vector.extract_strided_slice %345 {offsets = [0, 0], sizes = [8, 128], strides = [1, 1]} : vector<8x512xf32> to vector<8x128xf32>
    %347 = arith.negf %346 : vector<8x128xf32>
    %348 = math.exp %347 : vector<8x128xf32>
    %cst_122 = arith.constant 1.000000e+00 : f32
    %349 = vector.broadcast %cst_122 : f32 to vector<8x128xf32>
    %350 = arith.addf %349, %348 : vector<8x128xf32>
    %351 = arith.divf %349, %350 : vector<8x128xf32>
    %352 = vector.extract_strided_slice %345 {offsets = [0, 128], sizes = [8, 128], strides = [1, 1]} : vector<8x512xf32> to vector<8x128xf32>
    %353 = arith.negf %352 : vector<8x128xf32>
    %354 = math.exp %353 : vector<8x128xf32>
    %cst_123 = arith.constant 1.000000e+00 : f32
    %355 = vector.broadcast %cst_123 : f32 to vector<8x128xf32>
    %356 = arith.addf %355, %354 : vector<8x128xf32>
    %357 = arith.divf %355, %356 : vector<8x128xf32>
    %358 = vector.extract_strided_slice %345 {offsets = [0, 256], sizes = [8, 128], strides = [1, 1]} : vector<8x512xf32> to vector<8x128xf32>
    %359 = math.tanh %358 : vector<8x128xf32>
    %360 = vector.extract_strided_slice %345 {offsets = [0, 384], sizes = [8, 128], strides = [1, 1]} : vector<8x512xf32> to vector<8x128xf32>
    %361 = arith.negf %360 : vector<8x128xf32>
    %362 = math.exp %361 : vector<8x128xf32>
    %cst_124 = arith.constant 1.000000e+00 : f32
    %363 = vector.broadcast %cst_124 : f32 to vector<8x128xf32>
    %364 = arith.addf %363, %362 : vector<8x128xf32>
    %365 = arith.divf %363, %364 : vector<8x128xf32>
    %366 = arith.mulf %357, %336 : vector<8x128xf32>
    %367 = arith.mulf %351, %359 : vector<8x128xf32>
    %368 = arith.addf %366, %367 : vector<8x128xf32>
    %369 = math.tanh %368 : vector<8x128xf32>
    %370 = arith.mulf %365, %369 : vector<8x128xf32>
    %c5_125 = arith.constant 5 : index
    %c0_126 = arith.constant 0 : index
    %c0_127 = arith.constant 0 : index
    %371 = vector.load %arg14[%c5_125, %c0_126, %c0_127] : memref<8x8x128xf32, #tpu.memory_space<vmem>>, vector<1x8x128xf32>
    %372 = vector.shape_cast %371 : vector<1x8x128xf32> to vector<8x128xf32>
    %373 = vector.shape_cast %370 : vector<8x128xf32> to vector<1x8x128xf32>
    tpu.vector_store %arg14[%c5_125, %c0_126, %c0_127], %373 {strides = array<i32>} : memref<8x8x128xf32, #tpu.memory_space<vmem>>, vector<1x8x128xf32>,
    %c4_128 = arith.constant 4 : index
    %c0_129 = arith.constant 0 : index
    %c0_130 = arith.constant 0 : index
    %374 = vector.load %arg12[%c4_128, %c0_129, %c0_130] : memref<8x8x512xf32, #tpu.memory_space<vmem>>, vector<1x8x512xf32>
    %375 = vector.shape_cast %374 : vector<1x8x512xf32> to vector<8x512xf32>
    %cst_131 = arith.constant dense<0.000000e+00> : vector<8x512xf32>
    %376 = tpu.matmul %370, %17, %cst_131 {dimension_numbers = #tpu.dot_dimension_numbers<[1], [0], [0], [1], [0, 0, 1, 1], [], []>} : vector<8x128xf32>, vector<128x512xf32>, vector<8x512xf32> -> vector<8x512xf32>
    %377 = arith.addf %375, %376 : vector<8x512xf32>
    %378 = vector.extract_strided_slice %377 {offsets = [0, 0], sizes = [8, 128], strides = [1, 1]} : vector<8x512xf32> to vector<8x128xf32>
    %379 = arith.negf %378 : vector<8x128xf32>
    %380 = math.exp %379 : vector<8x128xf32>
    %cst_132 = arith.constant 1.000000e+00 : f32
    %381 = vector.broadcast %cst_132 : f32 to vector<8x128xf32>
    %382 = arith.addf %381, %380 : vector<8x128xf32>
    %383 = arith.divf %381, %382 : vector<8x128xf32>
    %384 = vector.extract_strided_slice %377 {offsets = [0, 128], sizes = [8, 128], strides = [1, 1]} : vector<8x512xf32> to vector<8x128xf32>
    %385 = arith.negf %384 : vector<8x128xf32>
    %386 = math.exp %385 : vector<8x128xf32>
    %cst_133 = arith.constant 1.000000e+00 : f32
    %387 = vector.broadcast %cst_133 : f32 to vector<8x128xf32>
    %388 = arith.addf %387, %386 : vector<8x128xf32>
    %389 = arith.divf %387, %388 : vector<8x128xf32>
    %390 = vector.extract_strided_slice %377 {offsets = [0, 256], sizes = [8, 128], strides = [1, 1]} : vector<8x512xf32> to vector<8x128xf32>
    %391 = math.tanh %390 : vector<8x128xf32>
    %392 = vector.extract_strided_slice %377 {offsets = [0, 384], sizes = [8, 128], strides = [1, 1]} : vector<8x512xf32> to vector<8x128xf32>
    %393 = arith.negf %392 : vector<8x128xf32>
    %394 = math.exp %393 : vector<8x128xf32>
    %cst_134 = arith.constant 1.000000e+00 : f32
    %395 = vector.broadcast %cst_134 : f32 to vector<8x128xf32>
    %396 = arith.addf %395, %394 : vector<8x128xf32>
    %397 = arith.divf %395, %396 : vector<8x128xf32>
    %398 = arith.mulf %389, %368 : vector<8x128xf32>
    %399 = arith.mulf %383, %391 : vector<8x128xf32>
    %400 = arith.addf %398, %399 : vector<8x128xf32>
    %401 = math.tanh %400 : vector<8x128xf32>
    %402 = arith.mulf %397, %401 : vector<8x128xf32>
    %c4_135 = arith.constant 4 : index
    %c0_136 = arith.constant 0 : index
    %c0_137 = arith.constant 0 : index
    %403 = vector.load %arg14[%c4_135, %c0_136, %c0_137] : memref<8x8x128xf32, #tpu.memory_space<vmem>>, vector<1x8x128xf32>
    %404 = vector.shape_cast %403 : vector<1x8x128xf32> to vector<8x128xf32>
    %405 = vector.shape_cast %402 : vector<8x128xf32> to vector<1x8x128xf32>
    tpu.vector_store %arg14[%c4_135, %c0_136, %c0_137], %405 {strides = array<i32>} : memref<8x8x128xf32, #tpu.memory_space<vmem>>, vector<1x8x128xf32>,
    %c3_138 = arith.constant 3 : index
    %c0_139 = arith.constant 0 : index
    %c0_140 = arith.constant 0 : index
    %406 = vector.load %arg12[%c3_138, %c0_139, %c0_140] : memref<8x8x512xf32, #tpu.memory_space<vmem>>, vector<1x8x512xf32>
    %407 = vector.shape_cast %406 : vector<1x8x512xf32> to vector<8x512xf32>
    %cst_141 = arith.constant dense<0.000000e+00> : vector<8x512xf32>
    %408 = tpu.matmul %402, %17, %cst_141 {dimension_numbers = #tpu.dot_dimension_numbers<[1], [0], [0], [1], [0, 0, 1, 1], [], []>} : vector<8x128xf32>, vector<128x512xf32>, vector<8x512xf32> -> vector<8x512xf32>
    %409 = arith.addf %407, %408 : vector<8x512xf32>
    %410 = vector.extract_strided_slice %409 {offsets = [0, 0], sizes = [8, 128], strides = [1, 1]} : vector<8x512xf32> to vector<8x128xf32>
    %411 = arith.negf %410 : vector<8x128xf32>
    %412 = math.exp %411 : vector<8x128xf32>
    %cst_142 = arith.constant 1.000000e+00 : f32
    %413 = vector.broadcast %cst_142 : f32 to vector<8x128xf32>
    %414 = arith.addf %413, %412 : vector<8x128xf32>
    %415 = arith.divf %413, %414 : vector<8x128xf32>
    %416 = vector.extract_strided_slice %409 {offsets = [0, 128], sizes = [8, 128], strides = [1, 1]} : vector<8x512xf32> to vector<8x128xf32>
    %417 = arith.negf %416 : vector<8x128xf32>
    %418 = math.exp %417 : vector<8x128xf32>
    %cst_143 = arith.constant 1.000000e+00 : f32
    %419 = vector.broadcast %cst_143 : f32 to vector<8x128xf32>
    %420 = arith.addf %419, %418 : vector<8x128xf32>
    %421 = arith.divf %419, %420 : vector<8x128xf32>
    %422 = vector.extract_strided_slice %409 {offsets = [0, 256], sizes = [8, 128], strides = [1, 1]} : vector<8x512xf32> to vector<8x128xf32>
    %423 = math.tanh %422 : vector<8x128xf32>
    %424 = vector.extract_strided_slice %409 {offsets = [0, 384], sizes = [8, 128], strides = [1, 1]} : vector<8x512xf32> to vector<8x128xf32>
    %425 = arith.negf %424 : vector<8x128xf32>
    %426 = math.exp %425 : vector<8x128xf32>
    %cst_144 = arith.constant 1.000000e+00 : f32
    %427 = vector.broadcast %cst_144 : f32 to vector<8x128xf32>
    %428 = arith.addf %427, %426 : vector<8x128xf32>
    %429 = arith.divf %427, %428 : vector<8x128xf32>
    %430 = arith.mulf %421, %400 : vector<8x128xf32>
    %431 = arith.mulf %415, %423 : vector<8x128xf32>
    %432 = arith.addf %430, %431 : vector<8x128xf32>
    %433 = math.tanh %432 : vector<8x128xf32>
    %434 = arith.mulf %429, %433 : vector<8x128xf32>
    %c3_145 = arith.constant 3 : index
    %c0_146 = arith.constant 0 : index
    %c0_147 = arith.constant 0 : index
    %435 = vector.load %arg14[%c3_145, %c0_146, %c0_147] : memref<8x8x128xf32, #tpu.memory_space<vmem>>, vector<1x8x128xf32>
    %436 = vector.shape_cast %435 : vector<1x8x128xf32> to vector<8x128xf32>
    %437 = vector.shape_cast %434 : vector<8x128xf32> to vector<1x8x128xf32>
    tpu.vector_store %arg14[%c3_145, %c0_146, %c0_147], %437 {strides = array<i32>} : memref<8x8x128xf32, #tpu.memory_space<vmem>>, vector<1x8x128xf32>,
    %c2_148 = arith.constant 2 : index
    %c0_149 = arith.constant 0 : index
    %c0_150 = arith.constant 0 : index
    %438 = vector.load %arg12[%c2_148, %c0_149, %c0_150] : memref<8x8x512xf32, #tpu.memory_space<vmem>>, vector<1x8x512xf32>
    %439 = vector.shape_cast %438 : vector<1x8x512xf32> to vector<8x512xf32>
    %cst_151 = arith.constant dense<0.000000e+00> : vector<8x512xf32>
    %440 = tpu.matmul %434, %17, %cst_151 {dimension_numbers = #tpu.dot_dimension_numbers<[1], [0], [0], [1], [0, 0, 1, 1], [], []>} : vector<8x128xf32>, vector<128x512xf32>, vector<8x512xf32> -> vector<8x512xf32>
    %441 = arith.addf %439, %440 : vector<8x512xf32>
    %442 = vector.extract_strided_slice %441 {offsets = [0, 0], sizes = [8, 128], strides = [1, 1]} : vector<8x512xf32> to vector<8x128xf32>
    %443 = arith.negf %442 : vector<8x128xf32>
    %444 = math.exp %443 : vector<8x128xf32>
    %cst_152 = arith.constant 1.000000e+00 : f32
    %445 = vector.broadcast %cst_152 : f32 to vector<8x128xf32>
    %446 = arith.addf %445, %444 : vector<8x128xf32>
    %447 = arith.divf %445, %446 : vector<8x128xf32>
    %448 = vector.extract_strided_slice %441 {offsets = [0, 128], sizes = [8, 128], strides = [1, 1]} : vector<8x512xf32> to vector<8x128xf32>
    %449 = arith.negf %448 : vector<8x128xf32>
    %450 = math.exp %449 : vector<8x128xf32>
    %cst_153 = arith.constant 1.000000e+00 : f32
    %451 = vector.broadcast %cst_153 : f32 to vector<8x128xf32>
    %452 = arith.addf %451, %450 : vector<8x128xf32>
    %453 = arith.divf %451, %452 : vector<8x128xf32>
    %454 = vector.extract_strided_slice %441 {offsets = [0, 256], sizes = [8, 128], strides = [1, 1]} : vector<8x512xf32> to vector<8x128xf32>
    %455 = math.tanh %454 : vector<8x128xf32>
    %456 = vector.extract_strided_slice %441 {offsets = [0, 384], sizes = [8, 128], strides = [1, 1]} : vector<8x512xf32> to vector<8x128xf32>
    %457 = arith.negf %456 : vector<8x128xf32>
    %458 = math.exp %457 : vector<8x128xf32>
    %cst_154 = arith.constant 1.000000e+00 : f32
    %459 = vector.broadcast %cst_154 : f32 to vector<8x128xf32>
    %460 = arith.addf %459, %458 : vector<8x128xf32>
    %461 = arith.divf %459, %460 : vector<8x128xf32>
    %462 = arith.mulf %453, %432 : vector<8x128xf32>
    %463 = arith.mulf %447, %455 : vector<8x128xf32>
    %464 = arith.addf %462, %463 : vector<8x128xf32>
    %465 = math.tanh %464 : vector<8x128xf32>
    %466 = arith.mulf %461, %465 : vector<8x128xf32>
    %c2_155 = arith.constant 2 : index
    %c0_156 = arith.constant 0 : index
    %c0_157 = arith.constant 0 : index
    %467 = vector.load %arg14[%c2_155, %c0_156, %c0_157] : memref<8x8x128xf32, #tpu.memory_space<vmem>>, vector<1x8x128xf32>
    %468 = vector.shape_cast %467 : vector<1x8x128xf32> to vector<8x128xf32>
    %469 = vector.shape_cast %466 : vector<8x128xf32> to vector<1x8x128xf32>
    tpu.vector_store %arg14[%c2_155, %c0_156, %c0_157], %469 {strides = array<i32>} : memref<8x8x128xf32, #tpu.memory_space<vmem>>, vector<1x8x128xf32>,
    %c1_158 = arith.constant 1 : index
    %c0_159 = arith.constant 0 : index
    %c0_160 = arith.constant 0 : index
    %470 = vector.load %arg12[%c1_158, %c0_159, %c0_160] : memref<8x8x512xf32, #tpu.memory_space<vmem>>, vector<1x8x512xf32>
    %471 = vector.shape_cast %470 : vector<1x8x512xf32> to vector<8x512xf32>
    %cst_161 = arith.constant dense<0.000000e+00> : vector<8x512xf32>
    %472 = tpu.matmul %466, %17, %cst_161 {dimension_numbers = #tpu.dot_dimension_numbers<[1], [0], [0], [1], [0, 0, 1, 1], [], []>} : vector<8x128xf32>, vector<128x512xf32>, vector<8x512xf32> -> vector<8x512xf32>
    %473 = arith.addf %471, %472 : vector<8x512xf32>
    %474 = vector.extract_strided_slice %473 {offsets = [0, 0], sizes = [8, 128], strides = [1, 1]} : vector<8x512xf32> to vector<8x128xf32>
    %475 = arith.negf %474 : vector<8x128xf32>
    %476 = math.exp %475 : vector<8x128xf32>
    %cst_162 = arith.constant 1.000000e+00 : f32
    %477 = vector.broadcast %cst_162 : f32 to vector<8x128xf32>
    %478 = arith.addf %477, %476 : vector<8x128xf32>
    %479 = arith.divf %477, %478 : vector<8x128xf32>
    %480 = vector.extract_strided_slice %473 {offsets = [0, 128], sizes = [8, 128], strides = [1, 1]} : vector<8x512xf32> to vector<8x128xf32>
    %481 = arith.negf %480 : vector<8x128xf32>
    %482 = math.exp %481 : vector<8x128xf32>
    %cst_163 = arith.constant 1.000000e+00 : f32
    %483 = vector.broadcast %cst_163 : f32 to vector<8x128xf32>
    %484 = arith.addf %483, %482 : vector<8x128xf32>
    %485 = arith.divf %483, %484 : vector<8x128xf32>
    %486 = vector.extract_strided_slice %473 {offsets = [0, 256], sizes = [8, 128], strides = [1, 1]} : vector<8x512xf32> to vector<8x128xf32>
    %487 = math.tanh %486 : vector<8x128xf32>
    %488 = vector.extract_strided_slice %473 {offsets = [0, 384], sizes = [8, 128], strides = [1, 1]} : vector<8x512xf32> to vector<8x128xf32>
    %489 = arith.negf %488 : vector<8x128xf32>
    %490 = math.exp %489 : vector<8x128xf32>
    %cst_164 = arith.constant 1.000000e+00 : f32
    %491 = vector.broadcast %cst_164 : f32 to vector<8x128xf32>
    %492 = arith.addf %491, %490 : vector<8x128xf32>
    %493 = arith.divf %491, %492 : vector<8x128xf32>
    %494 = arith.mulf %485, %464 : vector<8x128xf32>
    %495 = arith.mulf %479, %487 : vector<8x128xf32>
    %496 = arith.addf %494, %495 : vector<8x128xf32>
    %497 = math.tanh %496 : vector<8x128xf32>
    %498 = arith.mulf %493, %497 : vector<8x128xf32>
    %c1_165 = arith.constant 1 : index
    %c0_166 = arith.constant 0 : index
    %c0_167 = arith.constant 0 : index
    %499 = vector.load %arg14[%c1_165, %c0_166, %c0_167] : memref<8x8x128xf32, #tpu.memory_space<vmem>>, vector<1x8x128xf32>
    %500 = vector.shape_cast %499 : vector<1x8x128xf32> to vector<8x128xf32>
    %501 = vector.shape_cast %498 : vector<8x128xf32> to vector<1x8x128xf32>
    tpu.vector_store %arg14[%c1_165, %c0_166, %c0_167], %501 {strides = array<i32>} : memref<8x8x128xf32, #tpu.memory_space<vmem>>, vector<1x8x128xf32>,
    %c0_168 = arith.constant 0 : index
    %c0_169 = arith.constant 0 : index
    %c0_170 = arith.constant 0 : index
    %502 = vector.load %arg12[%c0_168, %c0_169, %c0_170] : memref<8x8x512xf32, #tpu.memory_space<vmem>>, vector<1x8x512xf32>
    %503 = vector.shape_cast %502 : vector<1x8x512xf32> to vector<8x512xf32>
    %cst_171 = arith.constant dense<0.000000e+00> : vector<8x512xf32>
    %504 = tpu.matmul %498, %17, %cst_171 {dimension_numbers = #tpu.dot_dimension_numbers<[1], [0], [0], [1], [0, 0, 1, 1], [], []>} : vector<8x128xf32>, vector<128x512xf32>, vector<8x512xf32> -> vector<8x512xf32>
    %505 = arith.addf %503, %504 : vector<8x512xf32>
    %506 = vector.extract_strided_slice %505 {offsets = [0, 0], sizes = [8, 128], strides = [1, 1]} : vector<8x512xf32> to vector<8x128xf32>
    %507 = arith.negf %506 : vector<8x128xf32>
    %508 = math.exp %507 : vector<8x128xf32>
    %cst_172 = arith.constant 1.000000e+00 : f32
    %509 = vector.broadcast %cst_172 : f32 to vector<8x128xf32>
    %510 = arith.addf %509, %508 : vector<8x128xf32>
    %511 = arith.divf %509, %510 : vector<8x128xf32>
    %512 = vector.extract_strided_slice %505 {offsets = [0, 128], sizes = [8, 128], strides = [1, 1]} : vector<8x512xf32> to vector<8x128xf32>
    %513 = arith.negf %512 : vector<8x128xf32>
    %514 = math.exp %513 : vector<8x128xf32>
    %cst_173 = arith.constant 1.000000e+00 : f32
    %515 = vector.broadcast %cst_173 : f32 to vector<8x128xf32>
    %516 = arith.addf %515, %514 : vector<8x128xf32>
    %517 = arith.divf %515, %516 : vector<8x128xf32>
    %518 = vector.extract_strided_slice %505 {offsets = [0, 256], sizes = [8, 128], strides = [1, 1]} : vector<8x512xf32> to vector<8x128xf32>
    %519 = math.tanh %518 : vector<8x128xf32>
    %520 = vector.extract_strided_slice %505 {offsets = [0, 384], sizes = [8, 128], strides = [1, 1]} : vector<8x512xf32> to vector<8x128xf32>
    %521 = arith.negf %520 : vector<8x128xf32>
    %522 = math.exp %521 : vector<8x128xf32>
    %cst_174 = arith.constant 1.000000e+00 : f32
    %523 = vector.broadcast %cst_174 : f32 to vector<8x128xf32>
    %524 = arith.addf %523, %522 : vector<8x128xf32>
    %525 = arith.divf %523, %524 : vector<8x128xf32>
    %526 = arith.mulf %517, %496 : vector<8x128xf32>
    %527 = arith.mulf %511, %519 : vector<8x128xf32>
    %528 = arith.addf %526, %527 : vector<8x128xf32>
    %529 = math.tanh %528 : vector<8x128xf32>
    %530 = arith.mulf %525, %529 : vector<8x128xf32>
    %c0_175 = arith.constant 0 : index
    %c0_176 = arith.constant 0 : index
    %c0_177 = arith.constant 0 : index
    %531 = vector.load %arg14[%c0_175, %c0_176, %c0_177] : memref<8x8x128xf32, #tpu.memory_space<vmem>>, vector<1x8x128xf32>
    %532 = vector.shape_cast %531 : vector<1x8x128xf32> to vector<8x128xf32>
    %533 = vector.shape_cast %530 : vector<8x128xf32> to vector<1x8x128xf32>
    tpu.vector_store %arg14[%c0_175, %c0_176, %c0_177], %533 {strides = array<i32>} : memref<8x8x128xf32, #tpu.memory_space<vmem>>, vector<1x8x128xf32>,
    %c0_178 = arith.constant 0 : index
    %c0_179 = arith.constant 0 : index
    %c0_180 = arith.constant 0 : index
    %534 = vector.load %arg13[%c0_178, %c0_179, %c0_180] : memref<8x8x128xf32, #tpu.memory_space<vmem>>, vector<8x8x128xf32>
    %535 = vector.shape_cast %534 : vector<8x8x128xf32> to vector<64x128xf32>
    %c0_181 = arith.constant 0 : index
    %c0_182 = arith.constant 0 : index
    %c0_183 = arith.constant 0 : index
    %536 = vector.load %arg14[%c0_181, %c0_182, %c0_183] : memref<8x8x128xf32, #tpu.memory_space<vmem>>, vector<8x8x128xf32>
    %537 = vector.shape_cast %536 : vector<8x8x128xf32> to vector<64x128xf32>
    %c0_184 = arith.constant 0 : index
    %c0_185 = arith.constant 0 : index
    %538 = vector.load %arg8[%c0_184, %c0_185] : memref<128x128xf32, #tpu.memory_space<vmem>>, vector<128x128xf32>
    %cst_186 = arith.constant dense<0.000000e+00> : vector<64x128xf32>
    %539 = tpu.matmul %535, %538, %cst_186 {dimension_numbers = #tpu.dot_dimension_numbers<[1], [0], [0], [1], [0, 0, 1, 1], [], []>} : vector<64x128xf32>, vector<128x128xf32>, vector<64x128xf32> -> vector<64x128xf32>
    %c0_187 = arith.constant 0 : index
    %c0_188 = arith.constant 0 : index
    %540 = vector.load %arg9[%c0_187, %c0_188] : memref<128x128xf32, #tpu.memory_space<vmem>>, vector<128x128xf32>
    %cst_189 = arith.constant dense<0.000000e+00> : vector<64x128xf32>
    %541 = tpu.matmul %537, %540, %cst_189 {dimension_numbers = #tpu.dot_dimension_numbers<[1], [0], [0], [1], [0, 0, 1, 1], [], []>} : vector<64x128xf32>, vector<128x128xf32>, vector<64x128xf32> -> vector<64x128xf32>
    %542 = arith.addf %539, %541 : vector<64x128xf32>
    %cst_190 = arith.constant 0.000000e+00 : f32
    %543 = vector.broadcast %cst_190 : f32 to vector<64x128xf32>
    %544 = arith.maximumf %542, %543 : vector<64x128xf32>
    %545 = vector.shape_cast %544 : vector<64x128xf32> to vector<8x8x128xf32>
    %c0_191 = arith.constant 0 : index
    %c0_192 = arith.constant 0 : index
    %c0_193 = arith.constant 0 : index
    %546 = vector.load %arg10[%c0_191, %c0_192, %c0_193] : memref<8x8x128xf32, #tpu.memory_space<vmem>>, vector<8x8x128xf32>
    tpu.vector_store %arg10[%c0_191, %c0_192, %c0_193], %545 {strides = array<i32>} : memref<8x8x128xf32, #tpu.memory_space<vmem>>, vector<8x8x128xf32>,
    return
  }
  func.func @transform_0(%arg0: i32) -> (i32, i32, i32) {
    %c0_i32 = arith.constant 0 : i32
    %c0_i32_0 = arith.constant 0 : i32
    %c0_i32_1 = arith.constant 0 : i32
    %c0_i32_2 = arith.constant 0 : i32
    return %c0_i32, %c0_i32_0, %c0_i32_1 : i32, i32, i32
  }
  func.func @transform_1(%arg0: i32) -> (i32, i32) {
    %c0_i32 = arith.constant 0 : i32
    %c0_i32_0 = arith.constant 0 : i32
    %c0_i32_1 = arith.constant 0 : i32
    return %c0_i32, %c0_i32_0 : i32, i32
  }
  func.func @transform_2(%arg0: i32) -> (i32, i32) {
    %c0_i32 = arith.constant 0 : i32
    %c0_i32_0 = arith.constant 0 : i32
    %c0_i32_1 = arith.constant 0 : i32
    return %c0_i32, %c0_i32_0 : i32, i32
  }
  func.func @transform_3(%arg0: i32) -> (i32, i32) {
    %c0_i32 = arith.constant 0 : i32
    %c0_i32_0 = arith.constant 0 : i32
    %c0_i32_1 = arith.constant 0 : i32
    return %c0_i32, %c0_i32_0 : i32, i32
  }
  func.func @transform_4(%arg0: i32) -> (i32, i32) {
    %c0_i32 = arith.constant 0 : i32
    %c0_i32_0 = arith.constant 0 : i32
    %c0_i32_1 = arith.constant 0 : i32
    return %c0_i32, %c0_i32_0 : i32, i32
  }
  func.func @transform_5(%arg0: i32) -> (i32, i32) {
    %c0_i32 = arith.constant 0 : i32
    %c0_i32_0 = arith.constant 0 : i32
    %c0_i32_1 = arith.constant 0 : i32
    return %c0_i32, %c0_i32_0 : i32, i32
  }
  func.func @transform_6(%arg0: i32) -> (i32, i32) {
    %c0_i32 = arith.constant 0 : i32
    %c0_i32_0 = arith.constant 0 : i32
    %c0_i32_1 = arith.constant 0 : i32
    return %c0_i32, %c0_i32_0 : i32, i32
  }
  func.func @transform_7(%arg0: i32) -> (i32, i32) {
    %c0_i32 = arith.constant 0 : i32
    %c0_i32_0 = arith.constant 0 : i32
    %c0_i32_1 = arith.constant 0 : i32
    return %c0_i32, %c0_i32_0 : i32, i32
  }
  func.func @transform_8(%arg0: i32) -> (i32, i32) {
    %c0_i32 = arith.constant 0 : i32
    %c0_i32_0 = arith.constant 0 : i32
    %c0_i32_1 = arith.constant 0 : i32
    return %c0_i32, %c0_i32_0 : i32, i32
  }
  func.func @transform_9(%arg0: i32) -> (i32, i32, i32) {
    %c0_i32 = arith.constant 0 : i32
    %c0_i32_0 = arith.constant 0 : i32
    %c0_i32_1 = arith.constant 0 : i32
    %c0_i32_2 = arith.constant 0 : i32
    return %c0_i32, %c0_i32_0, %c0_i32_1 : i32, i32, i32
  }
}

</mosaic_0001>

<bundles_post_ra>
// kernel: tpu_custom_call.1
= control target key start
LH: loop header
LB: loop body
LE: loop exit
PB: predicated region body
PF: predicated region fallthrough
CT: control target
= control target key end

     0   :  { %14 = vsyncpa [#allocation7], 0  ;;  %s6405_s0 = inlined_call_operand.hbm [shape: f32[8,8,16], index: 0, kind: input, shape index: {}]   ;;  %s6406_s1 = inlined_call_operand.hbm [shape: f32[16,512], index: 1, kind: input, shape index: {}]   ;;  %s6407_s2 = inlined_call_operand.hbm [shape: f32[1,512], index: 2, kind: input, shape index: {}]   ;;  %s6408_s3 = inlined_call_operand.hbm [shape: f32[128,512], index: 3, kind: input, shape index: {}]   ;;  %s6409_s4 = inlined_call_operand.hbm [shape: f32[16,512], index: 4, kind: input, shape index: {}]   ;;  %s6410_s5 = inlined_call_operand.vmem [shape: f32[1,512], index: 5, kind: input, shape index: {}]   ;;  %s6411_s6 = inlined_call_operand.hbm [shape: f32[128,512], index: 6, kind: input, shape index: {}]   ;;  %s6412_s7 = inlined_call_operand.hbm [shape: f32[128,128], index: 7, kind: input, shape index: {}]   ;;  %s6413_s8 = inlined_call_operand.hbm [shape: f32[128,128], index: 8, kind: input, shape index: {}]   ;;  %s6414_s9 = inlined_call_operand.hbm [shape: f32[8,8,128], index: 9, kind: output, shape index: {}]  }
   0x1   :  { %15 = vsyncpa [#allocation10], 0 }
   0x2   :  { %16 = vsyncpa [#allocation13], 0 }
   0x3   :  { %17 = vsyncpa [#allocation16], 0 }
   0x4   :  { %18 = vsyncpa [#allocation19], 0  ;;  %s37_s11 = sshll.u32 %s6406_s1, 4  ;;  %s38_s11 = int_to_ptr.hbm [resolvable:$true] %s37_s11 }
   0x5   :  { %19 = vsyncpa [#allocation8], 0  ;;  %s4117_s12 = smov [#allocation9]   ;;  %s61_s16 = sshll.u32 %s6408_s3, 4  ;;  %s62_s16 = int_to_ptr.hbm [resolvable:$true] %s61_s16 }
   0x6   :  { %s39_s13 = sshll.u32 %s4117_s12, 4  ;;  %s4118_s17 = smov 512   ;;  %s40_s13 = int_to_ptr.vmem [resolvable:$true] %s39_s13 }
   0x7   :  { %s4119_s18 = smov 32   ;;  %s4120_s19 = smov [#allocation12]  }
   0x8   :  { %45 = dma.hbm_to_vmem [thread:$0]  %s38_s11, 1024, %s40_s13, [#allocation10], %s4118_s17, %s4118_s17, %s4119_s18  }
   0x9   :  { %s63_s20 = sshll.u32 %s4120_s19, 4  ;;  %s89_s22 = sshll.u32 %s6411_s6, 4  ;;  %s64_s20 = int_to_ptr.vmem [resolvable:$true] %s63_s20  ;;  %s90_s22 = int_to_ptr.hbm [resolvable:$true] %s89_s22 }
   0xa   :  { %69 = dma.hbm_to_vmem [thread:$0]  %s62_s16, 8192, %s64_s20, [#allocation13], %s4118_s17, %s4118_s17, %s4119_s18  }
   0xb   :  { %s24_s24 = sshll.u32 %s6405_s0, 4  ;;  %s4121_s25 = smov [#allocation15]   ;;  %s25_s24 = int_to_ptr.hbm [resolvable:$true] %s24_s24 }
   0xc   :  { %s91_s26 = sshll.u32 %s4121_s25, 4  ;;  %s4122_s27 = smov [#allocation6]   ;;  %s92_s26 = int_to_ptr.vmem [resolvable:$true] %s91_s26 }
   0xd   :  { %97 = dma.hbm_to_vmem [thread:$0]  %s90_s22, 8192, %s92_s26, [#allocation16], %s4118_s17, %s4118_s17, %s4119_s18  }
   0xe   :  { %s26_s6 = sshll.u32 %s4122_s27, 4  ;;  %s4123_s28 = smov 128   ;;  %s27_s6 = int_to_ptr.vmem [resolvable:$true] %s26_s6 }
   0xf   :  { %s4124_s29 = smov 8   ;;  %s51_s0 = sshll.u32 %s6407_s2, 4  ;;  %s52_s0 = int_to_ptr.hbm [resolvable:$true] %s51_s0 }
  0x10   :  { %32 = dma.hbm_to_vmem [thread:$0]  %s25_s24, 1024, %s27_s6, [#allocation7], %s4123_s28, %s4123_s28, %s4124_s29  }
  0x11   :  { %s4125_s11 = smov [#allocation11]   ;;  %s74_s15 = sshll.u32 %s6409_s4, 4  ;;  %s75_s15 = int_to_ptr.hbm [resolvable:$true] %s74_s15 }
  0x12   :  { %s53_s12 = sshll.u32 %s4125_s11, 4  ;;  %s4126_s16 = smov [#allocation14]   ;;  %s54_s12 = int_to_ptr.vmem [resolvable:$true] %s53_s12 }
  0x13   :  { %56 = dma.hbm_to_vmem [thread:$0]  %s52_s0, 64, %s54_s12, [#allocation10]  }
  0x14   :  { %s76_s19 = sshll.u32 %s4126_s16, 4  ;;  %s102_s1 = sshll.u32 %s6412_s7, 4  ;;  %s77_s19 = int_to_ptr.vmem [resolvable:$true] %s76_s19  ;;  %s103_s1 = int_to_ptr.hbm [resolvable:$true] %s102_s1 }
  0x15   :  { %82 = dma.hbm_to_vmem [thread:$0]  %s75_s15, 1024, %s77_s19, [#allocation13], %s4118_s17, %s4118_s17, %s4119_s18  }
  0x16   :  { %s115_s3 = sshll.u32 %s6413_s8, 4  ;;  %s4127_s23 = smov [#allocation17]   ;;  %s116_s3 = int_to_ptr.hbm [resolvable:$true] %s115_s3 }
  0x17   :  { %s104_s4 = sshll.u32 %s4127_s23, 4  ;;  %s4128_s24 = smov [#allocation18]   ;;  %s105_s4 = int_to_ptr.vmem [resolvable:$true] %s104_s4 }
  0x18   :  { %110 = dma.hbm_to_vmem [thread:$0]  %s103_s1, 2048, %s105_s4, [#allocation16], %s4123_s28, %s4123_s28, %s4124_s29  }
  0x19   :  { %s117_s7 = sshll.u32 %s4128_s24, 4  ;;  %s118_s7 = int_to_ptr.vmem [resolvable:$true] %s117_s7 }
  0x1a   :  { %123 = dma.hbm_to_vmem [thread:$0]  %s116_s3, 2048, %s118_s7, [#allocation19], %s4123_s28, %s4123_s28, %s4124_s29  }
  0x1b   :  { %4105 = dma.done.wait [#allocation7], 1024  }
  0x1c   :  { %4106 = vsyncadd [#allocation7], 4294966272 }
  0x1d   :  { %4107 = dma.done.wait [#allocation10], 1088  }
  0x1e   :  { %4108 = vsyncadd [#allocation10], 4294966208 }
  0x1f   :  { %4109 = dma.done.wait [#allocation13], 9216  }
  0x20   :  { %4110 = vsyncadd [#allocation13], 4294958080 }
  0x21   :  { %4111 = dma.done.wait [#allocation16], 10240  }
  0x22   :  { %4112 = vsyncadd [#allocation16], 4294957056 }
  0x23   :  { %4113 = dma.done.wait [#allocation19], 2048  }
  0x24   :  { %4114 = vsyncadd [#allocation19], 4294965248  ;;  %v168_v0 = vld [vmem:[#allocation9 + $0x20] sm:$0xff]  ;;  %v169_v1 = vld [vmem:[#allocation9 + $0x28] sm:$0xff]  ;;  %vm182_vm0 = vcmask 130048   ;;  %v6415_v62 = vmov 0.0  }
  0x25   :  { %v164_v2 = vld [vmem:[#allocation9] sm:$0xff]  ;;  %221 = vmatpush.msra.mxu0 %v168_v0  ;;  %3486 = vmatpush.msra.mxu2 %v168_v0  ;;  %v165_v3 = vld [vmem:[#allocation9 + $0x8] sm:$0xff]  ;;  %v4228_v5 = vld [vmem:[#allocation6 + $0x18] sm:$0xff]  ;;  %s3357_s30 = sshll.u32 %s6414_s9, 4  ;;  %s3358_s30 = int_to_ptr.hbm [resolvable:$true] %s3357_s30 }
  0x26   :  { %262 = vmatpush.msra.mxu1 %v169_v1  ;;  %3488 = vmatpush.msra.mxu3 %v169_v1  ;;  %v4226_v4 = vld [vmem:[#allocation6] sm:$0xff]  ;;  %v171_v6 = vld [vmem:[#allocation9 + $0x38] sm:$0xff]  ;;  %v170_v7 = vld [vmem:[#allocation9 + $0x30] sm:$0xff] }
  0x27   :  { %222 = vmatpush.msra.mxu0 %v164_v2  ;;  %3487 = vmatpush.msra.mxu2 %v164_v2  ;;  %v407_v8 = vld [vmem:[#allocation14 + $0x20] sm:$0xff]  ;;  %v408_v9 = vld [vmem:[#allocation14 + $0x28] sm:$0xff]  ;;  %v167_v10 = vld [vmem:[#allocation9 + $0x18] sm:$0xff] }
  0x28   :  { %263 = vmatpush.msra.mxu1 %v165_v3  ;;  %3489 = vmatpush.msra.mxu3 %v165_v3  ;;  %v166_v11 = vld [vmem:[#allocation9 + $0x10] sm:$0xff]  ;;  %v403_v12 = vld [vmem:[#allocation14] sm:$0xff]  ;;  %v410_v16 = vld [vmem:[#allocation14 + $0x38] sm:$0xff] }
  0x29   :  { %3374 = vmatmul.msk.f32.vlgmr.msra.gmra.mxu0 %vm182_vm0, %v4226_v4  ;;  %3377 = vmatmul.msk.f32.vlgmr.msra.gmra.mxu2 %vm182_vm0, %v4228_v5  ;;  %v404_v13 = vld [vmem:[#allocation14 + $0x8] sm:$0xff]  ;;  %v4240_v15 = vld [vmem:[#allocation6 + $0x20] sm:$0xff]  ;;  %v409_v19 = vld [vmem:[#allocation14 + $0x30] sm:$0xff] }
  0x2a   :  { %3382 = vmatmul.msk.f32.vlgmr.msra.gmra.mxu1 %vm182_vm0, %v4226_v4  ;;  %3385 = vmatmul.msk.f32.vlgmr.msra.gmra.mxu3 %vm182_vm0, %v4228_v5  ;;  %v4238_v14 = vld [vmem:[#allocation6 + $0x8] sm:$0xff]  ;;  %v4250_v17 = vld [vmem:[#allocation6 + $0x10] sm:$0xff]  ;;  %v4288_v27 = vld [vmem:[#allocation6 + $0x38] sm:$0xff] }
  0x2b   :  { %344 = vmatpush.msrb.mxu3 %v171_v6  ;;  %303 = vmatpush.msrb.mxu2 %v170_v7  ;;  %v4252_v18 = vld [vmem:[#allocation6 + $0x28] sm:$0xff]  ;;  %v4262_v20 = vld [vmem:[#allocation6 + $0x30] sm:$0xff]  ;;  %v406_v38 = vld [vmem:[#allocation14 + $0x18] sm:$0xff] }
  0x2c   :  { %435 = vmatpush.msrb.mxu0 %v407_v8  ;;  %476 = vmatpush.msrb.mxu1 %v408_v9  ;;  %v4272_v21 = vld [vmem:[#allocation12 + $0x1e0] sm:$0xff]  ;;  %v4274_v22 = vld [vmem:[#allocation12 + $0x1e8] sm:$0xff]  ;;  %v405_v45 = vld [vmem:[#allocation14 + $0x10] sm:$0xff] }
  0x2d   :  { %345 = vmatpush.msrb.mxu3 %v167_v10  ;;  %304 = vmatpush.msrb.mxu2 %v166_v11  ;;  %v4276_v23 = vld [vmem:[#allocation12 + $0x1c0] sm:$0xff]  ;;  %v4280_v24 = vld [vmem:[#allocation12 + $0x1c8] sm:$0xff]  ;;  %v4424_v56 = vld [vmem:[#allocation12 + $0x1f8] sm:$0xff] }
  0x2e   :  { %436 = vmatpush.msrb.mxu0 %v403_v12  ;;  %477 = vmatpush.msrb.mxu1 %v404_v13  ;;  %v4282_v25 = vld [vmem:[#allocation12 + $0x1a0] sm:$0xff]  ;;  %v4284_v26 = vld [vmem:[#allocation12 + $0x1a8] sm:$0xff]  ;;  %v4426_v57 = vld [vmem:[#allocation12 + $0x1d8] sm:$0xff] }
  0x2f   :  { %558 = vmatpush.msra.mxu3 %v410_v16  ;;  %517 = vmatpush.msra.mxu2 %v409_v19  ;;  %v4292_v28 = vld [vmem:[#allocation12 + $0x180] sm:$0xff]  ;;  %v4294_v29 = vld [vmem:[#allocation12 + $0x188] sm:$0xff]  ;;  %v4444_v58 = vld [vmem:[#allocation12 + $0x1b8] sm:$0xff] }
  0x30   :  { %749 = vmatpush.msra.mxu0 %v4272_v21  ;;  %769 = vmatpush.msra.mxu1 %v4274_v22  ;;  %v4304_v30 = vld [vmem:[#allocation12 + $0x160] sm:$0xff]  ;;  %v4306_v31 = vld [vmem:[#allocation12 + $0x168] sm:$0xff]  ;;  %v4446_v59 = vld [vmem:[#allocation12 + $0x1f0] sm:$0xff] }
  0x31   :  { %3375 = vmatmul.msk.f32.gmra.mxu0 %vm182_vm0, %v4238_v14  ;;  %3378 = vmatmul.msk.f32.gmra.mxu2 %vm182_vm0, %v4240_v15  ;;  %v4310_v32 = vld [vmem:[#allocation12 + $0x140] sm:$0xff]  ;;  %v4312_v33 = vld [vmem:[#allocation12 + $0x148] sm:$0xff]  ;;  %v4448_v60 = vld [vmem:[#allocation12 + $0x198] sm:$0xff] }
  0x32   :  { %3383 = vmatmul.msk.f32.gmra.mxu1 %vm182_vm0, %v4238_v14  ;;  %3386 = vmatmul.msk.f32.gmra.mxu3 %vm182_vm0, %v4240_v15  ;;  %v4318_v34 = vld [vmem:[#allocation12 + $0x120] sm:$0xff]  ;;  %v4320_v35 = vld [vmem:[#allocation12 + $0x128] sm:$0xff]  ;;  %v4452_v61 = vld [vmem:[#allocation12 + $0x1d0] sm:$0xff] }
  0x33   :  { %750 = vmatpush.msra.mxu0 %v4276_v23  ;;  %770 = vmatpush.msra.mxu1 %v4280_v24  ;;  %v4330_v36 = vld [vmem:[#allocation12 + $0x100] sm:$0xff]  ;;  %v4332_v37 = vld [vmem:[#allocation12 + $0x108] sm:$0xff]  ;;  %v4468_v63 = vld [vmem:[#allocation12 + $0x178] sm:$0xff] }
  0x34   :  { %6673 = vst [vmem:[#allocation27_spill] sm:$0xff] %v4332_v37  ;;  %559 = vmatpush.msra.mxu3 %v406_v38  ;;  %v4336_v39 = vld [vmem:[#allocation12 + $0xe0] sm:$0xff]  ;;  %v4338_v40 = vld [vmem:[#allocation12 + $0xe8] sm:$0xff]  ;;  %518 = vmatpush.msra.mxu2 %v405_v45  ;;  %v4470_v0 = vld [vmem:[#allocation12 + $0x1b0] sm:$0xff] }
  0x35   :  { %751 = vmatpush.msra.mxu0 %v4282_v25  ;;  %771 = vmatpush.msra.mxu1 %v4284_v26  ;;  %6674 = vst [vmem:[#allocation28_spill] sm:$0xff] %v4336_v39  ;;  %v4344_v41 = vld [vmem:[#allocation12 + $0xc0] sm:$0xff]  ;;  %v4346_v42 = vld [vmem:[#allocation12 + $0xc8] sm:$0xff]  ;;  %v4472_v1 = vld [vmem:[#allocation12 + $0x158] sm:$0xff] }
  0x36   :  { %6675 = vst [vmem:[#allocation29_spill] sm:$0xff] %v4338_v40  ;;  %v4356_v43 = vld [vmem:[#allocation12 + $0xa0] sm:$0xff]  ;;  %v4358_v44 = vld [vmem:[#allocation12 + $0xa8] sm:$0xff]  ;;  %v4481_v2 = vld [vmem:[#allocation12 + $0x190] sm:$0xff] }
  0x37   :  { %752 = vmatpush.msra.mxu0 %v4292_v28  ;;  %772 = vmatpush.msra.mxu1 %v4294_v29  ;;  %6676 = vst [vmem:[#allocation30_spill] sm:$0xff] %v4344_v41  ;;  %v4362_v46 = vld [vmem:[#allocation12 + $0x80] sm:$0xff]  ;;  %v4364_v47 = vld [vmem:[#allocation12 + $0x88] sm:$0xff]  ;;  %v4490_v3 = vld [vmem:[#allocation12 + $0x138] sm:$0xff] }
  0x38   :  { %6677 = vst [vmem:[#allocation31_spill] sm:$0xff] %v4346_v42  ;;  %v4370_v48 = vld [vmem:[#allocation12 + $0x60] sm:$0xff]  ;;  %v4372_v49 = vld [vmem:[#allocation12 + $0x68] sm:$0xff]  ;;  %v4492_v6 = vld [vmem:[#allocation12 + $0x170] sm:$0xff] }
  0x39   :  { %3376 = vmatmul.msk.f32.gmra.mxu0 %vm182_vm0, %v4250_v17  ;;  %3379 = vmatmul.msk.f32.gmra.mxu2 %vm182_vm0, %v4252_v18  ;;  %6678 = vst [vmem:[#allocation32_spill] sm:$0xff] %v4364_v47  ;;  %v4382_v50 = vld [vmem:[#allocation12 + $0x40] sm:$0xff]  ;;  %v4384_v51 = vld [vmem:[#allocation12 + $0x48] sm:$0xff]  ;;  %v4499_v7 = vld [vmem:[#allocation12 + $0x118] sm:$0xff] }
  0x3a   :  { %3384 = vmatmul.msk.f32.gmra.mxu1 %vm182_vm0, %v4250_v17  ;;  %3387 = vmatmul.msk.f32.gmra.mxu3 %vm182_vm0, %v4252_v18  ;;  %6679 = vst [vmem:[#allocation33_spill] sm:$0xff] %v4370_v48  ;;  %v4388_v52 = vld [vmem:[#allocation12 + $0x20] sm:$0xff]  ;;  %v4390_v53 = vld [vmem:[#allocation12 + $0x28] sm:$0xff]  ;;  %v4504_v8 = vld [vmem:[#allocation12 + $0x150] sm:$0xff] }
  0x3b   :  { %753 = vmatpush.msra.mxu0 %v4304_v30  ;;  %773 = vmatpush.msra.mxu1 %v4306_v31  ;;  %6680 = vst [vmem:[#allocation34_spill] sm:$0xff] %v4372_v49  ;;  %v4396_v54 = vld [vmem:[#allocation12] sm:$0xff]  ;;  %v4398_v55 = vld [vmem:[#allocation12 + $0x8] sm:$0xff]  ;;  %v4513_v9 = vld [vmem:[#allocation12 + $0xf8] sm:$0xff] }
  0x3c   :  { %6681 = vst [vmem:[#allocation35_spill] sm:$0xff] %v4382_v50  ;;  %v4515_v10 = vld [vmem:[#allocation12 + $0x130] sm:$0xff]  ;;  %v4522_v11 = vld [vmem:[#allocation12 + $0xd8] sm:$0xff] }
  0x3d   :  { %754 = vmatpush.msra.mxu0 %v4310_v32  ;;  %774 = vmatpush.msra.mxu1 %v4312_v33  ;;  %6682 = vst [vmem:[#allocation36_spill] sm:$0xff] %v4384_v51  ;;  %v4536_v12 = vld [vmem:[#allocation12 + $0xb8] sm:$0xff]  ;;  %v4538_v13 = vld [vmem:[#allocation12 + $0xf0] sm:$0xff] }
  0x3e   :  { %6683 = vst [vmem:[#allocation37_spill] sm:$0xff] %v4388_v52  ;;  %v4545_v16 = vld [vmem:[#allocation12 + $0x98] sm:$0xff]  ;;  %v4561_v38 = vld [vmem:[#allocation12 + $0xb0] sm:$0xff] }
  0x3f   :  { %755 = vmatpush.msra.mxu0 %v4318_v34  ;;  %775 = vmatpush.msra.mxu1 %v4320_v35  ;;  %6684 = vst [vmem:[#allocation38_spill] sm:$0xff] %v4390_v53  ;;  %v4559_v19 = vld [vmem:[#allocation12 + $0x78] sm:$0xff] }
  0x40   :  { %6685 = vst [vmem:[#allocation39_spill] sm:$0xff] %v4396_v54  ;;  %v4568_v45 = vld [vmem:[#allocation12 + $0x58] sm:$0xff] }
  0x41   :  { %3380 = vmatmul.msk.f32.gmra.mxu2 %vm182_vm0, %v4262_v20  ;;  %3406 = vmatmul.msk.f32.vlgmr.msrb.gmra.mxu0 %vm182_vm0, %v4226_v4  ;;  %6686 = vst [vmem:[#allocation40_spill] sm:$0xff] %v4398_v55 }
  0x42   :  { %3388 = vmatmul.msk.f32.gmra.mxu3 %vm182_vm0, %v4262_v20  ;;  %3414 = vmatmul.msk.f32.vlgmr.msrb.gmra.mxu1 %vm182_vm0, %v4226_v4  ;;  %6687 = vst [vmem:[#allocation41_spill] sm:$0xff] %v4545_v16 }
  0x43   :  { %756 = vmatpush.msra.mxu0 %v4330_v36  ;;  %776 = vmatpush.msra.mxu1 %v4332_v37  ;;  %6688 = vst [vmem:[#allocation42_spill] sm:$0xff] %v4559_v19 }
  0x44   :  { %6689 = vst [vmem:[#allocation43_spill] sm:$0xff] %v4568_v45 }
  0x45   :  { %757 = vmatpush.msra.mxu0 %v4336_v39  ;;  %777 = vmatpush.msra.mxu1 %v4338_v40 }
  0x47   :  { %758 = vmatpush.msra.mxu0 %v4344_v41  ;;  %778 = vmatpush.msra.mxu1 %v4346_v42 }
  0x49   :  { %3381 = vmatmul.msk.f32.gmra.mxu2 %vm182_vm0, %v4288_v27  ;;  %3407 = vmatmul.msk.f32.gmra.mxu0 %vm182_vm0, %v4238_v14 }
  0x4a   :  { %3389 = vmatmul.msk.f32.gmra.mxu3 %vm182_vm0, %v4288_v27  ;;  %3415 = vmatmul.msk.f32.gmra.mxu1 %vm182_vm0, %v4238_v14 }
  0x4b   :  { %759 = vmatpush.msra.mxu0 %v4356_v43  ;;  %779 = vmatpush.msra.mxu1 %v4358_v44 }
  0x4d   :  { %760 = vmatpush.msra.mxu0 %v4362_v46  ;;  %780 = vmatpush.msra.mxu1 %v4364_v47 }
  0x4f   :  { %761 = vmatpush.msra.mxu0 %v4370_v48  ;;  %781 = vmatpush.msra.mxu1 %v4372_v49 }
  0x51   :  { %3390 = vmatmul.msk.f32.vlgmr.msrb.gmra.mxu2 %vm182_vm0, %v4226_v4  ;;  %3408 = vmatmul.msk.f32.gmra.mxu0 %vm182_vm0, %v4250_v17 }
  0x52   :  { %3398 = vmatmul.msk.f32.vlgmr.msrb.gmra.mxu3 %vm182_vm0, %v4226_v4  ;;  %3416 = vmatmul.msk.f32.gmra.mxu1 %vm182_vm0, %v4250_v17 }
  0x53   :  { %762 = vmatpush.msra.mxu0 %v4382_v50  ;;  %782 = vmatpush.msra.mxu1 %v4384_v51 }
  0x54   :  { %809 = vmatpush.msrb.mxu3 %v4424_v56  ;;  %789 = vmatpush.msrb.mxu2 %v4446_v59 }
  0x55   :  { %763 = vmatpush.msra.mxu0 %v4388_v52  ;;  %783 = vmatpush.msra.mxu1 %v4390_v53 }
  0x56   :  { %810 = vmatpush.msrb.mxu3 %v4426_v57  ;;  %790 = vmatpush.msrb.mxu2 %v4452_v61 }
  0x57   :  { %764 = vmatpush.msra.mxu0 %v4396_v54  ;;  %784 = vmatpush.msra.mxu1 %v4398_v55 }
  0x58   :  { %811 = vmatpush.msrb.mxu3 %v4444_v58  ;;  %791 = vmatpush.msrb.mxu2 %v4470_v0 }
  0x59   :  { %3391 = vmatmul.msk.f32.gmra.mxu2 %vm182_vm0, %v4238_v14  ;;  %3409 = vmatmul.msk.f32.gmra.mxu0 %vm182_vm0, %v4228_v5 }
  0x5a   :  { %3399 = vmatmul.msk.f32.gmra.mxu3 %vm182_vm0, %v4238_v14  ;;  %3417 = vmatmul.msk.f32.gmra.mxu1 %vm182_vm0, %v4228_v5 }
  0x5b   :  { %902 = vmatpush.msrb.mxu0 %v4272_v21  ;;  %922 = vmatpush.msrb.mxu1 %v4274_v22 }
  0x5c   :  { %812 = vmatpush.msrb.mxu3 %v4448_v60  ;;  %792 = vmatpush.msrb.mxu2 %v4481_v2 }
  0x5d   :  { %903 = vmatpush.msrb.mxu0 %v4276_v23  ;;  %923 = vmatpush.msrb.mxu1 %v4280_v24 }
  0x5e   :  { %813 = vmatpush.msrb.mxu3 %v4468_v63  ;;  %793 = vmatpush.msrb.mxu2 %v4492_v6 }
  0x5f   :  { %904 = vmatpush.msrb.mxu0 %v4282_v25  ;;  %924 = vmatpush.msrb.mxu1 %v4284_v26 }
  0x60   :  { %814 = vmatpush.msrb.mxu3 %v4472_v1  ;;  %794 = vmatpush.msrb.mxu2 %v4504_v8 }
  0x61   :  { %3392 = vmatmul.msk.f32.gmra.mxu2 %vm182_vm0, %v4250_v17  ;;  %3410 = vmatmul.msk.f32.gmra.mxu0 %vm182_vm0, %v4240_v15 }
  0x62   :  { %3400 = vmatmul.msk.f32.gmra.mxu3 %vm182_vm0, %v4250_v17  ;;  %3418 = vmatmul.msk.f32.gmra.mxu1 %vm182_vm0, %v4240_v15 }
  0x63   :  { %905 = vmatpush.msrb.mxu0 %v4292_v28  ;;  %925 = vmatpush.msrb.mxu1 %v4294_v29 }
  0x64   :  { %815 = vmatpush.msrb.mxu3 %v4490_v3  ;;  %795 = vmatpush.msrb.mxu2 %v4515_v10 }
  0x65   :  { %906 = vmatpush.msrb.mxu0 %v4304_v30  ;;  %926 = vmatpush.msrb.mxu1 %v4306_v31 }
  0x66   :  { %816 = vmatpush.msrb.mxu3 %v4499_v7 }
  0x67   :  { %907 = vmatpush.msrb.mxu0 %v4310_v32  ;;  %927 = vmatpush.msrb.mxu1 %v4312_v33 }
  0x68   :  { %817 = vmatpush.msrb.mxu3 %v4513_v9 }
  0x69   :  { %3393 = vmatmul.msk.f32.gmra.mxu2 %vm182_vm0, %v4228_v5  ;;  %3411 = vmatmul.msk.f32.gmra.mxu0 %vm182_vm0, %v4252_v18 }
  0x6a   :  { %3401 = vmatmul.msk.f32.gmra.mxu3 %vm182_vm0, %v4228_v5  ;;  %3419 = vmatmul.msk.f32.gmra.mxu1 %vm182_vm0, %v4252_v18 }
  0x6b   :  { %908 = vmatpush.msrb.mxu0 %v4318_v34  ;;  %928 = vmatpush.msrb.mxu1 %v4320_v35 }
  0x6c   :  { %818 = vmatpush.msrb.mxu3 %v4522_v11 }
  0x6d   :  { %909 = vmatpush.msrb.mxu0 %v4330_v36  ;;  %929 = vmatpush.msrb.mxu1 %v4332_v37 }
  0x6e   :  { %819 = vmatpush.msrb.mxu3 %v4536_v12 }
  0x6f   :  { %910 = vmatpush.msrb.mxu0 %v4336_v39  ;;  %930 = vmatpush.msrb.mxu1 %v4338_v40 }
  0x70   :  { %820 = vmatpush.msrb.mxu3 %v4545_v16 }
  0x71   :  { %3394 = vmatmul.msk.f32.gmra.mxu2 %vm182_vm0, %v4240_v15  ;;  %3412 = vmatmul.msk.f32.gmra.mxu0 %vm182_vm0, %v4262_v20 }
  0x72   :  { %3402 = vmatmul.msk.f32.gmra.mxu3 %vm182_vm0, %v4240_v15  ;;  %3420 = vmatmul.msk.f32.gmra.mxu1 %vm182_vm0, %v4262_v20 }
  0x73   :  { %911 = vmatpush.msrb.mxu0 %v4344_v41  ;;  %931 = vmatpush.msrb.mxu1 %v4346_v42 }
  0x74   :  { %821 = vmatpush.msrb.mxu3 %v4559_v19 }
  0x75   :  { %912 = vmatpush.msrb.mxu0 %v4356_v43  ;;  %932 = vmatpush.msrb.mxu1 %v4358_v44 }
  0x76   :  { %822 = vmatpush.msrb.mxu3 %v4568_v45 }
  0x77   :  { %913 = vmatpush.msrb.mxu0 %v4362_v46  ;;  %933 = vmatpush.msrb.mxu1 %v4364_v47 }
  0x79   :  { %3395 = vmatmul.msk.f32.gmra.mxu2 %vm182_vm0, %v4252_v18  ;;  %3413 = vmatmul.msk.f32.gmra.mxu0 %vm182_vm0, %v4288_v27 }
  0x7a   :  { %3403 = vmatmul.msk.f32.gmra.mxu3 %vm182_vm0, %v4252_v18  ;;  %3421 = vmatmul.msk.f32.gmra.mxu1 %vm182_vm0, %v4288_v27 }
  0x7b   :  { %914 = vmatpush.msrb.mxu0 %v4370_v48  ;;  %934 = vmatpush.msrb.mxu1 %v4372_v49 }
  0x7d   :  { %915 = vmatpush.msrb.mxu0 %v4382_v50  ;;  %935 = vmatpush.msrb.mxu1 %v4384_v51 }
  0x7f   :  { %916 = vmatpush.msrb.mxu0 %v4388_v52  ;;  %936 = vmatpush.msrb.mxu1 %v4390_v53 }
  0x81   :  { %3396 = vmatmul.msk.f32.gmra.mxu2 %vm182_vm0, %v4262_v20  ;;  %765 = vmatmul.f32.vlgmr.msra.gmra.mxu0 %v6415_v62 }
  0x82   :  { %3404 = vmatmul.msk.f32.gmra.mxu3 %vm182_vm0, %v4262_v20  ;;  %785 = vmatmul.f32.vlgmr.msra.gmra.mxu1 %v6415_v62  ;;  %v4582_v62 = vld [vmem:[#allocation12 + $0x38] sm:$0xff] }
  0x83   :  { %917 = vmatpush.msrb.mxu0 %v4396_v54  ;;  %937 = vmatpush.msrb.mxu1 %v4398_v55  ;;  %6691 = vst [vmem:[#allocation45_spill] sm:$0xff] %v4582_v62 }
  0x84   :  { %823 = vmatpush.msrb.mxu3 %v4582_v62 }
  0x85   :  { %1056 = vmatpush.msra.mxu0 %v4272_v21  ;;  %1076 = vmatpush.msra.mxu1 %v4274_v22 }
  0x87   :  { %1057 = vmatpush.msra.mxu0 %v4276_v23  ;;  %1077 = vmatpush.msra.mxu1 %v4280_v24 }
  0x89   :  { %3397 = vmatmul.msk.f32.gmra.mxu2 %vm182_vm0, %v4288_v27  ;;  %1058 = vmatpush.msra.mxu0 %v4282_v25 }
  0x8a   :  { %3405 = vmatmul.msk.f32.gmra.mxu3 %vm182_vm0, %v4288_v27  ;;  %1078 = vmatpush.msra.mxu1 %v4284_v26 }
  0x8b   :  { %1059 = vmatpush.msra.mxu0 %v4292_v28 }
  0x8c   :  { %1079 = vmatpush.msra.mxu1 %v4294_v29 }
  0x8d   :  { %1060 = vmatpush.msra.mxu0 %v4304_v30 }
  0x8e   :  { %1080 = vmatpush.msra.mxu1 %v4306_v31 }
  0x8f   :  { %1061 = vmatpush.msra.mxu0 %v4310_v32 }
  0x90   :  { %1081 = vmatpush.msra.mxu1 %v4312_v33 }
  0x91   :  { %3422 = vmatmul.msk.f32.vlgmr.msra.gmra.mxu2 %vm182_vm0, %v4226_v4  ;;  %1062 = vmatpush.msra.mxu0 %v4318_v34 }
  0x92   :  { %3430 = vmatmul.msk.f32.vlgmr.msra.gmra.mxu3 %vm182_vm0, %v4226_v4  ;;  %v4527_v4 = vld [vmem:[#allocation12 + $0x110] sm:$0xff]  ;;  %1082 = vmatpush.msra.mxu1 %v4320_v35 }
  0x93   :  { %796 = vmatpush.msrb.mxu2 %v4527_v4  ;;  %1063 = vmatpush.msra.mxu0 %v4330_v36 }
  0x94   :  { %1083 = vmatpush.msra.mxu1 %v4332_v37  ;;  %v4600_v37 = vld [vmem:[#allocation12 + $0x30] sm:$0xff] }
  0x95   :  { %797 = vmatpush.msrb.mxu2 %v4538_v13  ;;  %1064 = vmatpush.msra.mxu0 %v4336_v39  ;;  %v4584_v39 = vld [vmem:[#allocation12 + $0x70] sm:$0xff]  ;;  %6697 = vst [vmem:[#allocation51_spill] sm:$0xff] %v4600_v37 }
  0x96   :  { %1084 = vmatpush.msra.mxu1 %v4338_v40  ;;  %6692 = vst [vmem:[#allocation46_spill] sm:$0xff] %v4584_v39 }
  0x97   :  { %1065 = vmatpush.msra.mxu0 %v4344_v41  ;;  %v4591_v41 = vld [vmem:[#allocation12 + $0x50] sm:$0xff] }
  0x98   :  { %1085 = vmatpush.msra.mxu1 %v4346_v42  ;;  %6694 = vst [vmem:[#allocation48_spill] sm:$0xff] %v4591_v41 }
  0x99   :  { %3423 = vmatmul.msk.f32.gmra.mxu2 %vm182_vm0, %v4238_v14  ;;  %1066 = vmatpush.msra.mxu0 %v4356_v43 }
  0x9a   :  { %3431 = vmatmul.msk.f32.gmra.mxu3 %vm182_vm0, %v4238_v14  ;;  %v4550_v14 = vld [vmem:[#allocation12 + $0xd0] sm:$0xff]  ;;  %1086 = vmatpush.msra.mxu1 %v4358_v44 }
  0x9b   :  { %798 = vmatpush.msrb.mxu2 %v4550_v14  ;;  %1067 = vmatpush.msra.mxu0 %v4362_v46 }
  0x9c   :  { %1087 = vmatpush.msra.mxu1 %v4364_v47 }
  0x9d   :  { %799 = vmatpush.msrb.mxu2 %v4561_v38  ;;  %1068 = vmatpush.msra.mxu0 %v4370_v48 }
  0x9e   :  { %1088 = vmatpush.msra.mxu1 %v4372_v49 }
  0x9f   :  { %1069 = vmatpush.msra.mxu0 %v4382_v50 }
  0xa0   :  { %1089 = vmatpush.msra.mxu1 %v4384_v51 }
  0xa1   :  { %3424 = vmatmul.msk.f32.gmra.mxu2 %vm182_vm0, %v4250_v17  ;;  %1070 = vmatpush.msra.mxu0 %v4388_v52 }
  0xa2   :  { %3432 = vmatmul.msk.f32.gmra.mxu3 %vm182_vm0, %v4250_v17  ;;  %v4573_v17 = vld [vmem:[#allocation12 + $0x90] sm:$0xff]  ;;  %1090 = vmatpush.msra.mxu1 %v4390_v53 }
  0xa3   :  { %6690 = vst [vmem:[#allocation44_spill] sm:$0xff] %v4573_v17  ;;  %800 = vmatpush.msrb.mxu2 %v4573_v17  ;;  %1071 = vmatpush.msra.mxu0 %v4396_v54 }
  0xa4   :  { %1091 = vmatpush.msra.mxu1 %v4398_v55 }
  0xa5   :  { %801 = vmatpush.msrb.mxu2 %v4584_v39 }
  0xa7   :  { %802 = vmatpush.msrb.mxu2 %v4591_v41 }
  0xa9   :  { %3425 = vmatmul.msk.f32.gmra.mxu2 %vm182_vm0, %v4228_v5 }
  0xaa   :  { %3433 = vmatmul.msk.f32.gmra.mxu3 %vm182_vm0, %v4228_v5  ;;  %v4598_v5 = vld [vmem:[#allocation12 + $0x18] sm:$0xff]  ;;  %803 = vmatpush.msrb.mxu2 %v4600_v37 }
  0xab   :  { %6696 = vst [vmem:[#allocation50_spill] sm:$0xff] %v4598_v5  ;;  %824 = vmatpush.msrb.mxu3 %v4598_v5 }
  0xac   :  { %v4588_v40 = vpop.f32.mrf.mxu2 }
  0xad   :  { %6693 = vst [vmem:[#allocation47_spill] sm:$0xff] %v4588_v40  ;;  %v4594_v42 = vpop.f32.mrf.mxu3  ;;  %v4606_v40 = vld [vmem:[#allocation12 + $0x10] sm:$0xff]  ;;  %962 = vmatpush.msra.mxu3 %v4424_v56 }
  0xae   :  { %6695 = vst [vmem:[#allocation49_spill] sm:$0xff] %v4594_v42  ;;  %804 = vmatpush.msrb.mxu2 %v4606_v40 }
  0xaf   :  { %6698 = vst [vmem:[#allocation52_spill] sm:$0xff] %v4606_v40  ;;  %963 = vmatpush.msra.mxu3 %v4426_v57 }
  0xb0   :  { %942 = vmatpush.msra.mxu2 %v4446_v59 }
  0xb1   :  { %3426 = vmatmul.msk.f32.gmra.mxu2 %vm182_vm0, %v4240_v15  ;;  %964 = vmatpush.msra.mxu3 %v4444_v58 }
  0xb2   :  { %3434 = vmatmul.msk.f32.gmra.mxu3 %vm182_vm0, %v4240_v15  ;;  %943 = vmatpush.msra.mxu2 %v4452_v61 }
  0xb3   :  { %965 = vmatpush.msra.mxu3 %v4448_v60 }
  0xb4   :  { %v4617_v42 = vpop.f32.mrf.mxu2  ;;  %944 = vmatpush.msra.mxu2 %v4470_v0 }
  0xb5   :  { %6699 = vst [vmem:[#allocation53_spill] sm:$0xff] %v4617_v42  ;;  %v4621_v48 = vpop.f32.mrf.mxu3  ;;  %966 = vmatpush.msra.mxu3 %v4468_v63  ;;  %v4647_v42 = vpop.f32.mrf.mxu0 }
  0xb6   :  { %6700 = vst [vmem:[#allocation54_spill] sm:$0xff] %v4621_v48  ;;  %945 = vmatpush.msra.mxu2 %v4481_v2 }
  0xb7   :  { %967 = vmatpush.msra.mxu3 %v4472_v1 }
  0xb8   :  { %946 = vmatpush.msra.mxu2 %v4492_v6 }
  0xb9   :  { %3427 = vmatmul.msk.f32.gmra.mxu2 %vm182_vm0, %v4252_v18  ;;  %968 = vmatpush.msra.mxu3 %v4490_v3 }
  0xba   :  { %3435 = vmatmul.msk.f32.gmra.mxu3 %vm182_vm0, %v4252_v18  ;;  %947 = vmatpush.msra.mxu2 %v4504_v8  ;;  %v4652_v18 = vpop.f32.mrf.mxu1 }
  0xbb   :  { %969 = vmatpush.msra.mxu3 %v4499_v7 }
  0xbc   :  { %v4638_v15 = vpop.f32.mrf.mxu2  ;;  %948 = vmatpush.msra.mxu2 %v4515_v10 }
  0xbd   :  { %6701 = vst [vmem:[#allocation55_spill] sm:$0xff] %v4638_v15  ;;  %v4641_v48 = vpop.f32.mrf.mxu3  ;;  %970 = vmatpush.msra.mxu3 %v4513_v9 }
  0xbe   :  { %6702 = vst [vmem:[#allocation56_spill] sm:$0xff] %v4641_v48  ;;  %949 = vmatpush.msra.mxu2 %v4527_v4 }
  0xbf   :  { %971 = vmatpush.msra.mxu3 %v4522_v11 }
  0xc0   :  { %950 = vmatpush.msra.mxu2 %v4538_v13 }
  0xc1   :  { %3428 = vmatmul.msk.f32.gmra.mxu2 %vm182_vm0, %v4262_v20  ;;  %972 = vmatpush.msra.mxu3 %v4536_v12 }
  0xc2   :  { %3436 = vmatmul.msk.f32.gmra.mxu3 %vm182_vm0, %v4262_v20  ;;  %951 = vmatpush.msra.mxu2 %v4550_v14  ;;  %v4673_v20 = vpop.f32.mrf.mxu0 }
  0xc3   :  { %973 = vmatpush.msra.mxu3 %v4545_v16  ;;  %6705 = vst [vmem:[#allocation59_spill] sm:$0xff] %v4673_v20 }
  0xc4   :  { %v4658_v48 = vpop.f32.mrf.mxu2  ;;  %952 = vmatpush.msra.mxu2 %v4561_v38 }
  0xc5   :  { %6703 = vst [vmem:[#allocation57_spill] sm:$0xff] %v4658_v48  ;;  %v4661_v15 = vpop.f32.mrf.mxu3  ;;  %974 = vmatpush.msra.mxu3 %v4559_v19 }
  0xc6   :  { %6704 = vst [vmem:[#allocation58_spill] sm:$0xff] %v4661_v15  ;;  %953 = vmatpush.msra.mxu2 %v4573_v17  ;;  %v4676_v15 = vpop.f32.mrf.mxu1 }
  0xc7   :  { %975 = vmatpush.msra.mxu3 %v4568_v45  ;;  %6706 = vst [vmem:[#allocation60_spill] sm:$0xff] %v4676_v15 }
  0xc8   :  { %954 = vmatpush.msra.mxu2 %v4584_v39 }
  0xc9   :  { %3429 = vmatmul.msk.f32.gmra.mxu2 %vm182_vm0, %v4288_v27  ;;  %976 = vmatpush.msra.mxu3 %v4582_v62 }
  0xca   :  { %3437 = vmatmul.msk.f32.gmra.mxu3 %vm182_vm0, %v4288_v27  ;;  %955 = vmatpush.msra.mxu2 %v4591_v41  ;;  %v6709_v27 = vmov 0.0  }
  0xcb   :  { %977 = vmatpush.msra.mxu3 %v4598_v5 }
  0xcc   :  { %v4678_v48 = vpop.f32.mrf.mxu2  ;;  %956 = vmatpush.msra.mxu2 %v4600_v37 }
  0xcd   :  { %6707 = vst [vmem:[#allocation61_spill] sm:$0xff] %v4678_v48  ;;  %v4681_v55 = vpop.f32.mrf.mxu3 }
  0xce   :  { %6708 = vst [vmem:[#allocation62_spill] sm:$0xff] %v4681_v55  ;;  %957 = vmatpush.msra.mxu2 %v4606_v40  ;;  %v4694_v55 = vpop.f32.mrf.mxu0  ;;  %v4700_v20 = vpop.f32.mrf.mxu1 }
  0xcf   :  { %6710 = vst [vmem:[#allocation63_spill] sm:$0xff] %v4694_v55 }
  0xd0   :  { %6711 = vst [vmem:[#allocation64_spill] sm:$0xff] %v4700_v20 }
  0xd1   :  { %805 = vmatmul.f32.vlgmr.msrb.gmra.mxu2 %v6709_v27 }
  0xd2   :  { %825 = vmatmul.f32.vlgmr.msrb.gmra.mxu3 %v6709_v27  ;;  %1096 = vmatpush.msrb.mxu2 %v4446_v59 }
  0xd3   :  { %1116 = vmatpush.msrb.mxu3 %v4424_v56 }
  0xd4   :  { %v4692_v48 = vpop.f32.mrf.mxu2  ;;  %1097 = vmatpush.msrb.mxu2 %v4452_v61 }
  0xd5   :  { %v4696_v15 = vpop.f32.mrf.mxu3  ;;  %1117 = vmatpush.msrb.mxu3 %v4426_v57 }
  0xd6   :  { %1098 = vmatpush.msrb.mxu2 %v4470_v0  ;;  %v4714_v20 = vpop.f32.mrf.mxu0  ;;  %v4718_v54 = vpop.f32.mrf.mxu1 }
  0xd7   :  { %1118 = vmatpush.msrb.mxu3 %v4444_v58  ;;  %6714 = vst [vmem:[#allocation67_spill] sm:$0xff] %v4714_v20 }
  0xd8   :  { %1099 = vmatpush.msrb.mxu2 %v4481_v2  ;;  %6715 = vst [vmem:[#allocation68_spill] sm:$0xff] %v4718_v54 }
  0xd9   :  { %1119 = vmatpush.msrb.mxu3 %v4448_v60 }
  0xda   :  { %1100 = vmatpush.msrb.mxu2 %v4492_v6 }
  0xdb   :  { %1120 = vmatpush.msrb.mxu3 %v4468_v63 }
  0xdc   :  { %v4708_v27 = vpop.f32.mrf.mxu2  ;;  %1101 = vmatpush.msrb.mxu2 %v4504_v8 }
  0xdd   :  { %6712 = vst [vmem:[#allocation65_spill] sm:$0xff] %v4708_v27  ;;  %v4710_v55 = vpop.f32.mrf.mxu3  ;;  %1121 = vmatpush.msrb.mxu3 %v4472_v1 }
  0xde   :  { %6713 = vst [vmem:[#allocation66_spill] sm:$0xff] %v4710_v55  ;;  %1102 = vmatpush.msrb.mxu2 %v4515_v10  ;;  %v4732_v54 = vpop.f32.mrf.mxu0  ;;  %v4736_v20 = vpop.f32.mrf.mxu1 }
  0xdf   :  { %1122 = vmatpush.msrb.mxu3 %v4490_v3  ;;  %6718 = vst [vmem:[#allocation71_spill] sm:$0xff] %v4732_v54 }
  0xe0   :  { %1103 = vmatpush.msrb.mxu2 %v4527_v4  ;;  %6719 = vst [vmem:[#allocation72_spill] sm:$0xff] %v4736_v20 }
  0xe1   :  { %1123 = vmatpush.msrb.mxu3 %v4499_v7 }
  0xe2   :  { %1104 = vmatpush.msrb.mxu2 %v4538_v13 }
  0xe3   :  { %1124 = vmatpush.msrb.mxu3 %v4513_v9 }
  0xe4   :  { %v4724_v27 = vpop.f32.mrf.mxu2  ;;  %1105 = vmatpush.msrb.mxu2 %v4550_v14 }
  0xe5   :  { %6716 = vst [vmem:[#allocation69_spill] sm:$0xff] %v4724_v27  ;;  %v4726_v55 = vpop.f32.mrf.mxu3  ;;  %1125 = vmatpush.msrb.mxu3 %v4522_v11 }
  0xe6   :  { %6717 = vst [vmem:[#allocation70_spill] sm:$0xff] %v4726_v55  ;;  %1106 = vmatpush.msrb.mxu2 %v4561_v38  ;;  %v4750_v20 = vpop.f32.mrf.mxu0  ;;  %v4752_v54 = vpop.f32.mrf.mxu1 }
  0xe7   :  { %1126 = vmatpush.msrb.mxu3 %v4536_v12  ;;  %6722 = vst [vmem:[#allocation75_spill] sm:$0xff] %v4750_v20 }
  0xe8   :  { %1107 = vmatpush.msrb.mxu2 %v4573_v17  ;;  %6723 = vst [vmem:[#allocation76_spill] sm:$0xff] %v4752_v54 }
  0xe9   :  { %1127 = vmatpush.msrb.mxu3 %v4545_v16 }
  0xea   :  { %1108 = vmatpush.msrb.mxu2 %v4584_v39 }
  0xeb   :  { %1128 = vmatpush.msrb.mxu3 %v4559_v19 }
  0xec   :  { %v4740_v27 = vpop.f32.mrf.mxu2  ;;  %1109 = vmatpush.msrb.mxu2 %v4591_v41 }
  0xed   :  { %6720 = vst [vmem:[#allocation73_spill] sm:$0xff] %v4740_v27  ;;  %v4742_v55 = vpop.f32.mrf.mxu3  ;;  %1129 = vmatpush.msrb.mxu3 %v4568_v45 }
  0xee   :  { %6721 = vst [vmem:[#allocation74_spill] sm:$0xff] %v4742_v55  ;;  %1110 = vmatpush.msrb.mxu2 %v4600_v37  ;;  %v4760_v52 = vpop.f32.mrf.mxu0  ;;  %v4764_v37 = vpop.f32.mrf.mxu1 }
  0xef   :  { %1130 = vmatpush.msrb.mxu3 %v4582_v62  ;;  %6727 = vst [vmem:[#allocation80_spill] sm:$0xff] %v4760_v52  ;;  %v411_v52 = vld [vmem:[%s6410_s5] sm:$0xf] }
  0xf0   :  { %1111 = vmatpush.msrb.mxu2 %v4606_v40  ;;  %6729 = vst [vmem:[#allocation82_spill] sm:$0xff] %v4764_v37 }
  0xf1   :  { %1131 = vmatpush.msrb.mxu3 %v4598_v5 }
  0xf4   :  { %v4754_v53 = vpop.f32.mrf.mxu2 }
  0xf5   :  { %6724 = vst [vmem:[#allocation77_spill] sm:$0xff] %v4754_v53  ;;  %v4756_v27 = vpop.f32.mrf.mxu3 }
  0xf6   :  { %6725 = vst [vmem:[#allocation78_spill] sm:$0xff] %v4756_v27  ;;  %v4770_v5 = vpop.f32.mrf.mxu0  ;;  %v4772_v20 = vpop.f32.mrf.mxu1 }
  0xf7   :  { %6732 = vst [vmem:[#allocation85_spill] sm:$0xff] %v4770_v5 }
  0xf8   :  { %6733 = vst [vmem:[#allocation86_spill] sm:$0xff] %v4772_v20 }
  0xfc   :  { %v4758_v55 = vpop.f32.mrf.mxu2 }
  0xfd   :  { %6726 = vst [vmem:[#allocation79_spill] sm:$0xff] %v4758_v55  ;;  %v4762_v45 = vpop.f32.mrf.mxu3 }
  0xfe   :  { %6728 = vst [vmem:[#allocation81_spill] sm:$0xff] %v4762_v45  ;;  %v4781_v55 = vpop.f32.mrf.mxu0  ;;  %v4783_v45 = vperm.slane %v411_v52, 2  ;;  %v4785_v37 = vpop.f32.mrf.mxu1 }
  0xff   :  { %6736 = vst [vmem:[#allocation89_spill] sm:$0xff] %v4781_v55 }
 0x100   :  { %6737 = vst [vmem:[#allocation90_spill] sm:$0xff] %v4783_v45 }
 0x101   :  { %6738 = vst [vmem:[#allocation91_spill] sm:$0xff] %v4785_v37 }
 0x104   :  { %v4766_v62 = vpop.f32.mrf.mxu2 }
 0x105   :  { %6730 = vst [vmem:[#allocation83_spill] sm:$0xff] %v4766_v62  ;;  %v4768_v40 = vpop.f32.mrf.mxu3  ;;  %v4787_v62 = vperm.slane %v411_v52, 3 }
 0x106   :  { %6731 = vst [vmem:[#allocation84_spill] sm:$0xff] %v4768_v40  ;;  %v4797_v27 = vpop.f32.mrf.mxu1 }
 0x107   :  { %6739 = vst [vmem:[#allocation92_spill] sm:$0xff] %v4787_v62 }
 0x108   :  { %6743 = vst [vmem:[#allocation96_spill] sm:$0xff] %v4797_v27  ;;  %v172_v27 = vld [vmem:[#allocation11] sm:$0xf] }
 0x10c   :  { %v4774_v54 = vpop.f32.mrf.mxu2 }
 0x10d   :  { %6734 = vst [vmem:[#allocation87_spill] sm:$0xff] %v4774_v54  ;;  %v4776_v53 = vpop.f32.mrf.mxu3 }
 0x10e   :  { %6735 = vst [vmem:[#allocation88_spill] sm:$0xff] %v4776_v53  ;;  %v4795_v53 = vpop.f32.mrf.mxu0 }
 0x10f   :  { %6742 = vst [vmem:[#allocation95_spill] sm:$0xff] %v4795_v53 }
 0x114   :  { %v520_v40 = vpop.f32.mrf.mxu2 }
 0x115   :  { %v4790_v5 = vadd.f32 %v520_v40, %v4783_v45  ;;  %v561_v20 = vpop.f32.mrf.mxu3 }
 0x116   :  { %v4793_v54 = vadd.f32 %v561_v20, %v4787_v62  ;;  %v4805_v50 = vpop.f32.mrf.mxu0 }
 0x117   :  { %6740 = vst [vmem:[#allocation93_spill] sm:$0xff] %v4790_v5  ;;  %v4810_v5 = vpop.f32.mrf.mxu1 }
 0x118   :  { %6741 = vst [vmem:[#allocation94_spill] sm:$0xff] %v4793_v54 }
 0x119   :  { %6746 = vst [vmem:[#allocation99_spill] sm:$0xff] %v4805_v50  ;;  %v4823_v50 = vperm.slane %v172_v27, 1 }
 0x11a   :  { %6748 = vst [vmem:[#allocation101_spill] sm:$0xff] %v4810_v5 }
 0x11b   :  { %6753 = vst [vmem:[#allocation106_spill] sm:$0xff] %v4823_v50 }
 0x11c   :  { %v523_v41 = vpop.f32.mrf.mxu2 }
 0x11d   :  { %v4800_v55 = vadd.f32 %v523_v41, %v4783_v45  ;;  %v564_v51 = vpop.f32.mrf.mxu3 }
 0x11e   :  { %v4803_v52 = vadd.f32 %v564_v51, %v4787_v62  ;;  %v4818_v51 = vperm.slane %v172_v27, 0 }
 0x11f   :  { %6744 = vst [vmem:[#allocation97_spill] sm:$0xff] %v4800_v55  ;;  %v786_v5 = vpop.f32.mrf.mxu1 }
 0x120   :  { %6745 = vst [vmem:[#allocation98_spill] sm:$0xff] %v4803_v52 }
 0x121   :  { %6751 = vst [vmem:[#allocation104_spill] sm:$0xff] %v4818_v51 }
 0x124   :  { %v526_v37 = vpop.f32.mrf.mxu2 }
 0x125   :  { %v4808_v40 = vadd.f32 %v526_v37, %v4783_v45  ;;  %v567_v20 = vpop.f32.mrf.mxu3  ;;  %v766_v37 = vpop.f32.mrf.mxu0 }
 0x126   :  { %v4813_v54 = vadd.f32 %v567_v20, %v4787_v62  ;;  %v266_v20 = vadd.f32 %v4652_v18, %v4823_v50 }
 0x127   :  { %6747 = vst [vmem:[#allocation100_spill] sm:$0xff] %v4808_v40  ;;  %v225_v40 = vadd.f32 %v4647_v42, %v4818_v51 }
 0x128   :  { %6749 = vst [vmem:[#allocation102_spill] sm:$0xff] %v4813_v54  ;;  %v830_v19 = vadd.f32 %v786_v5, %v266_v20 }
 0x129   :  { %v829_v54 = vadd.f32 %v766_v37, %v225_v40 }
 0x12b   :  { %v3438_v49 = vmul.f32 -1.442695, %v829_v54 }
 0x12c   :  { %v529_v53 = vpop.f32.mrf.mxu2 }
 0x12d   :  { %v4816_v41 = vadd.f32 %v529_v53, %v4783_v45  ;;  %v570_v55 = vpop.f32.mrf.mxu3  ;;  %3504 = vpow2.f32 %v3438_v49 }
 0x12e   :  { %v4821_v52 = vadd.f32 %v570_v55, %v4787_v62 }
 0x12f   :  { %6750 = vst [vmem:[#allocation103_spill] sm:$0xff] %v4816_v41 }
 0x130   :  { %6752 = vst [vmem:[#allocation105_spill] sm:$0xff] %v4821_v52  ;;  %v3439_v52 = vmul.f32 -1.442695, %v830_v19 }
 0x132   :  { %3506 = vpow2.f32 %v3439_v52 }
 0x133   :  { %v3505_v5 = vpop.eup %3504 }
 0x134   :  { %v532_v53 = vpop.f32.mrf.mxu2  ;;  %v836_v37 = vadd.f32 1.0, %v3505_v5 }
 0x135   :  { %v4830_v41 = vadd.f32 %v532_v53, %v4783_v45  ;;  %v573_v39 = vpop.f32.mrf.mxu3 }
 0x136   :  { %v4833_v55 = vadd.f32 %v573_v39, %v4787_v62  ;;  %3508 = vrcp.f32 %v836_v37  ;;  %vm842_vm3 = vweird.f32 %v836_v37 }
 0x137   :  { %6754 = vst [vmem:[#allocation107_spill] sm:$0xff] %v4830_v41  ;;  %v4851_v41 = vperm.slane %v172_v27, 3 }
 0x138   :  { %6755 = vst [vmem:[#allocation108_spill] sm:$0xff] %v4833_v55  ;;  %v3507_v40 = vpop.eup %3506  ;;  %v4853_v55 = vperm.slane %v172_v27, 2 }
 0x139   :  { %v855_v20 = vadd.f32 1.0, %v3507_v40  ;;  %6762 = vst [vmem:[#allocation115_spill] sm:$0xff] %v4851_v41 }
 0x13a   :  { %6763 = vst [vmem:[#allocation116_spill] sm:$0xff] %v4853_v55 }
 0x13b   :  { %3510 = vrcp.f32 %v855_v20  ;;  %v867_v47 = vand.u32 2147483648, %v855_v20  ;;  %vm861_vm4 = vweird.f32 %v855_v20 }
 0x13c   :  { %v535_v16 = vpop.f32.mrf.mxu2  ;;  %v3509_v19 = vpop.eup %3508 }
 0x13d   :  { %v4836_v42 = vadd.f32 %v535_v16, %v4783_v45  ;;  %v576_v51 = vpop.f32.mrf.mxu3  ;;  %v838_v5 = vmul.f32 %v3509_v19, %v836_v37  ;;  %vm843_vm1 = vweird.f32 %v3509_v19 }
 0x13e   :  { %v4839_v18 = vadd.f32 %v576_v51, %v4787_v62  ;;  %vm844_vm5 = vmor %vm842_vm3, %vm843_vm1 }
 0x13f   :  { %6756 = vst [vmem:[#allocation109_spill] sm:$0xff] %v4836_v42  ;;  %v839_v42 = vsub.f32 1.0, %v838_v5  ;;  %v846_v5 = vand.u32 2147483647, %v836_v37 }
 0x140   :  { %6757 = vst [vmem:[#allocation110_spill] sm:$0xff] %v4839_v18 }
 0x141   :  { %v3511_v51 = vpop.eup %3510  ;;  %v840_v50 = vmul.f32 %v3509_v19, %v839_v42  ;;  %v868_v42 = vor.u32 1.1754944e-38, %v867_v47  ;;  %vm847_vm7 = vcmp.eq.f32.partialorder %v846_v5, 8.507059e+37 }
 0x142   :  { %v857_v40 = vmul.f32 %v3511_v51, %v855_v20  ;;  %vm862_vm2 = vweird.f32 %v3511_v51 }
 0x143   :  { %v841_v27 = vadd.f32 %v3509_v19, %v840_v50  ;;  %vm863_vm6 = vmor %vm861_vm4, %vm862_vm2 }
 0x144   :  { %v538_v53 = vpop.f32.mrf.mxu2 }
 0x145   :  { %v4842_v54 = vadd.f32 %v538_v53, %v4783_v45  ;;  %v579_v39 = vpop.f32.mrf.mxu3  ;;  %v348_v53 = vadd.f32 %v4696_v15, %v4851_v41  ;;  %v848_v15 = vand.u32 2147483648, %v836_v37 }
 0x146   :  { %v4845_v49 = vadd.f32 %v579_v39, %v4787_v62  ;;  %v858_v39 = vsub.f32 1.0, %v857_v40  ;;  %v865_v40 = vand.u32 2147483647, %v855_v20 }
 0x147   :  { %6758 = vst [vmem:[#allocation111_spill] sm:$0xff] %v4842_v54 }
 0x148   :  { %6759 = vst [vmem:[#allocation112_spill] sm:$0xff] %v4845_v49  ;;  %v307_v49 = vadd.f32 %v4692_v48, %v4853_v55  ;;  %v859_v62 = vmul.f32 %v3511_v51, %v858_v39  ;;  %v845_v48 = vsel %vm844_vm5, %v3509_v19, %v841_v27  ;;  %vm866_vm8 = vcmp.eq.f32.partialorder %v865_v40, 8.507059e+37 }
 0x14a   :  { %v860_v17 = vadd.f32 %v3511_v51, %v859_v62 }
 0x14c   :  { %v4847_v16 = vpop.f32.mrf.mxu2 }
 0x14d   :  { %6760 = vst [vmem:[#allocation113_spill] sm:$0xff] %v4847_v16  ;;  %v4849_v52 = vpop.f32.mrf.mxu3 }
 0x14e   :  { %6761 = vst [vmem:[#allocation114_spill] sm:$0xff] %v4849_v52 }
 0x154   :  { %v806_v18 = vpop.f32.mrf.mxu2 }
 0x155   :  { %v826_v54 = vpop.f32.mrf.mxu3  ;;  %v831_v45 = vadd.f32 %v806_v18, %v307_v49  ;;  %v864_v18 = vsel %vm863_vm6, %v3511_v51, %v860_v17 }
 0x156   :  { %v832_v16 = vadd.f32 %v826_v54, %v348_v53  ;;  %v869_v62 = vsel %vm866_vm8, %v868_v42, %v864_v18  ;;  %v6791_v18 = vld [vmem:[#allocation106_spill] sm:$0xff] }
 0x158   :  { %v3440_v52 = vmul.f32 -1.442695, %v832_v16  ;;  %v849_v16 = vor.u32 1.1754944e-38, %v848_v15 }
 0x15a   :  { %3512 = vpow2.f32 %v3440_v52  ;;  %v850_v50 = vsel %vm847_vm7, %v849_v16, %v845_v48  ;;  %v891_v52 = vmul.f32 0.0, %v869_v62 }
 0x15b   :  { %3514 = vtanh.f32 %v831_v45 }
 0x160   :  { %v3513_v41 = vpop.eup %3512 }
 0x161   :  { %v875_v54 = vadd.f32 1.0, %v3513_v41  ;;  %v3515_v49 = vpop.eup %3514 }
 0x162   :  { %v892_v45 = vmul.f32 %v3515_v49, %v850_v50 }
 0x163   :  { %3516 = vrcp.f32 %v875_v54  ;;  %v887_v19 = vand.u32 2147483648, %v875_v54  ;;  %v885_v41 = vand.u32 2147483647, %v875_v54  ;;  %vm881_vm10 = vweird.f32 %v875_v54 }
 0x164   :  { %v4859_v39 = vadd.f32 %v892_v45, %v891_v52 }
 0x165   :  { %v888_v51 = vor.u32 1.1754944e-38, %v887_v19  ;;  %vm886_vm12 = vcmp.eq.f32.partialorder %v885_v41, 8.507059e+37 }
 0x166   :  { %3518 = vtanh.f32 %v4859_v39 }
 0x169   :  { %v3517_v53 = vpop.eup %3516 }
 0x16a   :  { %v877_v37 = vmul.f32 %v3517_v53, %v875_v54  ;;  %vm882_vm9 = vweird.f32 %v3517_v53  ;;  %v6792_v54 = vld [vmem:[#allocation60_spill] sm:$0xff] }
 0x16b   :  { %vm883_vm11 = vmor %vm881_vm10, %vm882_vm9  ;;  %v269_v49 = vadd.f32 %v6792_v54, %v6791_v18 }
 0x16c   :  { %v878_v20 = vsub.f32 1.0, %v877_v37  ;;  %v3519_v15 = vpop.eup %3518  ;;  %v6794_v37 = vld [vmem:[#allocation66_spill] sm:$0xff] }
 0x16e   :  { %v879_v17 = vmul.f32 %v3517_v53, %v878_v20 }
 0x170   :  { %v880_v47 = vadd.f32 %v3517_v53, %v879_v17 }
 0x172   :  { %v884_v27 = vsel %vm883_vm11, %v3517_v53, %v880_v47  ;;  %v6793_v53 = vld [vmem:[#allocation115_spill] sm:$0xff] }
 0x173   :  { %v889_v5 = vsel %vm886_vm12, %v888_v51, %v884_v27  ;;  %v351_v20 = vadd.f32 %v6794_v37, %v6793_v53 }
 0x174   :  { %v4862_v40 = vmul.f32 %v3519_v15, %v889_v5 }
 0x176   :  { %6764 = vst [vmem:[#allocation117_spill] sm:$0xff] %v4862_v40  ;;  %918 = vmatmul.f32.vlgmr.msrb.gmra.mxu0 %v4862_v40  ;;  %938 = vmatmul.f32.vlgmr.msrb.gmra.mxu1 %v4862_v40 }
 0x177   :  { %958 = vmatmul.f32.vlgmr.msra.gmra.mxu2 %v4862_v40  ;;  %978 = vmatmul.f32.vlgmr.msra.gmra.mxu3 %v4862_v40 }
 0x178   :  { %1210 = vmatpush.msrb.mxu0 %v4272_v21  ;;  %1230 = vmatpush.msrb.mxu1 %v4274_v22  ;;  %v6765_v21 = vld [vmem:[#allocation27_spill] sm:$0xff]  ;;  %v6766_v22 = vld [vmem:[#allocation28_spill] sm:$0xff] }
 0x179   :  { %1250 = vmatpush.msra.mxu2 %v4446_v59  ;;  %1270 = vmatpush.msra.mxu3 %v4424_v56  ;;  %v6783_v56 = vld [vmem:[#allocation51_spill] sm:$0xff]  ;;  %v6786_v59 = vld [vmem:[#allocation40_spill] sm:$0xff] }
 0x17a   :  { %1211 = vmatpush.msrb.mxu0 %v4276_v23  ;;  %1231 = vmatpush.msrb.mxu1 %v4280_v24  ;;  %v6767_v23 = vld [vmem:[#allocation29_spill] sm:$0xff]  ;;  %v6768_v24 = vld [vmem:[#allocation30_spill] sm:$0xff] }
 0x17b   :  { %1251 = vmatpush.msra.mxu2 %v4452_v61  ;;  %1271 = vmatpush.msra.mxu3 %v4426_v57  ;;  %v6784_v57 = vld [vmem:[#allocation45_spill] sm:$0xff]  ;;  %v6788_v61 = vld [vmem:[#allocation50_spill] sm:$0xff] }
 0x17c   :  { %1212 = vmatpush.msrb.mxu0 %v4282_v25  ;;  %1232 = vmatpush.msrb.mxu1 %v4284_v26  ;;  %v6769_v25 = vld [vmem:[#allocation31_spill] sm:$0xff]  ;;  %v6770_v26 = vld [vmem:[#allocation32_spill] sm:$0xff] }
 0x17d   :  { %1252 = vmatpush.msra.mxu2 %v4470_v0  ;;  %1272 = vmatpush.msra.mxu3 %v4444_v58  ;;  %v6785_v58 = vld [vmem:[#allocation39_spill] sm:$0xff] }
 0x17e   :  { %1213 = vmatpush.msrb.mxu0 %v4292_v28  ;;  %1233 = vmatpush.msrb.mxu1 %v4294_v29  ;;  %v6771_v28 = vld [vmem:[#allocation44_spill] sm:$0xff]  ;;  %v6772_v29 = vld [vmem:[#allocation41_spill] sm:$0xff] }
 0x17f   :  { %1253 = vmatpush.msra.mxu2 %v4481_v2  ;;  %1273 = vmatpush.msra.mxu3 %v4448_v60  ;;  %v6787_v60 = vld [vmem:[#allocation52_spill] sm:$0xff] }
 0x180   :  { %1214 = vmatpush.msrb.mxu0 %v4304_v30  ;;  %1234 = vmatpush.msrb.mxu1 %v4306_v31  ;;  %v6773_v30 = vld [vmem:[#allocation33_spill] sm:$0xff]  ;;  %v6774_v31 = vld [vmem:[#allocation34_spill] sm:$0xff] }
 0x181   :  { %1254 = vmatpush.msra.mxu2 %v4492_v6  ;;  %1274 = vmatpush.msra.mxu3 %v4468_v63  ;;  %v6789_v63 = vld [vmem:[#allocation104_spill] sm:$0xff] }
 0x182   :  { %1215 = vmatpush.msrb.mxu0 %v4310_v32  ;;  %1235 = vmatpush.msrb.mxu1 %v4312_v33  ;;  %v6775_v32 = vld [vmem:[#allocation46_spill] sm:$0xff] }
 0x183   :  { %1255 = vmatpush.msra.mxu2 %v4504_v8  ;;  %1275 = vmatpush.msra.mxu3 %v4472_v1  ;;  %v6776_v33 = vld [vmem:[#allocation42_spill] sm:$0xff]  ;;  %v6790_v1 = vld [vmem:[#allocation59_spill] sm:$0xff] }
 0x184   :  { %1216 = vmatpush.msrb.mxu0 %v4318_v34  ;;  %1236 = vmatpush.msrb.mxu1 %v4320_v35  ;;  %v6777_v34 = vld [vmem:[#allocation35_spill] sm:$0xff]  ;;  %v6778_v35 = vld [vmem:[#allocation36_spill] sm:$0xff]  ;;  %v228_v48 = vadd.f32 %v6790_v1, %v6789_v63 }
 0x185   :  { %1256 = vmatpush.msra.mxu2 %v4515_v10  ;;  %1276 = vmatpush.msra.mxu3 %v4490_v3 }
 0x186   :  { %1217 = vmatpush.msrb.mxu0 %v4330_v36  ;;  %1237 = vmatpush.msrb.mxu1 %v6765_v21  ;;  %v6779_v36 = vld [vmem:[#allocation48_spill] sm:$0xff] }
 0x187   :  { %1257 = vmatpush.msra.mxu2 %v4527_v4  ;;  %1277 = vmatpush.msra.mxu3 %v4499_v7 }
 0x188   :  { %1218 = vmatpush.msrb.mxu0 %v6766_v22  ;;  %1238 = vmatpush.msrb.mxu1 %v6767_v23  ;;  %v6795_v22 = vld [vmem:[#allocation65_spill] sm:$0xff] }
 0x189   :  { %1258 = vmatpush.msra.mxu2 %v4538_v13  ;;  %1278 = vmatpush.msra.mxu3 %v4513_v9  ;;  %v310_v23 = vadd.f32 %v6795_v22, %v4853_v55 }
 0x18a   :  { %1219 = vmatpush.msrb.mxu0 %v6768_v24  ;;  %1239 = vmatpush.msrb.mxu1 %v6769_v25 }
 0x18b   :  { %1259 = vmatpush.msra.mxu2 %v4550_v14  ;;  %1279 = vmatpush.msra.mxu3 %v4522_v11 }
 0x18c   :  { %1220 = vmatpush.msrb.mxu0 %v4356_v43  ;;  %1240 = vmatpush.msrb.mxu1 %v4358_v44  ;;  %v6780_v43 = vld [vmem:[#allocation43_spill] sm:$0xff]  ;;  %v6781_v44 = vld [vmem:[#allocation37_spill] sm:$0xff] }
 0x18d   :  { %1260 = vmatpush.msra.mxu2 %v4561_v38  ;;  %1280 = vmatpush.msra.mxu3 %v4536_v12 }
 0x18e   :  { %1221 = vmatpush.msrb.mxu0 %v4362_v46  ;;  %1241 = vmatpush.msrb.mxu1 %v6770_v26  ;;  %v6782_v46 = vld [vmem:[#allocation38_spill] sm:$0xff] }
 0x18f   :  { %1261 = vmatpush.msra.mxu2 %v6771_v28  ;;  %1281 = vmatpush.msra.mxu3 %v6772_v29 }
 0x190   :  { %1222 = vmatpush.msrb.mxu0 %v6773_v30  ;;  %1242 = vmatpush.msrb.mxu1 %v6774_v31 }
 0x191   :  { %1262 = vmatpush.msra.mxu2 %v6775_v32  ;;  %1282 = vmatpush.msra.mxu3 %v6776_v33 }
 0x192   :  { %1223 = vmatpush.msrb.mxu0 %v6777_v34  ;;  %1243 = vmatpush.msrb.mxu1 %v6778_v35 }
 0x193   :  { %1263 = vmatpush.msra.mxu2 %v6779_v36  ;;  %1283 = vmatpush.msra.mxu3 %v6780_v43 }
 0x194   :  { %1224 = vmatpush.msrb.mxu0 %v6781_v44  ;;  %1244 = vmatpush.msrb.mxu1 %v6782_v46 }
 0x195   :  { %1264 = vmatpush.msra.mxu2 %v6783_v56  ;;  %1284 = vmatpush.msra.mxu3 %v6784_v57 }
 0x196   :  { %1225 = vmatpush.msrb.mxu0 %v6785_v58  ;;  %1245 = vmatpush.msrb.mxu1 %v6786_v59 }
 0x197   :  { %1265 = vmatpush.msra.mxu2 %v6787_v60  ;;  %1285 = vmatpush.msra.mxu3 %v6788_v61 }
 0x1f3   :  { %v919_v42 = vpop.f32.mrf.mxu0  ;;  %v939_v16 = vpop.f32.mrf.mxu1 }
 0x1f4   :  { %v982_v50 = vadd.f32 %v919_v42, %v228_v48  ;;  %v983_v62 = vadd.f32 %v939_v16, %v269_v49 }
 0x1f6   :  { %v3441_v45 = vmul.f32 -1.442695, %v982_v50  ;;  %v3442_v52 = vmul.f32 -1.442695, %v983_v62 }
 0x1f8   :  { %3520 = vpow2.f32 %v3441_v45 }
 0x1f9   :  { %3522 = vpow2.f32 %v3442_v52 }
 0x1fa   :  { %v979_v19 = vpop.f32.mrf.mxu3  ;;  %v959_v5 = vpop.f32.mrf.mxu2 }
 0x1fb   :  { %v985_v17 = vadd.f32 %v979_v19, %v351_v20  ;;  %v984_v26 = vadd.f32 %v959_v5, %v310_v23 }
 0x1fd   :  { %v3443_v41 = vmul.f32 -1.442695, %v985_v17 }
 0x1fe   :  { %v3521_v47 = vpop.eup %3520 }
 0x1ff   :  { %v3523_v51 = vpop.eup %3522  ;;  %v989_v27 = vadd.f32 1.0, %v3521_v47  ;;  %3524 = vpow2.f32 %v3443_v41 }
 0x200   :  { %v1008_v15 = vadd.f32 1.0, %v3523_v51 }
 0x201   :  { %3526 = vrcp.f32 %v989_v27  ;;  %v1001_v46 = vand.u32 2147483648, %v989_v27  ;;  %v999_v1 = vand.u32 2147483647, %v989_v27  ;;  %vm995_vm15 = vweird.f32 %v989_v27 }
 0x202   :  { %3528 = vrcp.f32 %v1008_v15  ;;  %v1020_v58 = vand.u32 2147483648, %v1008_v15  ;;  %v1018_v54 = vand.u32 2147483647, %v1008_v15  ;;  %vm1014_vm0 = vweird.f32 %v1008_v15 }
 0x203   :  { %v1002_v16 = vor.u32 1.1754944e-38, %v1001_v46  ;;  %vm1000_vm3 = vcmp.eq.f32.partialorder %v999_v1, 8.507059e+37  ;;  %v4965_v46 = vld [vmem:[#allocation12 + $0x1c8] sm:$0xff]  ;;  %v4974_v1 = vld [vmem:[#allocation12 + $0x1a0] sm:$0xff] }
 0x204   :  { %v1021_v45 = vor.u32 1.1754944e-38, %v1020_v58  ;;  %vm1019_vm4 = vcmp.eq.f32.partialorder %v1018_v54, 8.507059e+37  ;;  %v4968_v58 = vld [vmem:[#allocation12 + $0x1d0] sm:$0xff]  ;;  %v4981_v54 = vld [vmem:[#allocation12 + $0x1b8] sm:$0xff] }
 0x205   :  { %v3525_v21 = vpop.eup %3524 }
 0x206   :  { %v1028_v24 = vadd.f32 1.0, %v3525_v21 }
 0x207   :  { %v3527_v25 = vpop.eup %3526 }
 0x208   :  { %v3529_v30 = vpop.eup %3528  ;;  %v991_v31 = vmul.f32 %v3527_v25, %v989_v27  ;;  %3530 = vrcp.f32 %v1028_v24  ;;  %vm996_vm13 = vweird.f32 %v3527_v25  ;;  %v1040_v21 = vand.u32 2147483648, %v1028_v24 }
 0x209   :  { %v1010_v34 = vmul.f32 %v3529_v30, %v1008_v15  ;;  %3532 = vtanh.f32 %v984_v26  ;;  %vm1015_vm14 = vweird.f32 %v3529_v30  ;;  %vm997_vm1 = vmor %vm995_vm15, %vm996_vm13  ;;  %vm1034_vm6 = vweird.f32 %v1028_v24 }
 0x20a   :  { %v992_v35 = vsub.f32 1.0, %v991_v31  ;;  %vm1016_vm2 = vmor %vm1014_vm0, %vm1015_vm14  ;;  %v1038_v22 = vand.u32 2147483647, %v1028_v24 }
 0x20b   :  { %v1011_v44 = vsub.f32 1.0, %v1010_v34  ;;  %v4956_v34 = vld [vmem:[#allocation12 + $0x1f0] sm:$0xff] }
 0x20c   :  { %v993_v59 = vmul.f32 %v3527_v25, %v992_v35  ;;  %vm1039_vm8 = vcmp.eq.f32.partialorder %v1038_v22, 8.507059e+37  ;;  %v4959_v35 = vld [vmem:[#allocation12 + $0x1f8] sm:$0xff] }
 0x20d   :  { %v1012_v48 = vmul.f32 %v3529_v30, %v1011_v44  ;;  %v4962_v44 = vld [vmem:[#allocation12 + $0x1c0] sm:$0xff]  ;;  %v6811_v22 = vld [vmem:[#allocation70_spill] sm:$0xff] }
 0x20e   :  { %v3531_v49 = vpop.eup %3530  ;;  %v994_v42 = vadd.f32 %v3527_v25, %v993_v59  ;;  %v4971_v59 = vld [vmem:[#allocation12 + $0x1d8] sm:$0xff] }
 0x20f   :  { %v1013_v50 = vadd.f32 %v3529_v30, %v1012_v48  ;;  %v1030_v62 = vmul.f32 %v3531_v49, %v1028_v24  ;;  %v3533_v37 = vpop.eup %3532  ;;  %vm1035_vm5 = vweird.f32 %v3531_v49  ;;  %v4953_v24 = vld [vmem:[#allocation12 + $0x1e8] sm:$0xff] }
 0x210   :  { %v998_v52 = vsel %vm997_vm1, %v3527_v25, %v994_v42  ;;  %vm1036_vm7 = vmor %vm1034_vm6, %vm1035_vm5  ;;  %v1041_v25 = vor.u32 1.1754944e-38, %v1040_v21  ;;  %v4977_v48 = vld [vmem:[#allocation12 + $0x1a8] sm:$0xff] }
 0x211   :  { %v1003_v20 = vsel %vm1000_vm3, %v1002_v16, %v998_v52  ;;  %v1017_v19 = vsel %vm1016_vm2, %v3529_v30, %v1013_v50  ;;  %v1031_v17 = vsub.f32 1.0, %v1030_v62  ;;  %v4987_v42 = vld [vmem:[#allocation12 + $0x188] sm:$0xff]  ;;  %v4991_v16 = vld [vmem:[#allocation12 + $0x198] sm:$0xff]  ;;  %v4994_v50 = vld [vmem:[#allocation12 + $0x160] sm:$0xff] }
 0x212   :  { %v1022_v41 = vsel %vm1019_vm4, %v1021_v45, %v1017_v19  ;;  %v1045_v47 = vmul.f32 %v3533_v37, %v1003_v20  ;;  %v5001_v62 = vld [vmem:[#allocation12 + $0x178] sm:$0xff]  ;;  %v5004_v45 = vld [vmem:[#allocation12 + $0x140] sm:$0xff] }
 0x213   :  { %v1044_v51 = vmul.f32 %v1022_v41, %v4859_v39  ;;  %v1032_v5 = vmul.f32 %v3531_v49, %v1031_v17  ;;  %v4950_v39 = vld [vmem:[#allocation12 + $0x1e0] sm:$0xff]  ;;  %v5011_v52 = vld [vmem:[#allocation12 + $0x158] sm:$0xff]  ;;  %v5033_v17 = vld [vmem:[#allocation12 + $0xe8] sm:$0xff] }
 0x214   :  { %v5014_v37 = vld [vmem:[#allocation12 + $0x120] sm:$0xff]  ;;  %v6810_v41 = vld [vmem:[#allocation64_spill] sm:$0xff] }
 0x215   :  { %v4941_v27 = vadd.f32 %v1045_v47, %v1044_v51  ;;  %v1033_v15 = vadd.f32 %v3531_v49, %v1032_v5  ;;  %v5022_v20 = vld [vmem:[#allocation12 + $0x100] sm:$0xff] }
 0x216   :  { %v5030_v19 = vld [vmem:[#allocation12 + $0xe0] sm:$0xff] }
 0x217   :  { %3534 = vtanh.f32 %v4941_v27  ;;  %v1037_v23 = vsel %vm1036_vm7, %v3531_v49, %v1033_v15  ;;  %v4984_v49 = vld [vmem:[#allocation12 + $0x180] sm:$0xff] }
 0x218   :  { %v1042_v30 = vsel %vm1039_vm8, %v1041_v25, %v1037_v23  ;;  %v354_v23 = vadd.f32 %v6811_v22, %v6793_v53 }
 0x21d   :  { %v3535_v26 = vpop.eup %3534 }
 0x21e   :  { %v4944_v31 = vmul.f32 %v3535_v26, %v1042_v30 }
 0x220   :  { %6796 = vst [vmem:[#allocation27_spill] sm:$0xff] %v4944_v31  ;;  %1072 = vmatmul.f32.vlgmr.msra.gmra.mxu0 %v4944_v31  ;;  %1092 = vmatmul.f32.vlgmr.msra.gmra.mxu1 %v4944_v31 }
 0x221   :  { %1112 = vmatmul.f32.vlgmr.msrb.gmra.mxu2 %v4944_v31  ;;  %1132 = vmatmul.f32.vlgmr.msrb.gmra.mxu3 %v4944_v31 }
 0x222   :  { %1364 = vmatpush.msra.mxu0 %v4950_v39  ;;  %1384 = vmatpush.msra.mxu1 %v4953_v24 }
 0x223   :  { %1404 = vmatpush.msrb.mxu2 %v4956_v34  ;;  %1424 = vmatpush.msrb.mxu3 %v4959_v35 }
 0x224   :  { %1365 = vmatpush.msra.mxu0 %v4962_v44  ;;  %1385 = vmatpush.msra.mxu1 %v4965_v46 }
 0x225   :  { %1405 = vmatpush.msrb.mxu2 %v4968_v58  ;;  %1425 = vmatpush.msrb.mxu3 %v4971_v59 }
 0x226   :  { %1366 = vmatpush.msra.mxu0 %v4974_v1  ;;  %1386 = vmatpush.msra.mxu1 %v4977_v48 }
 0x227   :  { %1406 = vmatpush.msrb.mxu2 %v4470_v0  ;;  %1426 = vmatpush.msrb.mxu3 %v4981_v54  ;;  %v4997_v0 = vld [vmem:[#allocation12 + $0x168] sm:$0xff] }
 0x228   :  { %1367 = vmatpush.msra.mxu0 %v4984_v49  ;;  %1387 = vmatpush.msra.mxu1 %v4987_v42 }
 0x229   :  { %1407 = vmatpush.msrb.mxu2 %v4481_v2  ;;  %1427 = vmatpush.msrb.mxu3 %v4991_v16  ;;  %v5007_v2 = vld [vmem:[#allocation12 + $0x148] sm:$0xff] }
 0x22a   :  { %1368 = vmatpush.msra.mxu0 %v4994_v50  ;;  %1388 = vmatpush.msra.mxu1 %v4997_v0 }
 0x22b   :  { %1408 = vmatpush.msrb.mxu2 %v4492_v6  ;;  %1428 = vmatpush.msrb.mxu3 %v5001_v62  ;;  %v5017_v6 = vld [vmem:[#allocation12 + $0x128] sm:$0xff] }
 0x22c   :  { %1369 = vmatpush.msra.mxu0 %v5004_v45  ;;  %1389 = vmatpush.msra.mxu1 %v5007_v2 }
 0x22d   :  { %1409 = vmatpush.msrb.mxu2 %v4504_v8  ;;  %1429 = vmatpush.msrb.mxu3 %v5011_v52  ;;  %v5025_v8 = vld [vmem:[#allocation12 + $0x108] sm:$0xff] }
 0x22e   :  { %1370 = vmatpush.msra.mxu0 %v5014_v37  ;;  %1390 = vmatpush.msra.mxu1 %v5017_v6 }
 0x22f   :  { %1410 = vmatpush.msrb.mxu2 %v4515_v10  ;;  %1430 = vmatpush.msrb.mxu3 %v4490_v3  ;;  %v5038_v3 = vld [vmem:[#allocation12 + $0xc0] sm:$0xff]  ;;  %v5041_v10 = vld [vmem:[#allocation12 + $0xc8] sm:$0xff] }
 0x230   :  { %1371 = vmatpush.msra.mxu0 %v5022_v20  ;;  %1391 = vmatpush.msra.mxu1 %v5025_v8 }
 0x231   :  { %1411 = vmatpush.msrb.mxu2 %v4527_v4  ;;  %1431 = vmatpush.msrb.mxu3 %v4499_v7  ;;  %v5046_v7 = vld [vmem:[#allocation12 + $0xa0] sm:$0xff]  ;;  %v5049_v4 = vld [vmem:[#allocation12 + $0xa8] sm:$0xff] }
 0x232   :  { %1372 = vmatpush.msra.mxu0 %v5030_v19  ;;  %1392 = vmatpush.msra.mxu1 %v5033_v17  ;;  %6797 = vst [vmem:[#allocation28_spill] sm:$0xff] %v5046_v7 }
 0x233   :  { %1412 = vmatpush.msrb.mxu2 %v4538_v13  ;;  %1432 = vmatpush.msrb.mxu3 %v4513_v9  ;;  %6798 = vst [vmem:[#allocation29_spill] sm:$0xff] %v5049_v4  ;;  %v5054_v9 = vld [vmem:[#allocation12 + $0x80] sm:$0xff]  ;;  %v5057_v13 = vld [vmem:[#allocation12 + $0x88] sm:$0xff] }
 0x234   :  { %1373 = vmatpush.msra.mxu0 %v5038_v3  ;;  %1393 = vmatpush.msra.mxu1 %v5041_v10  ;;  %6799 = vst [vmem:[#allocation30_spill] sm:$0xff] %v5054_v9 }
 0x235   :  { %1413 = vmatpush.msrb.mxu2 %v4550_v14  ;;  %1433 = vmatpush.msrb.mxu3 %v4522_v11  ;;  %6800 = vst [vmem:[#allocation31_spill] sm:$0xff] %v5057_v13  ;;  %v5062_v11 = vld [vmem:[#allocation12 + $0x60] sm:$0xff]  ;;  %v5065_v14 = vld [vmem:[#allocation12 + $0x68] sm:$0xff] }
 0x236   :  { %1374 = vmatpush.msra.mxu0 %v5046_v7  ;;  %1394 = vmatpush.msra.mxu1 %v5049_v4  ;;  %6801 = vst [vmem:[#allocation32_spill] sm:$0xff] %v5062_v11 }
 0x237   :  { %1414 = vmatpush.msrb.mxu2 %v4561_v38  ;;  %1434 = vmatpush.msrb.mxu3 %v4536_v12  ;;  %6802 = vst [vmem:[#allocation44_spill] sm:$0xff] %v5065_v14  ;;  %v5070_v12 = vld [vmem:[#allocation12 + $0x40] sm:$0xff]  ;;  %v5073_v38 = vld [vmem:[#allocation12 + $0x48] sm:$0xff] }
 0x238   :  { %1375 = vmatpush.msra.mxu0 %v5054_v9  ;;  %1395 = vmatpush.msra.mxu1 %v5057_v13  ;;  %6803 = vst [vmem:[#allocation41_spill] sm:$0xff] %v5070_v12 }
 0x239   :  { %1415 = vmatpush.msrb.mxu2 %v6771_v28  ;;  %1435 = vmatpush.msrb.mxu3 %v6772_v29  ;;  %6804 = vst [vmem:[#allocation33_spill] sm:$0xff] %v5073_v38  ;;  %v5078_v28 = vld [vmem:[#allocation12 + $0x20] sm:$0xff]  ;;  %v5081_v29 = vld [vmem:[#allocation12 + $0x28] sm:$0xff] }
 0x23a   :  { %1376 = vmatpush.msra.mxu0 %v5062_v11  ;;  %1396 = vmatpush.msra.mxu1 %v5065_v14  ;;  %6805 = vst [vmem:[#allocation34_spill] sm:$0xff] %v5078_v28 }
 0x23b   :  { %1416 = vmatpush.msrb.mxu2 %v6775_v32  ;;  %1436 = vmatpush.msrb.mxu3 %v6776_v33  ;;  %6806 = vst [vmem:[#allocation46_spill] sm:$0xff] %v5081_v29  ;;  %v5086_v32 = vld [vmem:[#allocation12] sm:$0xff]  ;;  %v5089_v33 = vld [vmem:[#allocation12 + $0x8] sm:$0xff] }
 0x23c   :  { %1377 = vmatpush.msra.mxu0 %v5070_v12  ;;  %1397 = vmatpush.msra.mxu1 %v5073_v38  ;;  %6807 = vst [vmem:[#allocation42_spill] sm:$0xff] %v5086_v32 }
 0x23d   :  { %1417 = vmatpush.msrb.mxu2 %v6779_v36  ;;  %1437 = vmatpush.msrb.mxu3 %v6780_v43  ;;  %6808 = vst [vmem:[#allocation35_spill] sm:$0xff] %v5089_v33  ;;  %v6809_v36 = vld [vmem:[#allocation63_spill] sm:$0xff] }
 0x23e   :  { %1378 = vmatpush.msra.mxu0 %v5078_v28  ;;  %1398 = vmatpush.msra.mxu1 %v5081_v29  ;;  %v231_v43 = vadd.f32 %v6809_v36, %v6789_v63 }
 0x23f   :  { %1418 = vmatpush.msrb.mxu2 %v6783_v56  ;;  %1438 = vmatpush.msrb.mxu3 %v6784_v57  ;;  %v272_v56 = vadd.f32 %v6810_v41, %v6791_v18 }
 0x240   :  { %1379 = vmatpush.msra.mxu0 %v5086_v32  ;;  %1399 = vmatpush.msra.mxu1 %v5089_v33 }
 0x241   :  { %1419 = vmatpush.msrb.mxu2 %v6787_v60  ;;  %1439 = vmatpush.msrb.mxu3 %v6788_v61 }
 0x29d   :  { %v1073_v47 = vpop.f32.mrf.mxu0  ;;  %v1093_v57 = vpop.f32.mrf.mxu1 }
 0x29e   :  { %v1136_v51 = vadd.f32 %v1073_v47, %v231_v43  ;;  %v1137_v5 = vadd.f32 %v1093_v57, %v272_v56  ;;  %v6812_v56 = vld [vmem:[#allocation69_spill] sm:$0xff] }
 0x29f   :  { %v313_v47 = vadd.f32 %v6812_v56, %v4853_v55 }
 0x2a0   :  { %v3444_v15 = vmul.f32 -1.442695, %v1136_v51  ;;  %v3445_v21 = vmul.f32 -1.442695, %v1137_v5 }
 0x2a2   :  { %3536 = vpow2.f32 %v3444_v15 }
 0x2a3   :  { %3538 = vpow2.f32 %v3445_v21 }
 0x2a4   :  { %v1133_v60 = vpop.f32.mrf.mxu3  ;;  %v1113_v41 = vpop.f32.mrf.mxu2 }
 0x2a5   :  { %v1139_v25 = vadd.f32 %v1133_v60, %v354_v23  ;;  %v1138_v5 = vadd.f32 %v1113_v41, %v313_v47 }
 0x2a7   :  { %v3446_v61 = vmul.f32 -1.442695, %v1139_v25 }
 0x2a8   :  { %v3537_v26 = vpop.eup %3536 }
 0x2a9   :  { %v3539_v30 = vpop.eup %3538  ;;  %v1143_v36 = vadd.f32 1.0, %v3537_v26  ;;  %3540 = vpow2.f32 %v3446_v61 }
 0x2aa   :  { %v1162_v31 = vadd.f32 1.0, %v3539_v30 }
 0x2ab   :  { %3542 = vrcp.f32 %v1143_v36  ;;  %v1155_v25 = vand.u32 2147483648, %v1143_v36  ;;  %v1153_v30 = vand.u32 2147483647, %v1143_v36  ;;  %vm1149_vm11 = vweird.f32 %v1143_v36 }
 0x2ac   :  { %3544 = vrcp.f32 %v1162_v31  ;;  %v1174_v61 = vand.u32 2147483648, %v1162_v31  ;;  %v1172_v53 = vand.u32 2147483647, %v1162_v31  ;;  %vm1168_vm12 = vweird.f32 %v1162_v31 }
 0x2ad   :  { %v1156_v41 = vor.u32 1.1754944e-38, %v1155_v25  ;;  %vm1154_vm15 = vcmp.eq.f32.partialorder %v1153_v30, 8.507059e+37 }
 0x2ae   :  { %vm1173_vm0 = vcmp.eq.f32.partialorder %v1172_v53, 8.507059e+37 }
 0x2af   :  { %v3541_v43 = vpop.eup %3540 }
 0x2b0   :  { %v1182_v57 = vadd.f32 1.0, %v3541_v43 }
 0x2b1   :  { %v3543_v51 = vpop.eup %3542 }
 0x2b2   :  { %v3545_v15 = vpop.eup %3544  ;;  %v1145_v21 = vmul.f32 %v3543_v51, %v1143_v36  ;;  %3546 = vrcp.f32 %v1182_v57  ;;  %vm1150_vm9 = vweird.f32 %v3543_v51  ;;  %vm1188_vm2 = vweird.f32 %v1182_v57 }
 0x2b3   :  { %v1164_v22 = vmul.f32 %v3545_v15, %v1162_v31  ;;  %3548 = vtanh.f32 %v1138_v5  ;;  %vm1169_vm10 = vweird.f32 %v3545_v15  ;;  %vm1151_vm13 = vmor %vm1149_vm11, %vm1150_vm9 }
 0x2b4   :  { %v1146_v23 = vsub.f32 1.0, %v1145_v21  ;;  %vm1170_vm14 = vmor %vm1168_vm12, %vm1169_vm10  ;;  %v1175_v21 = vor.u32 1.1754944e-38, %v1174_v61 }
 0x2b5   :  { %v1165_v60 = vsub.f32 1.0, %v1164_v22 }
 0x2b6   :  { %v1147_v26 = vmul.f32 %v3543_v51, %v1146_v23 }
 0x2b7   :  { %v1166_v40 = vmul.f32 %v3545_v15, %v1165_v60 }
 0x2b8   :  { %v3547_v18 = vpop.eup %3546  ;;  %v1148_v56 = vadd.f32 %v3543_v51, %v1147_v26 }
 0x2b9   :  { %v1167_v43 = vadd.f32 %v3545_v15, %v1166_v40  ;;  %v1184_v47 = vmul.f32 %v3547_v18, %v1182_v57  ;;  %v3549_v5 = vpop.eup %3548  ;;  %vm1189_vm1 = vweird.f32 %v3547_v18  ;;  %v1194_v40 = vand.u32 2147483648, %v1182_v57 }
 0x2ba   :  { %v1152_v22 = vsel %vm1151_vm13, %v3543_v51, %v1148_v56  ;;  %v1192_v51 = vand.u32 2147483647, %v1182_v57  ;;  %vm1190_vm3 = vmor %vm1188_vm2, %vm1189_vm1  ;;  %v5154_v57 = vld [vmem:[#allocation12 + $0x110] sm:$0xff]  ;;  %v5157_v56 = vld [vmem:[#allocation12 + $0x118] sm:$0xff] }
 0x2bb   :  { %v1157_v55 = vsel %vm1154_vm15, %v1156_v41, %v1152_v22  ;;  %v1171_v23 = vsel %vm1170_vm14, %v3545_v15, %v1167_v43  ;;  %v1185_v63 = vsub.f32 1.0, %v1184_v47  ;;  %v1195_v61 = vor.u32 1.1754944e-38, %v1194_v40  ;;  %v5162_v41 = vld [vmem:[#allocation12 + $0xf0] sm:$0xff]  ;;  %v5165_v43 = vld [vmem:[#allocation12 + $0xf8] sm:$0xff] }
 0x2bc   :  { %v1176_v60 = vsel %vm1173_vm0, %v1175_v21, %v1171_v23  ;;  %v1199_v33 = vmul.f32 %v3549_v5, %v1157_v55  ;;  %vm1193_vm4 = vcmp.eq.f32.partialorder %v1192_v51, 8.507059e+37  ;;  %v5122_v55 = vld [vmem:[#allocation12 + $0x1b0] sm:$0xff]  ;;  %v5173_v21 = vld [vmem:[#allocation12 + $0xd8] sm:$0xff] }
 0x2bd   :  { %v1198_v32 = vmul.f32 %v1176_v60, %v4941_v27  ;;  %v1186_v26 = vmul.f32 %v3547_v18, %v1185_v63  ;;  %v5128_v63 = vld [vmem:[#allocation12 + $0x190] sm:$0xff]  ;;  %6815 = vst [vmem:[#allocation43_spill] sm:$0xff] %v5173_v21  ;;  %v5181_v5 = vld [vmem:[#allocation12 + $0xb8] sm:$0xff] }
 0x2be   :  { %v5140_v27 = vld [vmem:[#allocation12 + $0x150] sm:$0xff]  ;;  %6817 = vst [vmem:[#allocation38_spill] sm:$0xff] %v5181_v5  ;;  %v5189_v60 = vld [vmem:[#allocation12 + $0x98] sm:$0xff] }
 0x2bf   :  { %v5103_v36 = vadd.f32 %v1199_v33, %v1198_v32  ;;  %v1187_v31 = vadd.f32 %v3547_v18, %v1186_v26  ;;  %v5146_v32 = vld [vmem:[#allocation12 + $0x130] sm:$0xff]  ;;  %v5149_v33 = vld [vmem:[#allocation12 + $0x138] sm:$0xff]  ;;  %6819 = vst [vmem:[#allocation45_spill] sm:$0xff] %v5189_v60 }
 0x2c0   :  { %v5170_v47 = vld [vmem:[#allocation12 + $0xd0] sm:$0xff]  ;;  %v5205_v51 = vld [vmem:[#allocation12 + $0x58] sm:$0xff] }
 0x2c1   :  { %3550 = vtanh.f32 %v5103_v36  ;;  %v1191_v25 = vsel %vm1190_vm3, %v3547_v18, %v1187_v31  ;;  %v5134_v18 = vld [vmem:[#allocation12 + $0x170] sm:$0xff]  ;;  %6814 = vst [vmem:[#allocation48_spill] sm:$0xff] %v5170_v47  ;;  %v5197_v31 = vld [vmem:[#allocation12 + $0x78] sm:$0xff] }
 0x2c2   :  { %v1196_v15 = vsel %vm1193_vm4, %v1195_v61, %v1191_v25  ;;  %v5178_v22 = vld [vmem:[#allocation12 + $0xb0] sm:$0xff]  ;;  %6821 = vst [vmem:[#allocation40_spill] sm:$0xff] %v5197_v31  ;;  %v5213_v61 = vld [vmem:[#allocation12 + $0x38] sm:$0xff] }
 0x2c3   :  { %6816 = vst [vmem:[#allocation37_spill] sm:$0xff] %v5178_v22  ;;  %v5186_v23 = vld [vmem:[#allocation12 + $0x90] sm:$0xff] }
 0x2c4   :  { %6818 = vst [vmem:[#allocation51_spill] sm:$0xff] %v5186_v23  ;;  %v5194_v26 = vld [vmem:[#allocation12 + $0x70] sm:$0xff] }
 0x2c5   :  { %6820 = vst [vmem:[#allocation39_spill] sm:$0xff] %v5194_v26  ;;  %v5202_v40 = vld [vmem:[#allocation12 + $0x50] sm:$0xff] }
 0x2c6   :  { %6822 = vst [vmem:[#allocation52_spill] sm:$0xff] %v5202_v40  ;;  %v5210_v25 = vld [vmem:[#allocation12 + $0x30] sm:$0xff] }
 0x2c7   :  { %v3551_v53 = vpop.eup %3550  ;;  %6823 = vst [vmem:[#allocation50_spill] sm:$0xff] %v5205_v51 }
 0x2c8   :  { %v5106_v30 = vmul.f32 %v3551_v53, %v1196_v15  ;;  %6824 = vst [vmem:[#allocation59_spill] sm:$0xff] %v5210_v25  ;;  %v6826_v53 = vld [vmem:[#allocation42_spill] sm:$0xff]  ;;  %v6827_v15 = vld [vmem:[#allocation35_spill] sm:$0xff] }
 0x2c9   :  { %6825 = vst [vmem:[#allocation60_spill] sm:$0xff] %v5213_v61 }
 0x2ca   :  { %6813 = vst [vmem:[#allocation36_spill] sm:$0xff] %v5106_v30  ;;  %1226 = vmatmul.f32.vlgmr.msrb.gmra.mxu0 %v5106_v30  ;;  %1246 = vmatmul.f32.vlgmr.msrb.gmra.mxu1 %v5106_v30 }
 0x2cb   :  { %1266 = vmatmul.f32.vlgmr.msra.gmra.mxu2 %v5106_v30  ;;  %1286 = vmatmul.f32.vlgmr.msra.gmra.mxu3 %v5106_v30  ;;  %v5218_v30 = vld [vmem:[#allocation12 + $0x10] sm:$0xff] }
 0x2cc   :  { %1518 = vmatpush.msrb.mxu0 %v4950_v39  ;;  %1538 = vmatpush.msrb.mxu1 %v4953_v24  ;;  %6828 = vst [vmem:[#allocation66_spill] sm:$0xff] %v5218_v30 }
 0x2cd   :  { %1558 = vmatpush.msra.mxu2 %v4956_v34  ;;  %1578 = vmatpush.msra.mxu3 %v4959_v35 }
 0x2ce   :  { %1519 = vmatpush.msrb.mxu0 %v4962_v44  ;;  %1539 = vmatpush.msrb.mxu1 %v4965_v46 }
 0x2cf   :  { %1559 = vmatpush.msra.mxu2 %v4968_v58  ;;  %1579 = vmatpush.msra.mxu3 %v4971_v59 }
 0x2d0   :  { %1520 = vmatpush.msrb.mxu0 %v4974_v1  ;;  %1540 = vmatpush.msrb.mxu1 %v4977_v48 }
 0x2d1   :  { %1560 = vmatpush.msra.mxu2 %v5122_v55  ;;  %1580 = vmatpush.msra.mxu3 %v4981_v54 }
 0x2d2   :  { %1521 = vmatpush.msrb.mxu0 %v4984_v49  ;;  %1541 = vmatpush.msrb.mxu1 %v4987_v42 }
 0x2d3   :  { %1561 = vmatpush.msra.mxu2 %v5128_v63  ;;  %1581 = vmatpush.msra.mxu3 %v4991_v16 }
 0x2d4   :  { %1522 = vmatpush.msrb.mxu0 %v4994_v50  ;;  %1542 = vmatpush.msrb.mxu1 %v4997_v0 }
 0x2d5   :  { %1562 = vmatpush.msra.mxu2 %v5134_v18  ;;  %1582 = vmatpush.msra.mxu3 %v5001_v62 }
 0x2d6   :  { %1523 = vmatpush.msrb.mxu0 %v5004_v45  ;;  %1543 = vmatpush.msrb.mxu1 %v5007_v2 }
 0x2d7   :  { %1563 = vmatpush.msra.mxu2 %v5140_v27  ;;  %1583 = vmatpush.msra.mxu3 %v5011_v52 }
 0x2d8   :  { %1524 = vmatpush.msrb.mxu0 %v5014_v37  ;;  %1544 = vmatpush.msrb.mxu1 %v5017_v6 }
 0x2d9   :  { %1564 = vmatpush.msra.mxu2 %v5146_v32  ;;  %1584 = vmatpush.msra.mxu3 %v5149_v33 }
 0x2da   :  { %1525 = vmatpush.msrb.mxu0 %v5022_v20  ;;  %1545 = vmatpush.msrb.mxu1 %v5025_v8 }
 0x2db   :  { %1565 = vmatpush.msra.mxu2 %v5154_v57  ;;  %1585 = vmatpush.msra.mxu3 %v5157_v56 }
 0x2dc   :  { %1526 = vmatpush.msrb.mxu0 %v5030_v19  ;;  %1546 = vmatpush.msrb.mxu1 %v5033_v17 }
 0x2dd   :  { %1566 = vmatpush.msra.mxu2 %v5162_v41  ;;  %1586 = vmatpush.msra.mxu3 %v5165_v43 }
 0x2de   :  { %1527 = vmatpush.msrb.mxu0 %v5038_v3  ;;  %1547 = vmatpush.msrb.mxu1 %v5041_v10 }
 0x2df   :  { %1567 = vmatpush.msra.mxu2 %v5170_v47  ;;  %1587 = vmatpush.msra.mxu3 %v5173_v21 }
 0x2e0   :  { %1528 = vmatpush.msrb.mxu0 %v5046_v7  ;;  %1548 = vmatpush.msrb.mxu1 %v5049_v4 }
 0x2e1   :  { %1568 = vmatpush.msra.mxu2 %v5178_v22  ;;  %1588 = vmatpush.msra.mxu3 %v5181_v5 }
 0x2e2   :  { %1529 = vmatpush.msrb.mxu0 %v5054_v9  ;;  %1549 = vmatpush.msrb.mxu1 %v5057_v13 }
 0x2e3   :  { %1569 = vmatpush.msra.mxu2 %v5186_v23  ;;  %1589 = vmatpush.msra.mxu3 %v5189_v60  ;;  %v6835_v60 = vld [vmem:[#allocation74_spill] sm:$0xff] }
 0x2e4   :  { %1530 = vmatpush.msrb.mxu0 %v5062_v11  ;;  %1550 = vmatpush.msrb.mxu1 %v5065_v14  ;;  %v6834_v11 = vld [vmem:[#allocation115_spill] sm:$0xff] }
 0x2e5   :  { %1570 = vmatpush.msra.mxu2 %v5194_v26  ;;  %1590 = vmatpush.msra.mxu3 %v5197_v31 }
 0x2e6   :  { %1531 = vmatpush.msrb.mxu0 %v5070_v12  ;;  %1551 = vmatpush.msrb.mxu1 %v5073_v38  ;;  %v6833_v38 = vld [vmem:[#allocation49_spill] sm:$0xff] }
 0x2e7   :  { %1571 = vmatpush.msra.mxu2 %v5202_v40  ;;  %1591 = vmatpush.msra.mxu3 %v5205_v51  ;;  %v5221_v51 = vld [vmem:[#allocation12 + $0x18] sm:$0xff] }
 0x2e8   :  { %1532 = vmatpush.msrb.mxu0 %v5078_v28  ;;  %1552 = vmatpush.msrb.mxu1 %v5081_v29  ;;  %6829 = vst [vmem:[#allocation65_spill] sm:$0xff] %v5221_v51  ;;  %v6830_v29 = vld [vmem:[#allocation104_spill] sm:$0xff]  ;;  %v6831_v28 = vld [vmem:[#allocation47_spill] sm:$0xff] }
 0x2e9   :  { %1572 = vmatpush.msra.mxu2 %v5210_v25  ;;  %1592 = vmatpush.msra.mxu3 %v5213_v61  ;;  %v234_v40 = vadd.f32 %v6831_v28, %v6830_v29  ;;  %v6832_v25 = vld [vmem:[#allocation106_spill] sm:$0xff] }
 0x2ea   :  { %1533 = vmatpush.msrb.mxu0 %v6826_v53  ;;  %1553 = vmatpush.msrb.mxu1 %v6827_v15  ;;  %v275_v12 = vadd.f32 %v6833_v38, %v6832_v25 }
 0x2eb   :  { %1573 = vmatpush.msra.mxu2 %v5218_v30  ;;  %1593 = vmatpush.msra.mxu3 %v5221_v51  ;;  %v357_v30 = vadd.f32 %v6835_v60, %v6834_v11 }
 0x347   :  { %v1227_v31 = vpop.f32.mrf.mxu0  ;;  %v1247_v61 = vpop.f32.mrf.mxu1 }
 0x348   :  { %v1290_v26 = vadd.f32 %v1227_v31, %v234_v40  ;;  %v1291_v53 = vadd.f32 %v1247_v61, %v275_v12  ;;  %v6836_v12 = vld [vmem:[#allocation116_spill] sm:$0xff] }
 0x34a   :  { %v3447_v14 = vmul.f32 -1.442695, %v1290_v26  ;;  %v3448_v15 = vmul.f32 -1.442695, %v1291_v53  ;;  %v6837_v26 = vld [vmem:[#allocation73_spill] sm:$0xff] }
 0x34b   :  { %v316_v40 = vadd.f32 %v6837_v26, %v6836_v12 }
 0x34c   :  { %3552 = vpow2.f32 %v3447_v14 }
 0x34d   :  { %3554 = vpow2.f32 %v3448_v15 }
 0x34e   :  { %v1287_v23 = vpop.f32.mrf.mxu3  ;;  %v1267_v38 = vpop.f32.mrf.mxu2 }
 0x34f   :  { %v1293_v13 = vadd.f32 %v1287_v23, %v357_v30  ;;  %v1292_v53 = vadd.f32 %v1267_v38, %v316_v40 }
 0x351   :  { %v3449_v51 = vmul.f32 -1.442695, %v1293_v13 }
 0x352   :  { %v3553_v9 = vpop.eup %3552 }
 0x353   :  { %v3555_v5 = vpop.eup %3554  ;;  %v1297_v28 = vadd.f32 1.0, %v3553_v9  ;;  %3556 = vpow2.f32 %v3449_v51 }
 0x354   :  { %v1316_v29 = vadd.f32 1.0, %v3555_v5 }
 0x355   :  { %3558 = vrcp.f32 %v1297_v28  ;;  %v1309_v11 = vand.u32 2147483648, %v1297_v28  ;;  %v1307_v51 = vand.u32 2147483647, %v1297_v28  ;;  %vm1303_vm7 = vweird.f32 %v1297_v28 }
 0x356   :  { %3560 = vrcp.f32 %v1316_v29  ;;  %v1328_v9 = vand.u32 2147483648, %v1316_v29  ;;  %v1326_v22 = vand.u32 2147483647, %v1316_v29  ;;  %vm1322_vm8 = vweird.f32 %v1316_v29 }
 0x357   :  { %v1310_v38 = vor.u32 1.1754944e-38, %v1309_v11  ;;  %vm1308_vm11 = vcmp.eq.f32.partialorder %v1307_v51, 8.507059e+37 }
 0x358   :  { %vm1327_vm12 = vcmp.eq.f32.partialorder %v1326_v22, 8.507059e+37 }
 0x359   :  { %v3557_v31 = vpop.eup %3556 }
 0x35a   :  { %v1336_v14 = vadd.f32 1.0, %v3557_v31 }
 0x35b   :  { %v3559_v61 = vpop.eup %3558 }
 0x35c   :  { %v3561_v60 = vpop.eup %3560  ;;  %v1299_v15 = vmul.f32 %v3559_v61, %v1297_v28  ;;  %3562 = vrcp.f32 %v1336_v14  ;;  %vm1304_vm5 = vweird.f32 %v3559_v61  ;;  %vm1342_vm14 = vweird.f32 %v1336_v14 }
 0x35d   :  { %v1318_v30 = vmul.f32 %v3561_v60, %v1316_v29  ;;  %3564 = vtanh.f32 %v1292_v53  ;;  %vm1323_vm6 = vweird.f32 %v3561_v60  ;;  %vm1305_vm9 = vmor %vm1303_vm7, %vm1304_vm5  ;;  %v1348_v29 = vand.u32 2147483648, %v1336_v14 }
 0x35e   :  { %v1300_v13 = vsub.f32 1.0, %v1299_v15  ;;  %vm1324_vm10 = vmor %vm1322_vm8, %vm1323_vm6  ;;  %v1329_v15 = vor.u32 1.1754944e-38, %v1328_v9 }
 0x35f   :  { %v1319_v23 = vsub.f32 1.0, %v1318_v30  ;;  %v1349_v9 = vor.u32 1.1754944e-38, %v1348_v29  ;;  %v6857_v29 = vld [vmem:[#allocation34_spill] sm:$0xff] }
 0x360   :  { %v1301_v5 = vmul.f32 %v3559_v61, %v1300_v13 }
 0x361   :  { %v1320_v25 = vmul.f32 %v3561_v60, %v1319_v23 }
 0x362   :  { %v3563_v4 = vpop.eup %3562  ;;  %v1302_v26 = vadd.f32 %v3559_v61, %v1301_v5 }
 0x363   :  { %v1321_v31 = vadd.f32 %v3561_v60, %v1320_v25  ;;  %v1338_v40 = vmul.f32 %v3563_v4, %v1336_v14  ;;  %v3565_v53 = vpop.eup %3564  ;;  %vm1343_vm13 = vweird.f32 %v3563_v4  ;;  %v1346_v25 = vand.u32 2147483647, %v1336_v14  ;;  %v6845_v14 = vld [vmem:[#allocation30_spill] sm:$0xff] }
 0x364   :  { %v1306_v30 = vsel %vm1305_vm9, %v3559_v61, %v1302_v26  ;;  %vm1344_vm15 = vmor %vm1342_vm14, %vm1343_vm13  ;;  %v6846_v26 = vld [vmem:[#allocation31_spill] sm:$0xff] }
 0x365   :  { %v1311_v12 = vsel %vm1308_vm11, %v1310_v38, %v1306_v30  ;;  %v1325_v13 = vsel %vm1324_vm10, %v3561_v60, %v1321_v31  ;;  %v1339_v7 = vsub.f32 1.0, %v1338_v40  ;;  %vm1347_vm0 = vcmp.eq.f32.partialorder %v1346_v25, 8.507059e+37  ;;  %v6847_v38 = vld [vmem:[#allocation51_spill] sm:$0xff]  ;;  %v6848_v31 = vld [vmem:[#allocation45_spill] sm:$0xff]  ;;  %v6849_v40 = vld [vmem:[#allocation32_spill] sm:$0xff] }
 0x366   :  { %v1330_v23 = vsel %vm1327_vm12, %v1329_v15, %v1325_v13  ;;  %v1353_v21 = vmul.f32 %v3565_v53, %v1311_v12  ;;  %v6844_v12 = vld [vmem:[#allocation38_spill] sm:$0xff]  ;;  %v6850_v15 = vld [vmem:[#allocation44_spill] sm:$0xff]  ;;  %v6851_v30 = vld [vmem:[#allocation39_spill] sm:$0xff] }
 0x367   :  { %v1352_v47 = vmul.f32 %v1330_v23, %v5103_v36  ;;  %v1340_v5 = vmul.f32 %v3563_v4, %v1339_v7  ;;  %v6839_v7 = vld [vmem:[#allocation48_spill] sm:$0xff]  ;;  %v6853_v13 = vld [vmem:[#allocation41_spill] sm:$0xff]  ;;  %v6858_v25 = vld [vmem:[#allocation46_spill] sm:$0xff] }
 0x368   :  { %v6841_v36 = vld [vmem:[#allocation28_spill] sm:$0xff]  ;;  %v6854_v23 = vld [vmem:[#allocation33_spill] sm:$0xff] }
 0x369   :  { %v5233_v28 = vadd.f32 %v1353_v21, %v1352_v47  ;;  %v1341_v11 = vadd.f32 %v3563_v4, %v1340_v5  ;;  %v6842_v47 = vld [vmem:[#allocation29_spill] sm:$0xff]  ;;  %v6852_v53 = vld [vmem:[#allocation40_spill] sm:$0xff] }
 0x36a   :  { %v6843_v21 = vld [vmem:[#allocation37_spill] sm:$0xff]  ;;  %v6855_v5 = vld [vmem:[#allocation52_spill] sm:$0xff] }
 0x36b   :  { %3566 = vtanh.f32 %v5233_v28  ;;  %v1345_v61 = vsel %vm1344_vm15, %v3563_v4, %v1341_v11  ;;  %v6840_v4 = vld [vmem:[#allocation43_spill] sm:$0xff]  ;;  %v6856_v11 = vld [vmem:[#allocation50_spill] sm:$0xff] }
 0x36c   :  { %v1350_v60 = vsel %vm1347_vm0, %v1349_v9, %v1345_v61  ;;  %v6859_v61 = vld [vmem:[#allocation59_spill] sm:$0xff]  ;;  %v6860_v9 = vld [vmem:[#allocation60_spill] sm:$0xff] }
 0x371   :  { %v3567_v22 = vpop.eup %3566 }
 0x372   :  { %v5236_v51 = vmul.f32 %v3567_v22, %v1350_v60  ;;  %v6861_v22 = vld [vmem:[#allocation42_spill] sm:$0xff]  ;;  %v6862_v60 = vld [vmem:[#allocation35_spill] sm:$0xff] }
 0x374   :  { %6838 = vst [vmem:[#allocation63_spill] sm:$0xff] %v5236_v51  ;;  %1380 = vmatmul.f32.vlgmr.msra.gmra.mxu0 %v5236_v51  ;;  %1400 = vmatmul.f32.vlgmr.msra.gmra.mxu1 %v5236_v51 }
 0x375   :  { %1420 = vmatmul.f32.vlgmr.msrb.gmra.mxu2 %v5236_v51  ;;  %1440 = vmatmul.f32.vlgmr.msrb.gmra.mxu3 %v5236_v51  ;;  %v6863_v51 = vld [vmem:[#allocation66_spill] sm:$0xff] }
 0x376   :  { %1672 = vmatpush.msra.mxu0 %v4950_v39  ;;  %1692 = vmatpush.msra.mxu1 %v4953_v24 }
 0x377   :  { %1712 = vmatpush.msrb.mxu2 %v4956_v34  ;;  %1732 = vmatpush.msrb.mxu3 %v4959_v35 }
 0x378   :  { %1673 = vmatpush.msra.mxu0 %v4962_v44  ;;  %1693 = vmatpush.msra.mxu1 %v4965_v46 }
 0x379   :  { %1713 = vmatpush.msrb.mxu2 %v4968_v58  ;;  %1733 = vmatpush.msrb.mxu3 %v4971_v59 }
 0x37a   :  { %1674 = vmatpush.msra.mxu0 %v4974_v1  ;;  %1694 = vmatpush.msra.mxu1 %v4977_v48 }
 0x37b   :  { %1714 = vmatpush.msrb.mxu2 %v5122_v55  ;;  %1734 = vmatpush.msrb.mxu3 %v4981_v54 }
 0x37c   :  { %1675 = vmatpush.msra.mxu0 %v4984_v49  ;;  %1695 = vmatpush.msra.mxu1 %v4987_v42 }
 0x37d   :  { %1715 = vmatpush.msrb.mxu2 %v5128_v63  ;;  %1735 = vmatpush.msrb.mxu3 %v4991_v16 }
 0x37e   :  { %1676 = vmatpush.msra.mxu0 %v4994_v50  ;;  %1696 = vmatpush.msra.mxu1 %v4997_v0 }
 0x37f   :  { %1716 = vmatpush.msrb.mxu2 %v5134_v18  ;;  %1736 = vmatpush.msrb.mxu3 %v5001_v62 }
 0x380   :  { %1677 = vmatpush.msra.mxu0 %v5004_v45  ;;  %1697 = vmatpush.msra.mxu1 %v5007_v2 }
 0x381   :  { %1717 = vmatpush.msrb.mxu2 %v5140_v27  ;;  %1737 = vmatpush.msrb.mxu3 %v5011_v52 }
 0x382   :  { %1678 = vmatpush.msra.mxu0 %v5014_v37  ;;  %1698 = vmatpush.msra.mxu1 %v5017_v6 }
 0x383   :  { %1718 = vmatpush.msrb.mxu2 %v5146_v32  ;;  %1738 = vmatpush.msrb.mxu3 %v5149_v33 }
 0x384   :  { %1679 = vmatpush.msra.mxu0 %v5022_v20  ;;  %1699 = vmatpush.msra.mxu1 %v5025_v8 }
 0x385   :  { %1719 = vmatpush.msrb.mxu2 %v5154_v57  ;;  %1739 = vmatpush.msrb.mxu3 %v5157_v56 }
 0x386   :  { %1680 = vmatpush.msra.mxu0 %v5030_v19  ;;  %1700 = vmatpush.msra.mxu1 %v5033_v17 }
 0x387   :  { %1720 = vmatpush.msrb.mxu2 %v5162_v41  ;;  %1740 = vmatpush.msrb.mxu3 %v5165_v43 }
 0x388   :  { %1681 = vmatpush.msra.mxu0 %v5038_v3  ;;  %1701 = vmatpush.msra.mxu1 %v5041_v10 }
 0x389   :  { %1721 = vmatpush.msrb.mxu2 %v6839_v7  ;;  %1741 = vmatpush.msrb.mxu3 %v6840_v4 }
 0x38a   :  { %1682 = vmatpush.msra.mxu0 %v6841_v36  ;;  %1702 = vmatpush.msra.mxu1 %v6842_v47 }
 0x38b   :  { %1722 = vmatpush.msrb.mxu2 %v6843_v21  ;;  %1742 = vmatpush.msrb.mxu3 %v6844_v12 }
 0x38c   :  { %1683 = vmatpush.msra.mxu0 %v6845_v14  ;;  %1703 = vmatpush.msra.mxu1 %v6846_v26 }
 0x38d   :  { %1723 = vmatpush.msrb.mxu2 %v6847_v38  ;;  %1743 = vmatpush.msrb.mxu3 %v6848_v31  ;;  %v6870_v38 = vld [vmem:[#allocation78_spill] sm:$0xff] }
 0x38e   :  { %1684 = vmatpush.msra.mxu0 %v6849_v40  ;;  %1704 = vmatpush.msra.mxu1 %v6850_v15 }
 0x38f   :  { %1724 = vmatpush.msrb.mxu2 %v6851_v30  ;;  %1744 = vmatpush.msrb.mxu3 %v6852_v53  ;;  %v6868_v30 = vld [vmem:[#allocation54_spill] sm:$0xff] }
 0x390   :  { %1685 = vmatpush.msra.mxu0 %v6853_v13  ;;  %1705 = vmatpush.msra.mxu1 %v6854_v23  ;;  %v6864_v13 = vld [vmem:[#allocation65_spill] sm:$0xff]  ;;  %v6865_v23 = vld [vmem:[#allocation104_spill] sm:$0xff] }
 0x391   :  { %1725 = vmatpush.msrb.mxu2 %v6855_v5  ;;  %1745 = vmatpush.msrb.mxu3 %v6856_v11  ;;  %v6866_v5 = vld [vmem:[#allocation53_spill] sm:$0xff]  ;;  %v6867_v11 = vld [vmem:[#allocation106_spill] sm:$0xff] }
 0x392   :  { %1686 = vmatpush.msra.mxu0 %v6857_v29  ;;  %1706 = vmatpush.msra.mxu1 %v6858_v25  ;;  %v237_v53 = vadd.f32 %v6866_v5, %v6865_v23  ;;  %v278_v29 = vadd.f32 %v6868_v30, %v6867_v11 }
 0x393   :  { %1726 = vmatpush.msrb.mxu2 %v6859_v61  ;;  %1746 = vmatpush.msrb.mxu3 %v6860_v9 }
 0x394   :  { %1687 = vmatpush.msra.mxu0 %v6861_v22  ;;  %1707 = vmatpush.msra.mxu1 %v6862_v60  ;;  %v6869_v22 = vld [vmem:[#allocation115_spill] sm:$0xff] }
 0x395   :  { %1727 = vmatpush.msrb.mxu2 %v6863_v51  ;;  %1747 = vmatpush.msrb.mxu3 %v6864_v13  ;;  %v360_v60 = vadd.f32 %v6870_v38, %v6869_v22 }
 0x3f1   :  { %v1381_v15 = vpop.f32.mrf.mxu0  ;;  %v1401_v25 = vpop.f32.mrf.mxu1 }
 0x3f2   :  { %v1444_v40 = vadd.f32 %v1381_v15, %v237_v53  ;;  %v1445_v61 = vadd.f32 %v1401_v25, %v278_v29  ;;  %v6871_v53 = vld [vmem:[#allocation116_spill] sm:$0xff] }
 0x3f4   :  { %v3450_v31 = vmul.f32 -1.442695, %v1444_v40  ;;  %v3451_v9 = vmul.f32 -1.442695, %v1445_v61  ;;  %v6872_v40 = vld [vmem:[#allocation77_spill] sm:$0xff] }
 0x3f5   :  { %v319_v29 = vadd.f32 %v6872_v40, %v6871_v53 }
 0x3f6   :  { %3568 = vpow2.f32 %v3450_v31 }
 0x3f7   :  { %3570 = vpow2.f32 %v3451_v9 }
 0x3f8   :  { %v1441_v51 = vpop.f32.mrf.mxu3  ;;  %v1421_v30 = vpop.f32.mrf.mxu2 }
 0x3f9   :  { %v1447_v26 = vadd.f32 %v1441_v51, %v360_v60  ;;  %v1446_v61 = vadd.f32 %v1421_v30, %v319_v29 }
 0x3fb   :  { %v3452_v13 = vmul.f32 -1.442695, %v1447_v26 }
 0x3fc   :  { %v3569_v14 = vpop.eup %3568 }
 0x3fd   :  { %v3571_v12 = vpop.eup %3570  ;;  %v1451_v5 = vadd.f32 1.0, %v3569_v14  ;;  %3572 = vpow2.f32 %v3452_v13 }
 0x3fe   :  { %v1470_v23 = vadd.f32 1.0, %v3571_v12 }
 0x3ff   :  { %3574 = vrcp.f32 %v1451_v5  ;;  %v1463_v22 = vand.u32 2147483648, %v1451_v5  ;;  %v1461_v13 = vand.u32 2147483647, %v1451_v5  ;;  %vm1457_vm3 = vweird.f32 %v1451_v5 }
 0x400   :  { %3576 = vrcp.f32 %v1470_v23  ;;  %v1482_v14 = vand.u32 2147483648, %v1470_v23  ;;  %v1480_v21 = vand.u32 2147483647, %v1470_v23  ;;  %vm1476_vm4 = vweird.f32 %v1470_v23 }
 0x401   :  { %v1464_v30 = vor.u32 1.1754944e-38, %v1463_v22  ;;  %vm1462_vm7 = vcmp.eq.f32.partialorder %v1461_v13, 8.507059e+37 }
 0x402   :  { %vm1481_vm8 = vcmp.eq.f32.partialorder %v1480_v21, 8.507059e+37 }
 0x403   :  { %v3573_v15 = vpop.eup %3572 }
 0x404   :  { %v1490_v31 = vadd.f32 1.0, %v3573_v15 }
 0x405   :  { %v3575_v25 = vpop.eup %3574 }
 0x406   :  { %v3577_v38 = vpop.eup %3576  ;;  %v1453_v9 = vmul.f32 %v3575_v25, %v1451_v5  ;;  %3578 = vrcp.f32 %v1490_v31  ;;  %vm1458_vm1 = vweird.f32 %v3575_v25  ;;  %vm1496_vm10 = vweird.f32 %v1490_v31 }
 0x407   :  { %v1472_v51 = vmul.f32 %v3577_v38, %v1470_v23  ;;  %3580 = vtanh.f32 %v1446_v61  ;;  %vm1477_vm2 = vweird.f32 %v3577_v38  ;;  %vm1459_vm5 = vmor %vm1457_vm3, %vm1458_vm1  ;;  %v1500_v22 = vand.u32 2147483647, %v1490_v31 }
 0x408   :  { %v1454_v26 = vsub.f32 1.0, %v1453_v9  ;;  %vm1478_vm6 = vmor %vm1476_vm4, %vm1477_vm2  ;;  %v1483_v9 = vor.u32 1.1754944e-38, %v1482_v14 }
 0x409   :  { %v1473_v60 = vsub.f32 1.0, %v1472_v51  ;;  %vm1501_vm12 = vcmp.eq.f32.partialorder %v1500_v22, 8.507059e+37 }
 0x40a   :  { %v1455_v12 = vmul.f32 %v3575_v25, %v1454_v26 }
 0x40b   :  { %v1474_v11 = vmul.f32 %v3577_v38, %v1473_v60 }
 0x40c   :  { %v3579_v47 = vpop.eup %3578  ;;  %v1456_v40 = vadd.f32 %v3575_v25, %v1455_v12 }
 0x40d   :  { %v1475_v15 = vadd.f32 %v3577_v38, %v1474_v11  ;;  %v1492_v29 = vmul.f32 %v3579_v47, %v1490_v31  ;;  %v3581_v61 = vpop.eup %3580  ;;  %vm1497_vm9 = vweird.f32 %v3579_v47  ;;  %v1502_v11 = vand.u32 2147483648, %v1490_v31 }
 0x40e   :  { %v1460_v51 = vsel %vm1459_vm5, %v3575_v25, %v1456_v40  ;;  %vm1498_vm11 = vmor %vm1496_vm10, %vm1497_vm9 }
 0x40f   :  { %v1465_v53 = vsel %vm1462_vm7, %v1464_v30, %v1460_v51  ;;  %v1479_v26 = vsel %vm1478_vm6, %v3577_v38, %v1475_v15  ;;  %v1493_v36 = vsub.f32 1.0, %v1492_v29  ;;  %v1503_v14 = vor.u32 1.1754944e-38, %v1502_v11  ;;  %v6906_v51 = vld [vmem:[#allocation116_spill] sm:$0xff] }
 0x410   :  { %v1484_v60 = vsel %vm1481_vm8, %v1483_v9, %v1479_v26  ;;  %v1507_v4 = vmul.f32 %v3581_v61, %v1465_v53  ;;  %v6907_v61 = vld [vmem:[#allocation79_spill] sm:$0xff] }
 0x411   :  { %v1506_v7 = vmul.f32 %v1484_v60, %v5233_v28  ;;  %v1494_v12 = vmul.f32 %v3579_v47, %v1493_v36  ;;  %v6904_v28 = vld [vmem:[#allocation115_spill] sm:$0xff]  ;;  %v322_v26 = vadd.f32 %v6907_v61, %v6906_v51  ;;  %v6909_v61 = vld [vmem:[#allocation57_spill] sm:$0xff] }
 0x413   :  { %v5315_v5 = vadd.f32 %v1507_v4, %v1506_v7  ;;  %v1495_v23 = vadd.f32 %v3579_v47, %v1494_v12  ;;  %v6905_v7 = vld [vmem:[#allocation81_spill] sm:$0xff] }
 0x414   :  { %v363_v4 = vadd.f32 %v6905_v7, %v6904_v28  ;;  %v5430_v7 = vld [vmem:[#allocation15 + $0x1a0] sm:$0xff] }
 0x415   :  { %3582 = vtanh.f32 %v5315_v5  ;;  %v1499_v25 = vsel %vm1498_vm11, %v3579_v47, %v1495_v23 }
 0x416   :  { %v1504_v38 = vsel %vm1501_vm12, %v1503_v14, %v1499_v25 }
 0x41b   :  { %v3583_v21 = vpop.eup %3582 }
 0x41c   :  { %v5318_v13 = vmul.f32 %v3583_v21, %v1504_v38 }
 0x41e   :  { %6873 = vst [vmem:[#allocation64_spill] sm:$0xff] %v5318_v13  ;;  %1534 = vmatmul.f32.vlgmr.msrb.gmra.mxu0 %v5318_v13  ;;  %1554 = vmatmul.f32.vlgmr.msrb.gmra.mxu1 %v5318_v13 }
 0x41f   :  { %1574 = vmatmul.f32.vlgmr.msra.gmra.mxu2 %v5318_v13  ;;  %1594 = vmatmul.f32.vlgmr.msra.gmra.mxu3 %v5318_v13  ;;  %v5582_v13 = vld [vmem:[#allocation15 + $0x20] sm:$0xff] }
 0x420   :  { %1826 = vmatpush.msrb.mxu0 %v4950_v39  ;;  %1846 = vmatpush.msrb.mxu1 %v4953_v24  ;;  %v6874_v39 = vld [vmem:[#allocation48_spill] sm:$0xff]  ;;  %v6875_v24 = vld [vmem:[#allocation43_spill] sm:$0xff] }
 0x421   :  { %1866 = vmatpush.msra.mxu2 %v4956_v34  ;;  %1886 = vmatpush.msra.mxu3 %v4959_v35  ;;  %v6876_v34 = vld [vmem:[#allocation28_spill] sm:$0xff]  ;;  %v6877_v35 = vld [vmem:[#allocation29_spill] sm:$0xff] }
 0x422   :  { %1827 = vmatpush.msrb.mxu0 %v4962_v44  ;;  %1847 = vmatpush.msrb.mxu1 %v4965_v46  ;;  %v6878_v44 = vld [vmem:[#allocation37_spill] sm:$0xff]  ;;  %v6879_v46 = vld [vmem:[#allocation38_spill] sm:$0xff] }
 0x423   :  { %1867 = vmatpush.msra.mxu2 %v4968_v58  ;;  %1887 = vmatpush.msra.mxu3 %v4971_v59  ;;  %v6880_v58 = vld [vmem:[#allocation30_spill] sm:$0xff]  ;;  %v6881_v59 = vld [vmem:[#allocation31_spill] sm:$0xff] }
 0x424   :  { %1828 = vmatpush.msrb.mxu0 %v4974_v1  ;;  %1848 = vmatpush.msrb.mxu1 %v4977_v48  ;;  %v6882_v1 = vld [vmem:[#allocation51_spill] sm:$0xff]  ;;  %v6883_v48 = vld [vmem:[#allocation45_spill] sm:$0xff] }
 0x425   :  { %1868 = vmatpush.msra.mxu2 %v5122_v55  ;;  %1888 = vmatpush.msra.mxu3 %v4981_v54  ;;  %v6884_v54 = vld [vmem:[#allocation32_spill] sm:$0xff] }
 0x426   :  { %1829 = vmatpush.msrb.mxu0 %v4984_v49  ;;  %1849 = vmatpush.msrb.mxu1 %v4987_v42  ;;  %v6885_v49 = vld [vmem:[#allocation44_spill] sm:$0xff]  ;;  %v6886_v42 = vld [vmem:[#allocation39_spill] sm:$0xff] }
 0x427   :  { %1869 = vmatpush.msra.mxu2 %v5128_v63  ;;  %1889 = vmatpush.msra.mxu3 %v4991_v16  ;;  %v6887_v16 = vld [vmem:[#allocation40_spill] sm:$0xff]  ;;  %v6902_v63 = vld [vmem:[#allocation106_spill] sm:$0xff] }
 0x428   :  { %1830 = vmatpush.msrb.mxu0 %v4994_v50  ;;  %1850 = vmatpush.msrb.mxu1 %v4997_v0  ;;  %v6888_v50 = vld [vmem:[#allocation41_spill] sm:$0xff]  ;;  %6934 = vst [vmem:[#allocation40_spill] sm:$0xff] %v5582_v13 }
 0x429   :  { %1870 = vmatpush.msra.mxu2 %v5134_v18  ;;  %1890 = vmatpush.msra.mxu3 %v5001_v62  ;;  %v6889_v0 = vld [vmem:[#allocation33_spill] sm:$0xff]  ;;  %v6890_v62 = vld [vmem:[#allocation52_spill] sm:$0xff] }
 0x42a   :  { %1831 = vmatpush.msrb.mxu0 %v5004_v45  ;;  %1851 = vmatpush.msrb.mxu1 %v5007_v2  ;;  %v6891_v45 = vld [vmem:[#allocation50_spill] sm:$0xff]  ;;  %v6903_v18 = vld [vmem:[#allocation56_spill] sm:$0xff] }
 0x42b   :  { %1871 = vmatpush.msra.mxu2 %v5140_v27  ;;  %1891 = vmatpush.msra.mxu3 %v5011_v52  ;;  %v6892_v2 = vld [vmem:[#allocation34_spill] sm:$0xff]  ;;  %v281_v27 = vadd.f32 %v6903_v18, %v6902_v63 }
 0x42c   :  { %1832 = vmatpush.msrb.mxu0 %v5014_v37  ;;  %1852 = vmatpush.msrb.mxu1 %v5017_v6  ;;  %v6893_v52 = vld [vmem:[#allocation46_spill] sm:$0xff]  ;;  %v6894_v37 = vld [vmem:[#allocation59_spill] sm:$0xff]  ;;  %v6895_v6 = vld [vmem:[#allocation60_spill] sm:$0xff] }
 0x42d   :  { %1872 = vmatpush.msra.mxu2 %v5146_v32  ;;  %1892 = vmatpush.msra.mxu3 %v5149_v33 }
 0x42e   :  { %1833 = vmatpush.msrb.mxu0 %v5022_v20  ;;  %1853 = vmatpush.msrb.mxu1 %v5025_v8  ;;  %v6896_v20 = vld [vmem:[#allocation42_spill] sm:$0xff]  ;;  %v6897_v8 = vld [vmem:[#allocation35_spill] sm:$0xff] }
 0x42f   :  { %1873 = vmatpush.msra.mxu2 %v5154_v57  ;;  %1893 = vmatpush.msra.mxu3 %v5157_v56 }
 0x430   :  { %1834 = vmatpush.msrb.mxu0 %v5030_v19  ;;  %1854 = vmatpush.msrb.mxu1 %v5033_v17  ;;  %v6898_v19 = vld [vmem:[#allocation66_spill] sm:$0xff]  ;;  %v6899_v17 = vld [vmem:[#allocation65_spill] sm:$0xff] }
 0x431   :  { %1874 = vmatpush.msra.mxu2 %v5162_v41  ;;  %1894 = vmatpush.msra.mxu3 %v5165_v43 }
 0x432   :  { %1835 = vmatpush.msrb.mxu0 %v5038_v3  ;;  %1855 = vmatpush.msrb.mxu1 %v5041_v10  ;;  %v6900_v3 = vld [vmem:[#allocation104_spill] sm:$0xff]  ;;  %v6901_v10 = vld [vmem:[#allocation55_spill] sm:$0xff] }
 0x433   :  { %1875 = vmatpush.msra.mxu2 %v6874_v39  ;;  %1895 = vmatpush.msra.mxu3 %v6875_v24  ;;  %v240_v55 = vadd.f32 %v6901_v10, %v6900_v3 }
 0x434   :  { %1836 = vmatpush.msrb.mxu0 %v6876_v34  ;;  %1856 = vmatpush.msrb.mxu1 %v6877_v35 }
 0x435   :  { %1876 = vmatpush.msra.mxu2 %v6878_v44  ;;  %1896 = vmatpush.msra.mxu3 %v6879_v46 }
 0x436   :  { %1837 = vmatpush.msrb.mxu0 %v6880_v58  ;;  %1857 = vmatpush.msrb.mxu1 %v6881_v59 }
 0x437   :  { %1877 = vmatpush.msra.mxu2 %v6882_v1  ;;  %1897 = vmatpush.msra.mxu3 %v6883_v48 }
 0x438   :  { %1838 = vmatpush.msrb.mxu0 %v6884_v54  ;;  %1858 = vmatpush.msrb.mxu1 %v6885_v49 }
 0x439   :  { %1878 = vmatpush.msra.mxu2 %v6886_v42  ;;  %1898 = vmatpush.msra.mxu3 %v6887_v16 }
 0x43a   :  { %1839 = vmatpush.msrb.mxu0 %v6888_v50  ;;  %1859 = vmatpush.msrb.mxu1 %v6889_v0 }
 0x43b   :  { %1879 = vmatpush.msra.mxu2 %v6890_v62  ;;  %1899 = vmatpush.msra.mxu3 %v6891_v45 }
 0x43c   :  { %1840 = vmatpush.msrb.mxu0 %v6892_v2  ;;  %1860 = vmatpush.msrb.mxu1 %v6893_v52 }
 0x43d   :  { %1880 = vmatpush.msra.mxu2 %v6894_v37  ;;  %1900 = vmatpush.msra.mxu3 %v6895_v6 }
 0x43e   :  { %1841 = vmatpush.msrb.mxu0 %v6896_v20  ;;  %1861 = vmatpush.msrb.mxu1 %v6897_v8 }
 0x43f   :  { %1881 = vmatpush.msra.mxu2 %v6898_v19  ;;  %1901 = vmatpush.msra.mxu3 %v6899_v17 }
 0x49b   :  { %v1535_v32 = vpop.f32.mrf.mxu0  ;;  %v1555_v33 = vpop.f32.mrf.mxu1 }
 0x49c   :  { %v1598_v57 = vadd.f32 %v1535_v32, %v240_v55  ;;  %v1599_v56 = vadd.f32 %v1555_v33, %v281_v27  ;;  %v5408_v27 = vld [vmem:[#allocation15 + $0x1e8] sm:$0xff]  ;;  %v5410_v32 = vld [vmem:[#allocation15 + $0x1f0] sm:$0xff]  ;;  %v5414_v33 = vld [vmem:[#allocation15 + $0x1f8] sm:$0xff] }
 0x49e   :  { %v3453_v41 = vmul.f32 -1.442695, %v1598_v57  ;;  %v3454_v43 = vmul.f32 -1.442695, %v1599_v56  ;;  %v5418_v57 = vld [vmem:[#allocation15 + $0x1c0] sm:$0xff]  ;;  %v5420_v56 = vld [vmem:[#allocation15 + $0x1c8] sm:$0xff] }
 0x4a0   :  { %3584 = vpow2.f32 %v3453_v41  ;;  %v5422_v41 = vld [vmem:[#allocation15 + $0x1d0] sm:$0xff] }
 0x4a1   :  { %3586 = vpow2.f32 %v3454_v43  ;;  %v5426_v43 = vld [vmem:[#allocation15 + $0x1d8] sm:$0xff] }
 0x4a2   :  { %v1595_v36 = vpop.f32.mrf.mxu3  ;;  %v1575_v29 = vpop.f32.mrf.mxu2 }
 0x4a3   :  { %v1601_v47 = vadd.f32 %v1595_v36, %v363_v4  ;;  %v1600_v23 = vadd.f32 %v1575_v29, %v322_v26  ;;  %v5432_v4 = vld [vmem:[#allocation15 + $0x1a8] sm:$0xff]  ;;  %v5434_v36 = vld [vmem:[#allocation15 + $0x1b0] sm:$0xff]  ;;  %v243_v26 = vadd.f32 %v6909_v61, %v6900_v3  ;;  %v5536_v61 = vld [vmem:[#allocation15 + $0xb8] sm:$0xff] }
 0x4a4   :  { %v5456_v29 = vld [vmem:[#allocation15 + $0x168] sm:$0xff]  ;;  %6921 = vst [vmem:[#allocation48_spill] sm:$0xff] %v5536_v61  ;;  %v5588_v3 = vld [vmem:[#allocation15 + $0x30] sm:$0xff] }
 0x4a5   :  { %v3455_v53 = vmul.f32 -1.442695, %v1601_v47  ;;  %v5438_v47 = vld [vmem:[#allocation15 + $0x1b8] sm:$0xff]  ;;  %6936 = vst [vmem:[#allocation33_spill] sm:$0xff] %v5588_v3 }
 0x4a6   :  { %v3585_v31 = vpop.eup %3584 }
 0x4a7   :  { %v3587_v40 = vpop.eup %3586  ;;  %v1605_v30 = vadd.f32 1.0, %v3585_v31  ;;  %3588 = vpow2.f32 %v3455_v53  ;;  %v5442_v53 = vld [vmem:[#allocation15 + $0x180] sm:$0xff]  ;;  %v5444_v31 = vld [vmem:[#allocation15 + $0x188] sm:$0xff] }
 0x4a8   :  { %v1624_v15 = vadd.f32 1.0, %v3587_v40  ;;  %v5446_v40 = vld [vmem:[#allocation15 + $0x190] sm:$0xff] }
 0x4a9   :  { %3590 = vrcp.f32 %v1605_v30  ;;  %v1617_v38 = vand.u32 2147483648, %v1605_v30  ;;  %v1615_v34 = vand.u32 2147483647, %v1605_v30  ;;  %vm1611_vm15 = vweird.f32 %v1605_v30 }
 0x4aa   :  { %3592 = vrcp.f32 %v1624_v15  ;;  %v1636_v39 = vand.u32 2147483648, %v1624_v15  ;;  %v1634_v44 = vand.u32 2147483647, %v1624_v15  ;;  %vm1630_vm0 = vweird.f32 %v1624_v15 }
 0x4ab   :  { %v1618_v59 = vor.u32 1.1754944e-38, %v1617_v38  ;;  %vm1616_vm3 = vcmp.eq.f32.partialorder %v1615_v34, 8.507059e+37  ;;  %v5482_v34 = vld [vmem:[#allocation15 + $0x120] sm:$0xff] }
 0x4ac   :  { %v1637_v54 = vor.u32 1.1754944e-38, %v1636_v39  ;;  %vm1635_vm4 = vcmp.eq.f32.partialorder %v1634_v44, 8.507059e+37  ;;  %v5486_v44 = vld [vmem:[#allocation15 + $0x130] sm:$0xff] }
 0x4ad   :  { %v3589_v9 = vpop.eup %3588 }
 0x4ae   :  { %v1644_v60 = vadd.f32 1.0, %v3589_v9  ;;  %v5458_v9 = vld [vmem:[#allocation15 + $0x170] sm:$0xff] }
 0x4af   :  { %v3591_v12 = vpop.eup %3590 }
 0x4b0   :  { %v3593_v11 = vpop.eup %3592  ;;  %v1607_v22 = vmul.f32 %v3591_v12, %v1605_v30  ;;  %3594 = vrcp.f32 %v1644_v60  ;;  %vm1612_vm13 = vweird.f32 %v3591_v12  ;;  %v1656_v20 = vand.u32 2147483648, %v1644_v60  ;;  %v5450_v30 = vld [vmem:[#allocation15 + $0x198] sm:$0xff] }
 0x4b1   :  { %v1626_v25 = vmul.f32 %v3593_v11, %v1624_v15  ;;  %3596 = vtanh.f32 %v1600_v23  ;;  %vm1631_vm14 = vweird.f32 %v3593_v11  ;;  %vm1613_vm1 = vmor %vm1611_vm15, %vm1612_vm13  ;;  %vm1650_vm6 = vweird.f32 %v1644_v60  ;;  %v5454_v15 = vld [vmem:[#allocation15 + $0x160] sm:$0xff]  ;;  %v5466_v23 = vld [vmem:[#allocation15 + $0x178] sm:$0xff] }
 0x4b2   :  { %v1608_v14 = vsub.f32 1.0, %v1607_v22  ;;  %vm1632_vm2 = vmor %vm1630_vm0, %vm1631_vm14  ;;  %v1654_v8 = vand.u32 2147483647, %v1644_v60  ;;  %v1657_v17 = vor.u32 1.1754944e-38, %v1656_v20  ;;  %v5522_v20 = vld [vmem:[#allocation15 + $0xd0] sm:$0xff] }
 0x4b3   :  { %v1627_v21 = vsub.f32 1.0, %v1626_v25  ;;  %v5470_v25 = vld [vmem:[#allocation15 + $0x140] sm:$0xff]  ;;  %6916 = vst [vmem:[#allocation73_spill] sm:$0xff] %v5522_v20 }
 0x4b4   :  { %v1609_v24 = vmul.f32 %v3591_v12, %v1608_v14  ;;  %vm1655_vm8 = vcmp.eq.f32.partialorder %v1654_v8, 8.507059e+37  ;;  %v5472_v14 = vld [vmem:[#allocation15 + $0x148] sm:$0xff]  ;;  %v5524_v8 = vld [vmem:[#allocation15 + $0xd8] sm:$0xff] }
 0x4b5   :  { %v1628_v35 = vmul.f32 %v3593_v11, %v1627_v21  ;;  %v5474_v21 = vld [vmem:[#allocation15 + $0x150] sm:$0xff]  ;;  %6917 = vst [vmem:[#allocation53_spill] sm:$0xff] %v5524_v8 }
 0x4b6   :  { %v3595_v46 = vpop.eup %3594  ;;  %v1610_v58 = vadd.f32 %v3591_v12, %v1609_v24  ;;  %v5478_v24 = vld [vmem:[#allocation15 + $0x158] sm:$0xff] }
 0x4b7   :  { %v1629_v1 = vadd.f32 %v3593_v11, %v1628_v35  ;;  %v1646_v48 = vmul.f32 %v3595_v46, %v1644_v60  ;;  %v3597_v42 = vpop.eup %3596  ;;  %vm1651_vm5 = vweird.f32 %v3595_v46  ;;  %v6910_v60 = vld [vmem:[#allocation58_spill] sm:$0xff]  ;;  %v5484_v35 = vld [vmem:[#allocation15 + $0x128] sm:$0xff] }
 0x4b8   :  { %v1614_v49 = vsel %vm1613_vm1, %v3591_v12, %v1610_v58  ;;  %vm1652_vm7 = vmor %vm1650_vm6, %vm1651_vm5  ;;  %v284_v12 = vadd.f32 %v6910_v60, %v6902_v63  ;;  %v5540_v60 = vld [vmem:[#allocation15 + $0x80] sm:$0xff]  ;;  %v5586_v63 = vld [vmem:[#allocation15 + $0x28] sm:$0xff] }
 0x4b9   :  { %v1619_v16 = vsel %vm1616_vm3, %v1618_v59, %v1614_v49  ;;  %v1633_v50 = vsel %vm1632_vm2, %v3593_v11, %v1629_v1  ;;  %v1647_v0 = vsub.f32 1.0, %v1646_v48  ;;  %v5490_v59 = vld [vmem:[#allocation15 + $0x138] sm:$0xff]  ;;  %v5494_v1 = vld [vmem:[#allocation15 + $0x100] sm:$0xff]  ;;  %v5496_v48 = vld [vmem:[#allocation15 + $0x108] sm:$0xff]  ;;  %6922 = vst [vmem:[#allocation43_spill] sm:$0xff] %v5540_v60 }
 0x4ba   :  { %v1638_v62 = vsel %vm1635_vm4, %v1637_v54, %v1633_v50  ;;  %v1661_v45 = vmul.f32 %v3597_v42, %v1619_v16  ;;  %v5498_v54 = vld [vmem:[#allocation15 + $0x110] sm:$0xff]  ;;  %v5502_v49 = vld [vmem:[#allocation15 + $0x118] sm:$0xff]  ;;  %v5504_v42 = vld [vmem:[#allocation15 + $0xe0] sm:$0xff]  ;;  %6935 = vst [vmem:[#allocation41_spill] sm:$0xff] %v5586_v63 }
 0x4bb   :  { %v1660_v2 = vmul.f32 %v1638_v62, %v5315_v5  ;;  %v1648_v52 = vmul.f32 %v3595_v46, %v1647_v0  ;;  %v5406_v5 = vld [vmem:[#allocation15 + $0x1e0] sm:$0xff]  ;;  %v5506_v16 = vld [vmem:[#allocation15 + $0xe8] sm:$0xff]  ;;  %v5512_v62 = vld [vmem:[#allocation15 + $0xf0] sm:$0xff] }
 0x4bc   :  { %v6911_v50 = vld [vmem:[#allocation84_spill] sm:$0xff]  ;;  %6912 = vst [vmem:[#allocation69_spill] sm:$0xff] %v5512_v62 }
 0x4bd   :  { %v5397_v37 = vadd.f32 %v1661_v45, %v1660_v2  ;;  %v1649_v6 = vadd.f32 %v3595_v46, %v1648_v52  ;;  %v366_v0 = vadd.f32 %v6911_v50, %v6904_v28  ;;  %v5514_v45 = vld [vmem:[#allocation15 + $0xf8] sm:$0xff]  ;;  %v5516_v2 = vld [vmem:[#allocation15 + $0xc0] sm:$0xff] }
 0x4be   :  { %6913 = vst [vmem:[#allocation47_spill] sm:$0xff] %v5514_v45  ;;  %v5561_v50 = vld [vmem:[#allocation15 + $0x60] sm:$0xff] }
 0x4bf   :  { %3598 = vtanh.f32 %v5397_v37  ;;  %v1653_v19 = vsel %vm1652_vm7, %v3595_v46, %v1649_v6  ;;  %6914 = vst [vmem:[#allocation49_spill] sm:$0xff] %v5516_v2  ;;  %v5520_v6 = vld [vmem:[#allocation15 + $0xc8] sm:$0xff] }
 0x4c0   :  { %v1658_v55 = vsel %vm1655_vm8, %v1657_v17, %v1653_v19  ;;  %6915 = vst [vmem:[#allocation74_spill] sm:$0xff] %v5520_v6  ;;  %v5528_v17 = vld [vmem:[#allocation15 + $0xa0] sm:$0xff] }
 0x4c1   :  { %6918 = vst [vmem:[#allocation54_spill] sm:$0xff] %v5528_v17 }
 0x4c2   :  { %6926 = vst [vmem:[#allocation38_spill] sm:$0xff] %v5561_v50 }
 0x4c5   :  { %v3599_v10 = vpop.eup %3598 }
 0x4c6   :  { %v5400_v18 = vmul.f32 %v3599_v10, %v1658_v55  ;;  %v5530_v10 = vld [vmem:[#allocation15 + $0xa8] sm:$0xff]  ;;  %v5534_v55 = vld [vmem:[#allocation15 + $0xb0] sm:$0xff] }
 0x4c7   :  { %6919 = vst [vmem:[#allocation78_spill] sm:$0xff] %v5530_v10 }
 0x4c8   :  { %6908 = vst [vmem:[#allocation70_spill] sm:$0xff] %v5400_v18  ;;  %1688 = vmatmul.f32.vlgmr.msra.gmra.mxu0 %v5400_v18  ;;  %1708 = vmatmul.f32.vlgmr.msra.gmra.mxu1 %v5400_v18 }
 0x4c9   :  { %1728 = vmatmul.f32.vlgmr.msrb.gmra.mxu2 %v5400_v18  ;;  %1748 = vmatmul.f32.vlgmr.msrb.gmra.mxu3 %v5400_v18  ;;  %6920 = vst [vmem:[#allocation77_spill] sm:$0xff] %v5534_v55  ;;  %v5580_v18 = vld [vmem:[#allocation15 + $0x58] sm:$0xff] }
 0x4ca   :  { %1980 = vmatpush.msra.mxu0 %v5406_v5  ;;  %2000 = vmatpush.msra.mxu1 %v5408_v27  ;;  %6933 = vst [vmem:[#allocation39_spill] sm:$0xff] %v5580_v18 }
 0x4cb   :  { %2020 = vmatpush.msrb.mxu2 %v5410_v32  ;;  %2040 = vmatpush.msrb.mxu3 %v5414_v33 }
 0x4cc   :  { %1981 = vmatpush.msra.mxu0 %v5418_v57  ;;  %2001 = vmatpush.msra.mxu1 %v5420_v56 }
 0x4cd   :  { %2021 = vmatpush.msrb.mxu2 %v5422_v41  ;;  %2041 = vmatpush.msrb.mxu3 %v5426_v43 }
 0x4ce   :  { %1982 = vmatpush.msra.mxu0 %v5430_v7  ;;  %2002 = vmatpush.msra.mxu1 %v5432_v4 }
 0x4cf   :  { %2022 = vmatpush.msrb.mxu2 %v5434_v36  ;;  %2042 = vmatpush.msrb.mxu3 %v5438_v47 }
 0x4d0   :  { %1983 = vmatpush.msra.mxu0 %v5442_v53  ;;  %2003 = vmatpush.msra.mxu1 %v5444_v31 }
 0x4d1   :  { %2023 = vmatpush.msrb.mxu2 %v5446_v40  ;;  %2043 = vmatpush.msrb.mxu3 %v5450_v30 }
 0x4d2   :  { %1984 = vmatpush.msra.mxu0 %v5454_v15  ;;  %2004 = vmatpush.msra.mxu1 %v5456_v29 }
 0x4d3   :  { %2024 = vmatpush.msrb.mxu2 %v5458_v9  ;;  %2044 = vmatpush.msrb.mxu3 %v5466_v23 }
 0x4d4   :  { %1985 = vmatpush.msra.mxu0 %v5470_v25  ;;  %2005 = vmatpush.msra.mxu1 %v5472_v14 }
 0x4d5   :  { %2025 = vmatpush.msrb.mxu2 %v5474_v21  ;;  %2045 = vmatpush.msrb.mxu3 %v5478_v24 }
 0x4d6   :  { %1986 = vmatpush.msra.mxu0 %v5482_v34  ;;  %2006 = vmatpush.msra.mxu1 %v5484_v35 }
 0x4d7   :  { %2026 = vmatpush.msrb.mxu2 %v5486_v44  ;;  %2046 = vmatpush.msrb.mxu3 %v5490_v59 }
 0x4d8   :  { %1987 = vmatpush.msra.mxu0 %v5494_v1  ;;  %2007 = vmatpush.msra.mxu1 %v5496_v48 }
 0x4d9   :  { %2027 = vmatpush.msrb.mxu2 %v5498_v54  ;;  %2047 = vmatpush.msrb.mxu3 %v5502_v49 }
 0x4da   :  { %1988 = vmatpush.msra.mxu0 %v5504_v42  ;;  %2008 = vmatpush.msra.mxu1 %v5506_v16 }
 0x4db   :  { %2028 = vmatpush.msrb.mxu2 %v5512_v62  ;;  %2048 = vmatpush.msrb.mxu3 %v5514_v45 }
 0x4dc   :  { %1989 = vmatpush.msra.mxu0 %v5516_v2  ;;  %2009 = vmatpush.msra.mxu1 %v5520_v6 }
 0x4dd   :  { %2029 = vmatpush.msrb.mxu2 %v5522_v20  ;;  %2049 = vmatpush.msrb.mxu3 %v5524_v8 }
 0x4de   :  { %1990 = vmatpush.msra.mxu0 %v5528_v17  ;;  %2010 = vmatpush.msra.mxu1 %v5530_v10 }
 0x4df   :  { %2030 = vmatpush.msrb.mxu2 %v5534_v55  ;;  %2050 = vmatpush.msrb.mxu3 %v5536_v61 }
 0x4e0   :  { %1991 = vmatpush.msra.mxu0 %v5540_v60 }
 0x4e2   :  { %1992 = vmatpush.msra.mxu0 %v5561_v50 }
 0x545   :  { %v1689_v11 = vpop.f32.mrf.mxu0  ;;  %v1709_v22 = vpop.f32.mrf.mxu1 }
 0x546   :  { %v1752_v38 = vadd.f32 %v1689_v11, %v243_v26  ;;  %v1753_v39 = vadd.f32 %v1709_v22, %v284_v12  ;;  %v5542_v12 = vld [vmem:[#allocation15 + $0x88] sm:$0xff]  ;;  %v5546_v22 = vld [vmem:[#allocation15 + $0x90] sm:$0xff] }
 0x547   :  { %6923 = vst [vmem:[#allocation28_spill] sm:$0xff] %v5542_v12  ;;  %2011 = vmatpush.msra.mxu1 %v5542_v12  ;;  %2031 = vmatpush.msrb.mxu2 %v5546_v22  ;;  %v5604_v12 = vld [vmem:[#allocation15 + $0x18] sm:$0xff] }
 0x548   :  { %v3456_v46 = vmul.f32 -1.442695, %v1752_v38  ;;  %v3457_v58 = vmul.f32 -1.442695, %v1753_v39  ;;  %6924 = vst [vmem:[#allocation29_spill] sm:$0xff] %v5546_v22  ;;  %v5548_v38 = vld [vmem:[#allocation15 + $0x98] sm:$0xff] }
 0x549   :  { %6925 = vst [vmem:[#allocation37_spill] sm:$0xff] %v5548_v38  ;;  %2051 = vmatpush.msrb.mxu3 %v5548_v38  ;;  %v5596_v38 = vld [vmem:[#allocation15] sm:$0xff]  ;;  %v5598_v22 = vld [vmem:[#allocation15 + $0x8] sm:$0xff] }
 0x54a   :  { %3600 = vpow2.f32 %v3456_v46  ;;  %6939 = vst [vmem:[#allocation50_spill] sm:$0xff] %v5596_v38 }
 0x54b   :  { %3602 = vpow2.f32 %v3457_v58  ;;  %6940 = vst [vmem:[#allocation34_spill] sm:$0xff] %v5598_v22 }
 0x54c   :  { %v1749_v52 = vpop.f32.mrf.mxu3  ;;  %v1729_v28 = vpop.f32.mrf.mxu2  ;;  %6942 = vst [vmem:[#allocation59_spill] sm:$0xff] %v5604_v12 }
 0x54d   :  { %v1755_v19 = vadd.f32 %v1749_v52, %v366_v0  ;;  %v5563_v0 = vld [vmem:[#allocation15 + $0x68] sm:$0xff]  ;;  %v5565_v52 = vld [vmem:[#allocation15 + $0x70] sm:$0xff] }
 0x54e   :  { %6927 = vst [vmem:[#allocation30_spill] sm:$0xff] %v5563_v0  ;;  %2012 = vmatpush.msra.mxu1 %v5563_v0  ;;  %2032 = vmatpush.msrb.mxu2 %v5565_v52  ;;  %v5590_v0 = vld [vmem:[#allocation15 + $0x38] sm:$0xff] }
 0x54f   :  { %v3458_v26 = vmul.f32 -1.442695, %v1755_v19  ;;  %6928 = vst [vmem:[#allocation31_spill] sm:$0xff] %v5565_v52  ;;  %v5570_v19 = vld [vmem:[#allocation15 + $0x78] sm:$0xff] }
 0x550   :  { %v3601_v11 = vpop.eup %3600  ;;  %6929 = vst [vmem:[#allocation51_spill] sm:$0xff] %v5570_v19  ;;  %2052 = vmatpush.msrb.mxu3 %v5570_v19  ;;  %v6938_v19 = vld [vmem:[#allocation83_spill] sm:$0xff] }
 0x551   :  { %v3603_v39 = vpop.eup %3602  ;;  %v5550_v46 = vadd.f32 1.0, %v3601_v11  ;;  %3604 = vpow2.f32 %v3458_v26  ;;  %v5572_v26 = vld [vmem:[#allocation15 + $0x40] sm:$0xff]  ;;  %v5574_v11 = vld [vmem:[#allocation15 + $0x48] sm:$0xff]  ;;  %6937 = vst [vmem:[#allocation52_spill] sm:$0xff] %v5590_v0  ;;  %v325_v50 = vadd.f32 %v6938_v19, %v6906_v51 }
 0x552   :  { %v5554_v58 = vadd.f32 1.0, %v3603_v39  ;;  %6930 = vst [vmem:[#allocation45_spill] sm:$0xff] %v5572_v26  ;;  %v5578_v39 = vld [vmem:[#allocation15 + $0x50] sm:$0xff]  ;;  %1993 = vmatpush.msra.mxu0 %v5572_v26  ;;  %2013 = vmatpush.msra.mxu1 %v5574_v11 }
 0x553   :  { %3606 = vrcp.f32 %v5550_v46  ;;  %6931 = vst [vmem:[#allocation32_spill] sm:$0xff] %v5574_v11  ;;  %2033 = vmatpush.msrb.mxu2 %v5578_v39  ;;  %2053 = vmatpush.msrb.mxu3 %v5580_v18  ;;  %v5602_v11 = vld [vmem:[#allocation15 + $0x10] sm:$0xff]  ;;  %v1754_v61 = vadd.f32 %v1729_v28, %v325_v50  ;;  %v1771_v50 = vand.u32 2147483648, %v5550_v46  ;;  %vm1765_vm11 = vweird.f32 %v5550_v46 }
 0x554   :  { %3608 = vrcp.f32 %v5554_v58  ;;  %6932 = vst [vmem:[#allocation44_spill] sm:$0xff] %v5578_v39  ;;  %1994 = vmatpush.msra.mxu0 %v5582_v13  ;;  %2014 = vmatpush.msra.mxu1 %v5586_v63  ;;  %v1769_v13 = vand.u32 2147483647, %v5550_v46  ;;  %vm1784_vm12 = vweird.f32 %v5554_v58 }
 0x555   :  { %6941 = vst [vmem:[#allocation46_spill] sm:$0xff] %v5602_v11  ;;  %2034 = vmatpush.msrb.mxu2 %v5588_v3  ;;  %2054 = vmatpush.msrb.mxu3 %v5590_v0  ;;  %v1790_v0 = vand.u32 2147483648, %v5554_v58 }
 0x556   :  { %1995 = vmatpush.msra.mxu0 %v5596_v38  ;;  %2015 = vmatpush.msra.mxu1 %v5598_v22  ;;  %v1788_v22 = vand.u32 2147483647, %v5554_v58  ;;  %vm1770_vm15 = vcmp.eq.f32.partialorder %v1769_v13, 8.507059e+37 }
 0x557   :  { %v3605_v52 = vpop.eup %3604  ;;  %2035 = vmatpush.msrb.mxu2 %v5602_v11  ;;  %2055 = vmatpush.msrb.mxu3 %v5604_v12  ;;  %v1791_v12 = vor.u32 1.1754944e-38, %v1790_v0 }
 0x558   :  { %v1798_v26 = vadd.f32 1.0, %v3605_v52  ;;  %vm1789_vm0 = vcmp.eq.f32.partialorder %v1788_v22, 8.507059e+37 }
 0x559   :  { %v3607_v60 = vpop.eup %3606 }
 0x55a   :  { %v3609_v19 = vpop.eup %3608  ;;  %v1761_v51 = vmul.f32 %v3607_v60, %v5550_v46  ;;  %3610 = vrcp.f32 %v1798_v26  ;;  %vm1766_vm9 = vweird.f32 %v3607_v60  ;;  %vm1804_vm2 = vweird.f32 %v1798_v26 }
 0x55b   :  { %v1780_v52 = vmul.f32 %v3609_v19, %v5554_v58  ;;  %3612 = vtanh.f32 %v1754_v61  ;;  %vm1785_vm10 = vweird.f32 %v3609_v19  ;;  %vm1767_vm13 = vmor %vm1765_vm11, %vm1766_vm9 }
 0x55c   :  { %v1762_v63 = vsub.f32 1.0, %v1761_v51  ;;  %v1772_v51 = vor.u32 1.1754944e-38, %v1771_v50  ;;  %vm1786_vm14 = vmor %vm1784_vm12, %vm1785_vm10  ;;  %v6954_v50 = vld [vmem:[#allocation29_spill] sm:$0xff] }
 0x55d   :  { %v1781_v28 = vsub.f32 1.0, %v1780_v52 }
 0x55e   :  { %v1763_v3 = vmul.f32 %v3607_v60, %v1762_v63 }
 0x55f   :  { %v1782_v38 = vmul.f32 %v3609_v19, %v1781_v28 }
 0x560   :  { %v3611_v18 = vpop.eup %3610  ;;  %v1764_v39 = vadd.f32 %v3607_v60, %v1763_v3 }
 0x561   :  { %v1783_v52 = vadd.f32 %v3609_v19, %v1782_v38  ;;  %v1800_v61 = vmul.f32 %v3611_v18, %v1798_v26  ;;  %v3613_v11 = vpop.eup %3612  ;;  %vm1805_vm1 = vweird.f32 %v3611_v18  ;;  %v1810_v38 = vand.u32 2147483648, %v1798_v26 }
 0x562   :  { %v1768_v63 = vsel %vm1767_vm13, %v3607_v60, %v1764_v39  ;;  %v1808_v60 = vand.u32 2147483647, %v1798_v26  ;;  %vm1806_vm3 = vmor %vm1804_vm2, %vm1805_vm1  ;;  %v6951_v26 = vld [vmem:[#allocation48_spill] sm:$0xff] }
 0x563   :  { %v1773_v55 = vsel %vm1770_vm15, %v1772_v51, %v1768_v63  ;;  %v1787_v28 = vsel %vm1786_vm14, %v3609_v19, %v1783_v52  ;;  %v1801_v10 = vsub.f32 1.0, %v1800_v61  ;;  %v1811_v0 = vor.u32 1.1754944e-38, %v1810_v38  ;;  %v6953_v19 = vld [vmem:[#allocation28_spill] sm:$0xff]  ;;  %v6955_v51 = vld [vmem:[#allocation37_spill] sm:$0xff]  ;;  %v6956_v52 = vld [vmem:[#allocation38_spill] sm:$0xff] }
 0x564   :  { %v1792_v17 = vsel %vm1789_vm0, %v1791_v12, %v1787_v28  ;;  %v1815_v8 = vmul.f32 %v3613_v11, %v1773_v55  ;;  %vm1809_vm4 = vcmp.eq.f32.partialorder %v1808_v60, 8.507059e+37  ;;  %v6950_v55 = vld [vmem:[#allocation77_spill] sm:$0xff]  ;;  %v6952_v11 = vld [vmem:[#allocation43_spill] sm:$0xff]  ;;  %v6957_v61 = vld [vmem:[#allocation30_spill] sm:$0xff] }
 0x565   :  { %v1814_v3 = vmul.f32 %v1792_v17, %v5397_v37  ;;  %v1802_v46 = vmul.f32 %v3611_v18, %v1801_v10  ;;  %v6945_v37 = vmov 0.0   ;;  %v6948_v17 = vld [vmem:[#allocation54_spill] sm:$0xff]  ;;  %v6958_v63 = vld [vmem:[#allocation31_spill] sm:$0xff]  ;;  %v6964_v60 = vld [vmem:[#allocation40_spill] sm:$0xff] }
 0x566   :  { %v6949_v10 = vld [vmem:[#allocation78_spill] sm:$0xff]  ;;  %v6959_v28 = vld [vmem:[#allocation51_spill] sm:$0xff] }
 0x567   :  { %v5621_v20 = vadd.f32 %v1815_v8, %v1814_v3  ;;  %v1803_v58 = vadd.f32 %v3611_v18, %v1802_v46  ;;  %v6947_v8 = vld [vmem:[#allocation53_spill] sm:$0xff]  ;;  %v6961_v46 = vld [vmem:[#allocation32_spill] sm:$0xff]  ;;  %v6963_v38 = vld [vmem:[#allocation39_spill] sm:$0xff] }
 0x568   :  { %v6960_v3 = vld [vmem:[#allocation45_spill] sm:$0xff] }
 0x569   :  { %6943 = vst [vmem:[#allocation60_spill] sm:$0xff] %v5621_v20  ;;  %3614 = vtanh.f32 %v5621_v20  ;;  %v1807_v13 = vsel %vm1806_vm3, %v3611_v18, %v1803_v58  ;;  %v6946_v18 = vld [vmem:[#allocation73_spill] sm:$0xff]  ;;  %v6962_v58 = vld [vmem:[#allocation44_spill] sm:$0xff]  ;;  %v6971_v20 = vld [vmem:[#allocation59_spill] sm:$0xff] }
 0x56a   :  { %v1812_v39 = vsel %vm1809_vm4, %v1811_v0, %v1807_v13  ;;  %v6965_v13 = vld [vmem:[#allocation41_spill] sm:$0xff] }
 0x56b   :  { %v6966_v0 = vld [vmem:[#allocation33_spill] sm:$0xff] }
 0x56f   :  { %v3615_v22 = vpop.eup %3614 }
 0x570   :  { %v5624_v12 = vmul.f32 %v3615_v22, %v1812_v39  ;;  %v6967_v22 = vld [vmem:[#allocation52_spill] sm:$0xff]  ;;  %v6968_v39 = vld [vmem:[#allocation50_spill] sm:$0xff] }
 0x572   :  { %6944 = vst [vmem:[#allocation42_spill] sm:$0xff] %v5624_v12  ;;  %1842 = vmatmul.f32.vlgmr.msrb.gmra.mxu0 %v5624_v12  ;;  %1862 = vmatmul.f32.vlgmr.msrb.gmra.mxu1 %v5624_v12 }
 0x573   :  { %1882 = vmatmul.f32.vlgmr.msra.gmra.mxu2 %v5624_v12  ;;  %1902 = vmatmul.f32.vlgmr.msra.gmra.mxu3 %v5624_v12  ;;  %v6970_v12 = vld [vmem:[#allocation46_spill] sm:$0xff] }
 0x574   :  { %2134 = vmatpush.msrb.mxu0 %v5406_v5  ;;  %2154 = vmatpush.msrb.mxu1 %v5408_v27 }
 0x575   :  { %2174 = vmatpush.msra.mxu2 %v5410_v32  ;;  %2194 = vmatpush.msra.mxu3 %v5414_v33 }
 0x576   :  { %2135 = vmatpush.msrb.mxu0 %v5418_v57  ;;  %2155 = vmatpush.msrb.mxu1 %v5420_v56 }
 0x577   :  { %2175 = vmatpush.msra.mxu2 %v5422_v41  ;;  %2195 = vmatpush.msra.mxu3 %v5426_v43 }
 0x578   :  { %2136 = vmatpush.msrb.mxu0 %v5430_v7  ;;  %2156 = vmatpush.msrb.mxu1 %v5432_v4 }
 0x579   :  { %2176 = vmatpush.msra.mxu2 %v5434_v36  ;;  %2196 = vmatpush.msra.mxu3 %v5438_v47 }
 0x57a   :  { %1996 = vmatmul.f32.vlgmr.msra.gmra.mxu0 %v6945_v37  ;;  %2016 = vmatmul.f32.vlgmr.msra.gmra.mxu1 %v6945_v37 }
 0x57b   :  { %2036 = vmatmul.f32.vlgmr.msrb.gmra.mxu2 %v6945_v37  ;;  %2056 = vmatmul.f32.vlgmr.msrb.gmra.mxu3 %v6945_v37  ;;  %v6969_v37 = vld [vmem:[#allocation34_spill] sm:$0xff] }
 0x57c   :  { %2137 = vmatpush.msrb.mxu0 %v5442_v53  ;;  %2157 = vmatpush.msrb.mxu1 %v5444_v31 }
 0x57d   :  { %2177 = vmatpush.msra.mxu2 %v5446_v40  ;;  %2197 = vmatpush.msra.mxu3 %v5450_v30 }
 0x57e   :  { %2138 = vmatpush.msrb.mxu0 %v5454_v15  ;;  %2158 = vmatpush.msrb.mxu1 %v5456_v29 }
 0x57f   :  { %2178 = vmatpush.msra.mxu2 %v5458_v9  ;;  %2198 = vmatpush.msra.mxu3 %v5466_v23 }
 0x580   :  { %2139 = vmatpush.msrb.mxu0 %v5470_v25  ;;  %2159 = vmatpush.msrb.mxu1 %v5472_v14 }
 0x581   :  { %2179 = vmatpush.msra.mxu2 %v5474_v21  ;;  %2199 = vmatpush.msra.mxu3 %v5478_v24 }
 0x582   :  { %2140 = vmatpush.msrb.mxu0 %v5482_v34  ;;  %2160 = vmatpush.msrb.mxu1 %v5484_v35 }
 0x583   :  { %2180 = vmatpush.msra.mxu2 %v5486_v44  ;;  %2200 = vmatpush.msra.mxu3 %v5490_v59 }
 0x584   :  { %2141 = vmatpush.msrb.mxu0 %v5494_v1  ;;  %2161 = vmatpush.msrb.mxu1 %v5496_v48 }
 0x585   :  { %2181 = vmatpush.msra.mxu2 %v5498_v54  ;;  %2201 = vmatpush.msra.mxu3 %v5502_v49 }
 0x586   :  { %2142 = vmatpush.msrb.mxu0 %v5504_v42  ;;  %2162 = vmatpush.msrb.mxu1 %v5506_v16 }
 0x587   :  { %2182 = vmatpush.msra.mxu2 %v5512_v62  ;;  %2202 = vmatpush.msra.mxu3 %v5514_v45 }
 0x588   :  { %2143 = vmatpush.msrb.mxu0 %v5516_v2  ;;  %2163 = vmatpush.msrb.mxu1 %v5520_v6 }
 0x589   :  { %2183 = vmatpush.msra.mxu2 %v6946_v18  ;;  %2203 = vmatpush.msra.mxu3 %v6947_v8 }
 0x58a   :  { %2144 = vmatpush.msrb.mxu0 %v6948_v17  ;;  %2164 = vmatpush.msrb.mxu1 %v6949_v10 }
 0x58b   :  { %2184 = vmatpush.msra.mxu2 %v6950_v55  ;;  %2204 = vmatpush.msra.mxu3 %v6951_v26 }
 0x58c   :  { %2145 = vmatpush.msrb.mxu0 %v6952_v11  ;;  %2165 = vmatpush.msrb.mxu1 %v6953_v19 }
 0x58d   :  { %2185 = vmatpush.msra.mxu2 %v6954_v50  ;;  %2205 = vmatpush.msra.mxu3 %v6955_v51 }
 0x58e   :  { %2146 = vmatpush.msrb.mxu0 %v6956_v52  ;;  %2166 = vmatpush.msrb.mxu1 %v6957_v61 }
 0x58f   :  { %2186 = vmatpush.msra.mxu2 %v6958_v63  ;;  %2206 = vmatpush.msra.mxu3 %v6959_v28 }
 0x590   :  { %2147 = vmatpush.msrb.mxu0 %v6960_v3  ;;  %2167 = vmatpush.msrb.mxu1 %v6961_v46 }
 0x591   :  { %2187 = vmatpush.msra.mxu2 %v6962_v58  ;;  %2207 = vmatpush.msra.mxu3 %v6963_v38 }
 0x592   :  { %2148 = vmatpush.msrb.mxu0 %v6964_v60  ;;  %2168 = vmatpush.msrb.mxu1 %v6965_v13 }
 0x593   :  { %2188 = vmatpush.msra.mxu2 %v6966_v0  ;;  %2208 = vmatpush.msra.mxu3 %v6967_v22 }
 0x594   :  { %2149 = vmatpush.msrb.mxu0 %v6968_v39  ;;  %2169 = vmatpush.msrb.mxu1 %v6969_v37 }
 0x595   :  { %2189 = vmatpush.msra.mxu2 %v6970_v12  ;;  %2209 = vmatpush.msra.mxu3 %v6971_v20 }
 0x596   :  { %2288 = vmatpush.msra.mxu0 %v5406_v5  ;;  %2308 = vmatpush.msra.mxu1 %v5408_v27 }
 0x597   :  { %2328 = vmatpush.msrb.mxu2 %v5410_v32  ;;  %2348 = vmatpush.msrb.mxu3 %v5414_v33 }
 0x598   :  { %2289 = vmatpush.msra.mxu0 %v5418_v57  ;;  %2309 = vmatpush.msra.mxu1 %v5420_v56 }
 0x599   :  { %2329 = vmatpush.msrb.mxu2 %v5422_v41  ;;  %2349 = vmatpush.msrb.mxu3 %v5426_v43 }
 0x59a   :  { %2290 = vmatpush.msra.mxu0 %v5430_v7  ;;  %2310 = vmatpush.msra.mxu1 %v5432_v4 }
 0x59b   :  { %2330 = vmatpush.msrb.mxu2 %v5434_v36  ;;  %2350 = vmatpush.msrb.mxu3 %v5438_v47 }
 0x59c   :  { %2291 = vmatpush.msra.mxu0 %v5442_v53  ;;  %2311 = vmatpush.msra.mxu1 %v5444_v31 }
 0x59d   :  { %2331 = vmatpush.msrb.mxu2 %v5446_v40  ;;  %2351 = vmatpush.msrb.mxu3 %v5450_v30 }
 0x59e   :  { %2292 = vmatpush.msra.mxu0 %v5454_v15  ;;  %2312 = vmatpush.msra.mxu1 %v5456_v29 }
 0x59f   :  { %2332 = vmatpush.msrb.mxu2 %v5458_v9  ;;  %2352 = vmatpush.msrb.mxu3 %v5466_v23 }
 0x5a0   :  { %2293 = vmatpush.msra.mxu0 %v5470_v25  ;;  %2313 = vmatpush.msra.mxu1 %v5472_v14 }
 0x5a1   :  { %2333 = vmatpush.msrb.mxu2 %v5474_v21  ;;  %2353 = vmatpush.msrb.mxu3 %v5478_v24 }
 0x5a2   :  { %2294 = vmatpush.msra.mxu0 %v5482_v34  ;;  %2314 = vmatpush.msra.mxu1 %v5484_v35 }
 0x5a3   :  { %2334 = vmatpush.msrb.mxu2 %v5486_v44  ;;  %2354 = vmatpush.msrb.mxu3 %v5490_v59 }
 0x5a4   :  { %2295 = vmatpush.msra.mxu0 %v5494_v1  ;;  %2315 = vmatpush.msra.mxu1 %v5496_v48 }
 0x5a5   :  { %2335 = vmatpush.msrb.mxu2 %v5498_v54  ;;  %2355 = vmatpush.msrb.mxu3 %v5502_v49 }
 0x5a6   :  { %2296 = vmatpush.msra.mxu0 %v5504_v42  ;;  %2316 = vmatpush.msra.mxu1 %v5506_v16 }
 0x5a7   :  { %2336 = vmatpush.msrb.mxu2 %v5512_v62  ;;  %2356 = vmatpush.msrb.mxu3 %v5514_v45 }
 0x5a8   :  { %2297 = vmatpush.msra.mxu0 %v5516_v2  ;;  %2317 = vmatpush.msra.mxu1 %v5520_v6  ;;  %v6988_v2 = vld [vmem:[#allocation60_spill] sm:$0xff] }
 0x5a9   :  { %2337 = vmatpush.msrb.mxu2 %v6946_v18  ;;  %2357 = vmatpush.msrb.mxu3 %v6947_v8 }
 0x5aa   :  { %2298 = vmatpush.msra.mxu0 %v6948_v17  ;;  %2318 = vmatpush.msra.mxu1 %v6949_v10 }
 0x5ab   :  { %2338 = vmatpush.msrb.mxu2 %v6950_v55  ;;  %2358 = vmatpush.msrb.mxu3 %v6951_v26 }
 0x5ac   :  { %2299 = vmatpush.msra.mxu0 %v6952_v11  ;;  %2319 = vmatpush.msra.mxu1 %v6953_v19 }
 0x5ad   :  { %2339 = vmatpush.msrb.mxu2 %v6954_v50  ;;  %2359 = vmatpush.msrb.mxu3 %v6955_v51  ;;  %v6980_v51 = vld [vmem:[#allocation115_spill] sm:$0xff] }
 0x5ae   :  { %2300 = vmatpush.msra.mxu0 %v6956_v52  ;;  %2320 = vmatpush.msra.mxu1 %v6957_v61 }
 0x5af   :  { %2340 = vmatpush.msrb.mxu2 %v6958_v63  ;;  %2360 = vmatpush.msrb.mxu3 %v6959_v28  ;;  %v6975_v28 = vld [vmem:[#allocation62_spill] sm:$0xff] }
 0x5b0   :  { %2301 = vmatpush.msra.mxu0 %v6960_v3  ;;  %2321 = vmatpush.msra.mxu1 %v6961_v46  ;;  %v6972_v46 = vld [vmem:[#allocation104_spill] sm:$0xff] }
 0x5b1   :  { %2341 = vmatpush.msrb.mxu2 %v6962_v58  ;;  %2361 = vmatpush.msrb.mxu3 %v6963_v38  ;;  %v6973_v58 = vld [vmem:[#allocation61_spill] sm:$0xff]  ;;  %v6974_v38 = vld [vmem:[#allocation106_spill] sm:$0xff] }
 0x5b2   :  { %2302 = vmatpush.msra.mxu0 %v6964_v60  ;;  %2322 = vmatpush.msra.mxu1 %v6965_v13  ;;  %v246_v3 = vadd.f32 %v6973_v58, %v6972_v46  ;;  %v287_v60 = vadd.f32 %v6975_v28, %v6974_v38  ;;  %v6979_v46 = vld [vmem:[#allocation87_spill] sm:$0xff]  ;;  %v6981_v28 = vld [vmem:[#allocation88_spill] sm:$0xff] }
 0x5b3   :  { %2342 = vmatpush.msrb.mxu2 %v6966_v0  ;;  %2362 = vmatpush.msrb.mxu3 %v6967_v22  ;;  %v369_v38 = vadd.f32 %v6981_v28, %v6980_v51 }
 0x5b4   :  { %2303 = vmatpush.msra.mxu0 %v6968_v39  ;;  %2323 = vmatpush.msra.mxu1 %v6969_v37  ;;  %v3824_v37 = vld [vmem:[%s6410_s5] sm:$0xf]  ;;  %s4130_s5 = smov [#allocation20]  }
 0x5b5   :  { %2343 = vmatpush.msrb.mxu2 %v6970_v12  ;;  %2363 = vmatpush.msrb.mxu3 %v6971_v20  ;;  %v5769_v39 = vperm.slane %v3824_v37, 0  ;;  %v5771_v12 = vperm.slane %v3824_v37, 1  ;;  %v6978_v20 = vld [vmem:[#allocation116_spill] sm:$0xff]  ;;  %s3355_s26 = sshll.u32 %s4130_s5, 4  ;;  %s3356_s26 = int_to_ptr.vmem [resolvable:$true] %s3355_s26 }
 0x5b6   :  { %v328_v58 = vadd.f32 %v6979_v46, %v6978_v20 }
 0x5b7   :  { %6976 = vst [vmem:[#allocation35_spill] sm:$0xff] %v5769_v39 }
 0x5b8   :  { %6977 = vst [vmem:[#allocation66_spill] sm:$0xff] %v5771_v12 }
 0x5ef   :  { %v1843_v63 = vpop.f32.mrf.mxu0  ;;  %v1863_v13 = vpop.f32.mrf.mxu1 }
 0x5f0   :  { %v1906_v61 = vadd.f32 %v1843_v63, %v246_v3  ;;  %v1907_v0 = vadd.f32 %v1863_v13, %v287_v60  ;;  %v6982_v63 = vld [vmem:[#allocation99_spill] sm:$0xff]  ;;  %v6983_v3 = vld [vmem:[#allocation101_spill] sm:$0xff] }
 0x5f1   :  { %v501_v60 = vadd.f32 %v6983_v3, %v5771_v12  ;;  %v6985_v3 = vld [vmem:[#allocation114_spill] sm:$0xff] }
 0x5f2   :  { %v3459_v52 = vmul.f32 -1.442695, %v1906_v61  ;;  %v3460_v22 = vmul.f32 -1.442695, %v1907_v0  ;;  %v460_v61 = vadd.f32 %v6982_v63, %v5769_v39  ;;  %v6984_v63 = vld [vmem:[#allocation92_spill] sm:$0xff] }
 0x5f3   :  { %v583_v12 = vadd.f32 %v6985_v3, %v6984_v63 }
 0x5f4   :  { %3616 = vpow2.f32 %v3459_v52 }
 0x5f5   :  { %3618 = vpow2.f32 %v3460_v22 }
 0x5f6   :  { %v1883_v13 = vpop.f32.mrf.mxu2  ;;  %v1903_v0 = vpop.f32.mrf.mxu3 }
 0x5f7   :  { %v1908_v50 = vadd.f32 %v1883_v13, %v328_v58  ;;  %v1909_v19 = vadd.f32 %v1903_v0, %v369_v38  ;;  %v1997_v37 = vpop.f32.mrf.mxu0  ;;  %v2017_v11 = vpop.f32.mrf.mxu1 }
 0x5f8   :  { %v2060_v52 = vadd.f32 %v1997_v37, %v460_v61  ;;  %v2061_v26 = vadd.f32 %v2017_v11, %v501_v60  ;;  %v6986_v37 = vld [vmem:[#allocation90_spill] sm:$0xff] }
 0x5f9   :  { %v3461_v55 = vmul.f32 -1.442695, %v1909_v19 }
 0x5fa   :  { %v3617_v20 = vpop.eup %3616  ;;  %v3462_v46 = vmul.f32 -1.442695, %v2060_v52  ;;  %v3463_v22 = vmul.f32 -1.442695, %v2061_v26  ;;  %v6987_v52 = vld [vmem:[#allocation113_spill] sm:$0xff] }
 0x5fb   :  { %v3619_v10 = vpop.eup %3618  ;;  %v1913_v51 = vadd.f32 1.0, %v3617_v20  ;;  %3620 = vpow2.f32 %v3461_v55  ;;  %v542_v20 = vadd.f32 %v6987_v52, %v6986_v37 }
 0x5fc   :  { %v1932_v28 = vadd.f32 1.0, %v3619_v10  ;;  %3622 = vpow2.f32 %v3462_v46 }
 0x5fd   :  { %3624 = vrcp.f32 %v1913_v51  ;;  %v1923_v63 = vand.u32 2147483647, %v1913_v51  ;;  %v1925_v3 = vand.u32 2147483648, %v1913_v51  ;;  %vm1919_vm8 = vweird.f32 %v1913_v51 }
 0x5fe   :  { %3626 = vrcp.f32 %v1932_v28  ;;  %v2057_v58 = vpop.f32.mrf.mxu3  ;;  %vm1938_vm7 = vweird.f32 %v1932_v28 }
 0x5ff   :  { %3628 = vpow2.f32 %v3463_v22  ;;  %v2063_v38 = vadd.f32 %v2057_v58, %v583_v12  ;;  %v2037_v12 = vpop.f32.mrf.mxu2  ;;  %vm1924_vm9 = vcmp.eq.f32.partialorder %v1923_v63, 8.507059e+37 }
 0x600   :  { %3630 = vtanh.f32 %v1908_v50  ;;  %v2062_v39 = vadd.f32 %v2037_v12, %v542_v20 }
 0x601   :  { %v3621_v13 = vpop.eup %3620  ;;  %v3464_v55 = vmul.f32 -1.442695, %v2063_v38  ;;  %v1942_v38 = vand.u32 2147483647, %v1932_v28 }
 0x602   :  { %v3623_v61 = vpop.eup %3622  ;;  %v5783_v11 = vadd.f32 1.0, %v3621_v13  ;;  %v1944_v13 = vand.u32 2147483648, %v1932_v28 }
 0x603   :  { %v3625_v19 = vpop.eup %3624  ;;  %v5785_v60 = vadd.f32 1.0, %v3623_v61  ;;  %vm1943_vm12 = vcmp.eq.f32.partialorder %v1942_v38, 8.507059e+37 }
 0x604   :  { %v3627_v26 = vpop.eup %3626  ;;  %v1915_v10 = vmul.f32 %v3625_v19, %v1913_v51  ;;  %3632 = vrcp.f32 %v5783_v11  ;;  %vm1920_vm5 = vweird.f32 %v3625_v19  ;;  %v1945_v8 = vor.u32 1.1754944e-38, %v1944_v13 }
 0x605   :  { %v3629_v0 = vpop.eup %3628  ;;  %v1934_v46 = vmul.f32 %v3627_v26, %v1932_v28  ;;  %3634 = vrcp.f32 %v5785_v60  ;;  %vm1939_vm6 = vweird.f32 %v3627_v26  ;;  %vm1921_vm10 = vmor %vm1919_vm8, %vm1920_vm5  ;;  %v2079_v51 = vand.u32 2147483648, %v5785_v60 }
 0x606   :  { %v1916_v22 = vsub.f32 1.0, %v1915_v10  ;;  %v5791_v58 = vadd.f32 1.0, %v3629_v0  ;;  %3636 = vpow2.f32 %v3464_v55  ;;  %v3631_v17 = vpop.eup %3630  ;;  %vm1940_vm11 = vmor %vm1938_vm7, %vm1939_vm6  ;;  %vm2073_vm13 = vweird.f32 %v5785_v60 }
 0x607   :  { %v1935_v50 = vsub.f32 1.0, %v1934_v46  ;;  %v1926_v46 = vor.u32 1.1754944e-38, %v1925_v3  ;;  %vm1958_vm3 = vweird.f32 %v5783_v11 }
 0x608   :  { %v1917_v61 = vmul.f32 %v3625_v19, %v1916_v22  ;;  %3638 = vrcp.f32 %v5791_v58  ;;  %vm2092_vm4 = vweird.f32 %v5791_v58 }
 0x609   :  { %v1936_v37 = vmul.f32 %v3627_v26, %v1935_v50  ;;  %3640 = vtanh.f32 %v2062_v39 }
 0x60a   :  { %v5794_v52 = vpop.eup %3632  ;;  %v1918_v10 = vadd.f32 %v3625_v19, %v1917_v61 }
 0x60b   :  { %v3635_v0 = vpop.eup %3634  ;;  %v1937_v18 = vadd.f32 %v3627_v26, %v1936_v37  ;;  %v1954_v55 = vmul.f32 %v5794_v52, %v5783_v11  ;;  %vm1959_vm15 = vweird.f32 %v5794_v52 }
 0x60c   :  { %v1922_v22 = vsel %vm1921_vm10, %v3625_v19, %v1918_v10  ;;  %v2069_v20 = vmul.f32 %v3635_v0, %v5785_v60  ;;  %v3637_v12 = vpop.eup %3636  ;;  %vm2074_vm14 = vweird.f32 %v3635_v0  ;;  %vm5815_vm5 = vmor %vm1958_vm3, %vm1959_vm15 }
 0x60d   :  { %v1927_v50 = vsel %vm1924_vm9, %v1926_v46, %v1922_v22  ;;  %v1941_v28 = vsel %vm1940_vm11, %v3627_v26, %v1937_v18  ;;  %v1955_v63 = vsub.f32 1.0, %v1954_v55  ;;  %v2106_v37 = vadd.f32 1.0, %v3637_v12  ;;  %vm2075_vm0 = vmor %vm2073_vm13, %vm2074_vm14 }
 0x60e   :  { %v3639_v61 = vpop.eup %3638  ;;  %v1946_v13 = vsel %vm1943_vm12, %v1945_v8, %v1941_v28  ;;  %v1969_v6 = vmul.f32 %v3631_v17, %v1927_v50  ;;  %v2070_v3 = vsub.f32 1.0, %v2069_v20  ;;  %v2077_v18 = vand.u32 2147483647, %v5785_v60 }
 0x60f   :  { %v1968_v45 = vmul.f32 %v1946_v13, %v6988_v2  ;;  %v2088_v62 = vmul.f32 %v3639_v61, %v5791_v58  ;;  %v1956_v19 = vmul.f32 %v5794_v52, %v1955_v63  ;;  %3642 = vrcp.f32 %v2106_v37  ;;  %v3641_v10 = vpop.eup %3640 }
 0x610   :  { %v2071_v39 = vmul.f32 %v3635_v0, %v2070_v3  ;;  %v2098_v8 = vand.u32 2147483648, %v5791_v58  ;;  %v1964_v17 = vand.u32 2147483648, %v5783_v11  ;;  %v2080_v2 = vor.u32 1.1754944e-38, %v2079_v51 }
 0x611   :  { %v1970_v26 = vadd.f32 %v1969_v6, %v1968_v45  ;;  %v2089_v38 = vsub.f32 1.0, %v2088_v62  ;;  %v1957_v55 = vadd.f32 %v5794_v52, %v1956_v19  ;;  %vm2093_vm1 = vweird.f32 %v3639_v61 }
 0x612   :  { %v2072_v46 = vadd.f32 %v3635_v0, %v2071_v39  ;;  %v2096_v45 = vand.u32 2147483647, %v5791_v58  ;;  %vm2078_vm2 = vcmp.eq.f32.partialorder %v2077_v18, 8.507059e+37  ;;  %v1962_v6 = vand.u32 2147483647, %v5783_v11  ;;  %vm2094_vm6 = vmor %vm2092_vm4, %vm2093_vm1 }
 0x613   :  { %3644 = vtanh.f32 %v1970_v26  ;;  %v2090_v22 = vmul.f32 %v3639_v61, %v2089_v38  ;;  %v2099_v60 = vor.u32 1.1754944e-38, %v2098_v8  ;;  %v1965_v51 = vor.u32 1.1754944e-38, %v1964_v17 }
 0x614   :  { %v2076_v62 = vsel %vm2075_vm0, %v3635_v0, %v2072_v46  ;;  %v1961_v0 = vsel %vm5815_vm5, %v5794_v52, %v1957_v55  ;;  %vm2097_vm7 = vcmp.eq.f32.partialorder %v2096_v45, 8.507059e+37  ;;  %vm1963_vm8 = vcmp.eq.f32.partialorder %v1962_v6, 8.507059e+37 }
 0x615   :  { %v2081_v20 = vsel %vm2078_vm2, %v2080_v2, %v2076_v62  ;;  %v2091_v12 = vadd.f32 %v3639_v61, %v2090_v22  ;;  %v3643_v28 = vpop.eup %3642  ;;  %v1966_v18 = vsel %vm1963_vm8, %v1965_v51, %v1961_v0  ;;  %v2118_v52 = vand.u32 2147483648, %v2106_v37  ;;  %v7027_v0 = vld [vmem:[#allocation112_spill] sm:$0xff] }
 0x616   :  { %v2123_v13 = vmul.f32 %v3641_v10, %v2081_v20  ;;  %v2108_v11 = vmul.f32 %v3643_v28, %v2106_v37  ;;  %vm2113_vm9 = vweird.f32 %v3643_v28  ;;  %vm2112_vm10 = vweird.f32 %v2106_v37 }
 0x617   :  { %v2095_v63 = vsel %vm2094_vm6, %v3639_v61, %v2091_v12  ;;  %v2116_v61 = vand.u32 2147483647, %v2106_v37  ;;  %vm2114_vm11 = vmor %vm2112_vm10, %vm2113_vm9  ;;  %v2119_v46 = vor.u32 1.1754944e-38, %v2118_v52  ;;  %v7026_v37 = vld [vmem:[#allocation96_spill] sm:$0xff]  ;;  %v7028_v52 = vld [vmem:[#allocation111_spill] sm:$0xff] }
 0x618   :  { %v2100_v3 = vsel %vm2097_vm7, %v2099_v60, %v2095_v63  ;;  %v2109_v39 = vsub.f32 1.0, %v2108_v11 }
 0x619   :  { %v3645_v58 = vpop.eup %3644  ;;  %v2122_v19 = vmul.f32 0.0, %v2100_v3  ;;  %vm2117_vm12 = vcmp.eq.f32.partialorder %v2116_v61, 8.507059e+37 }
 0x61a   :  { %v5822_v26 = vmul.f32 %v3645_v58, %v1966_v18  ;;  %v2110_v8 = vmul.f32 %v3643_v28, %v2109_v39 }
 0x61b   :  { %v5824_v38 = vadd.f32 %v2123_v13, %v2122_v19 }
 0x61c   :  { %6991 = vst [vmem:[#allocation65_spill] sm:$0xff] %v5822_v26  ;;  %v2111_v17 = vadd.f32 %v3643_v28, %v2110_v8  ;;  %v6093_v26 = vld [vmem:[#allocation15] sm:$0xff] }
 0x61d   :  { %3646 = vtanh.f32 %v5824_v38 }
 0x61e   :  { %v2115_v10 = vsel %vm2114_vm11, %v3643_v28, %v2111_v17 }
 0x61f   :  { %v2120_v55 = vsel %vm2117_vm12, %v2119_v46, %v2115_v10 }
 0x623   :  { %v3647_v2 = vpop.eup %3646 }
 0x624   :  { %v5827_v22 = vmul.f32 %v3647_v2, %v2120_v55 }
 0x626   :  { %6992 = vst [vmem:[#allocation55_spill] sm:$0xff] %v5827_v22  ;;  %2150 = vmatmul.f32.vlgmr.msrb.gmra.mxu0 %v5827_v22  ;;  %2170 = vmatmul.f32.vlgmr.msrb.gmra.mxu1 %v5827_v22 }
 0x627   :  { %2190 = vmatmul.f32.vlgmr.msra.gmra.mxu2 %v5827_v22  ;;  %2210 = vmatmul.f32.vlgmr.msra.gmra.mxu3 %v5827_v22  ;;  %v6087_v22 = vld [vmem:[#allocation15 + $0x30] sm:$0xff] }
 0x628   :  { %2442 = vmatpush.msrb.mxu0 %v5406_v5  ;;  %2462 = vmatpush.msrb.mxu1 %v5408_v27  ;;  %v6993_v5 = vld [vmem:[#allocation69_spill] sm:$0xff]  ;;  %v6994_v27 = vld [vmem:[#allocation47_spill] sm:$0xff]  ;;  %7050 = vst [vmem:[#allocation60_spill] sm:$0xff] %v6087_v22 }
 0x629   :  { %2482 = vmatpush.msra.mxu2 %v5410_v32  ;;  %2502 = vmatpush.msra.mxu3 %v5414_v33  ;;  %v6995_v32 = vld [vmem:[#allocation49_spill] sm:$0xff]  ;;  %v6996_v33 = vld [vmem:[#allocation74_spill] sm:$0xff]  ;;  %7052 = vst [vmem:[#allocation47_spill] sm:$0xff] %v6093_v26 }
 0x62a   :  { %2443 = vmatpush.msrb.mxu0 %v5418_v57  ;;  %2463 = vmatpush.msrb.mxu1 %v5420_v56  ;;  %v6997_v57 = vld [vmem:[#allocation73_spill] sm:$0xff] }
 0x62b   :  { %2483 = vmatpush.msra.mxu2 %v5422_v41  ;;  %2503 = vmatpush.msra.mxu3 %v5426_v43  ;;  %v6998_v56 = vld [vmem:[#allocation53_spill] sm:$0xff]  ;;  %v6999_v41 = vld [vmem:[#allocation54_spill] sm:$0xff] }
 0x62c   :  { %2444 = vmatpush.msrb.mxu0 %v5430_v7  ;;  %2464 = vmatpush.msrb.mxu1 %v5432_v4  ;;  %v7000_v43 = vld [vmem:[#allocation78_spill] sm:$0xff]  ;;  %v7001_v7 = vld [vmem:[#allocation77_spill] sm:$0xff]  ;;  %v7002_v4 = vld [vmem:[#allocation48_spill] sm:$0xff] }
 0x62d   :  { %2484 = vmatpush.msra.mxu2 %v5434_v36  ;;  %2504 = vmatpush.msra.mxu3 %v5438_v47  ;;  %v7003_v36 = vld [vmem:[#allocation43_spill] sm:$0xff]  ;;  %v7004_v47 = vld [vmem:[#allocation28_spill] sm:$0xff] }
 0x62e   :  { %2445 = vmatpush.msrb.mxu0 %v5442_v53  ;;  %2465 = vmatpush.msrb.mxu1 %v5444_v31  ;;  %v7005_v53 = vld [vmem:[#allocation29_spill] sm:$0xff] }
 0x62f   :  { %2485 = vmatpush.msra.mxu2 %v5446_v40  ;;  %2505 = vmatpush.msra.mxu3 %v5450_v30  ;;  %v7006_v31 = vld [vmem:[#allocation37_spill] sm:$0xff]  ;;  %v7007_v40 = vld [vmem:[#allocation38_spill] sm:$0xff] }
 0x630   :  { %2446 = vmatpush.msrb.mxu0 %v5454_v15  ;;  %2466 = vmatpush.msrb.mxu1 %v5456_v29  ;;  %v7008_v30 = vld [vmem:[#allocation30_spill] sm:$0xff]  ;;  %v7009_v15 = vld [vmem:[#allocation31_spill] sm:$0xff] }
 0x631   :  { %2486 = vmatpush.msra.mxu2 %v5458_v9  ;;  %2506 = vmatpush.msra.mxu3 %v5466_v23  ;;  %v7010_v29 = vld [vmem:[#allocation51_spill] sm:$0xff]  ;;  %v7011_v9 = vld [vmem:[#allocation45_spill] sm:$0xff]  ;;  %v7012_v23 = vld [vmem:[#allocation32_spill] sm:$0xff] }
 0x632   :  { %2447 = vmatpush.msrb.mxu0 %v5470_v25  ;;  %2467 = vmatpush.msrb.mxu1 %v5472_v14  ;;  %v7013_v25 = vld [vmem:[#allocation44_spill] sm:$0xff]  ;;  %v7014_v14 = vld [vmem:[#allocation39_spill] sm:$0xff] }
 0x633   :  { %2487 = vmatpush.msra.mxu2 %v5474_v21  ;;  %2507 = vmatpush.msra.mxu3 %v5478_v24  ;;  %v7015_v21 = vld [vmem:[#allocation40_spill] sm:$0xff]  ;;  %v7016_v24 = vld [vmem:[#allocation41_spill] sm:$0xff] }
 0x634   :  { %2448 = vmatpush.msrb.mxu0 %v5482_v34  ;;  %2468 = vmatpush.msrb.mxu1 %v5484_v35  ;;  %v7017_v34 = vld [vmem:[#allocation33_spill] sm:$0xff]  ;;  %v7018_v35 = vld [vmem:[#allocation52_spill] sm:$0xff] }
 0x635   :  { %2488 = vmatpush.msra.mxu2 %v5486_v44  ;;  %2508 = vmatpush.msra.mxu3 %v5490_v59  ;;  %v7019_v44 = vld [vmem:[#allocation50_spill] sm:$0xff] }
 0x636   :  { %2449 = vmatpush.msrb.mxu0 %v5494_v1  ;;  %2469 = vmatpush.msrb.mxu1 %v5496_v48  ;;  %v7020_v59 = vld [vmem:[#allocation34_spill] sm:$0xff]  ;;  %v7022_v48 = vld [vmem:[#allocation59_spill] sm:$0xff] }
 0x637   :  { %2489 = vmatpush.msra.mxu2 %v5498_v54  ;;  %2509 = vmatpush.msra.mxu3 %v5502_v49  ;;  %v7021_v1 = vld [vmem:[#allocation46_spill] sm:$0xff]  ;;  %v7023_v54 = vld [vmem:[#allocation35_spill] sm:$0xff] }
 0x638   :  { %2450 = vmatpush.msrb.mxu0 %v5504_v42  ;;  %2470 = vmatpush.msrb.mxu1 %v5506_v16  ;;  %v7024_v49 = vld [vmem:[#allocation95_spill] sm:$0xff]  ;;  %v7025_v16 = vld [vmem:[#allocation66_spill] sm:$0xff] }
 0x639   :  { %2490 = vmatpush.msra.mxu2 %v6993_v5  ;;  %2510 = vmatpush.msra.mxu3 %v6994_v27  ;;  %v457_v42 = vadd.f32 %v7024_v49, %v7023_v54  ;;  %v498_v45 = vadd.f32 %v7026_v37, %v7025_v16  ;;  %v5916_v49 = vld [vmem:[#allocation15 + $0x1e8] sm:$0xff]  ;;  %v5922_v37 = vld [vmem:[#allocation15 + $0x1f8] sm:$0xff] }
 0x63a   :  { %2451 = vmatpush.msrb.mxu0 %v6995_v32  ;;  %2471 = vmatpush.msrb.mxu1 %v6996_v33 }
 0x63b   :  { %2491 = vmatpush.msra.mxu2 %v6997_v57  ;;  %2511 = vmatpush.msra.mxu3 %v6998_v56 }
 0x63c   :  { %2452 = vmatpush.msrb.mxu0 %v6999_v41  ;;  %2472 = vmatpush.msrb.mxu1 %v7000_v43 }
 0x63d   :  { %2492 = vmatpush.msra.mxu2 %v7001_v7  ;;  %2512 = vmatpush.msra.mxu3 %v7002_v4 }
 0x63e   :  { %2453 = vmatpush.msrb.mxu0 %v7003_v36  ;;  %2473 = vmatpush.msrb.mxu1 %v7004_v47 }
 0x63f   :  { %2493 = vmatpush.msra.mxu2 %v7005_v53  ;;  %2513 = vmatpush.msra.mxu3 %v7006_v31 }
 0x640   :  { %2454 = vmatpush.msrb.mxu0 %v7007_v40  ;;  %2474 = vmatpush.msrb.mxu1 %v7008_v30 }
 0x641   :  { %2494 = vmatpush.msra.mxu2 %v7009_v15  ;;  %2514 = vmatpush.msra.mxu3 %v7010_v29 }
 0x642   :  { %2455 = vmatpush.msrb.mxu0 %v7011_v9  ;;  %2475 = vmatpush.msrb.mxu1 %v7012_v23 }
 0x643   :  { %2495 = vmatpush.msra.mxu2 %v7013_v25  ;;  %2515 = vmatpush.msra.mxu3 %v7014_v14 }
 0x644   :  { %2456 = vmatpush.msrb.mxu0 %v7015_v21  ;;  %2476 = vmatpush.msrb.mxu1 %v7016_v24 }
 0x645   :  { %2496 = vmatpush.msra.mxu2 %v7017_v34  ;;  %2516 = vmatpush.msra.mxu3 %v7018_v35 }
 0x646   :  { %2457 = vmatpush.msrb.mxu0 %v7019_v44  ;;  %2477 = vmatpush.msrb.mxu1 %v7020_v59 }
 0x647   :  { %2497 = vmatpush.msra.mxu2 %v7021_v1  ;;  %2517 = vmatpush.msra.mxu3 %v7022_v48 }
 0x6a3   :  { %v2151_v62 = vpop.f32.mrf.mxu0  ;;  %v2171_v6 = vpop.f32.mrf.mxu1 }
 0x6a4   :  { %v2214_v20 = vadd.f32 %v2151_v62, %v457_v42  ;;  %v2215_v12 = vadd.f32 %v2171_v6, %v498_v45  ;;  %v5919_v42 = vld [vmem:[#allocation15 + $0x1f0] sm:$0xff]  ;;  %v5925_v45 = vld [vmem:[#allocation15 + $0x1c0] sm:$0xff]  ;;  %v5928_v62 = vld [vmem:[#allocation15 + $0x1c8] sm:$0xff] }
 0x6a5   :  { %v5931_v6 = vld [vmem:[#allocation15 + $0x1d0] sm:$0xff] }
 0x6a6   :  { %v3465_v50 = vmul.f32 -1.442695, %v2214_v20  ;;  %v3466_v28 = vmul.f32 -1.442695, %v2215_v12  ;;  %v5934_v20 = vld [vmem:[#allocation15 + $0x1d8] sm:$0xff]  ;;  %v5937_v12 = vld [vmem:[#allocation15 + $0x1a0] sm:$0xff] }
 0x6a8   :  { %3648 = vpow2.f32 %v3465_v50  ;;  %v5940_v50 = vld [vmem:[#allocation15 + $0x1a8] sm:$0xff] }
 0x6a9   :  { %3650 = vpow2.f32 %v3466_v28  ;;  %v5943_v28 = vld [vmem:[#allocation15 + $0x1b0] sm:$0xff] }
 0x6aa   :  { %v2211_v60 = vpop.f32.mrf.mxu3  ;;  %v2191_v19 = vpop.f32.mrf.mxu2 }
 0x6ab   :  { %v2217_v51 = vadd.f32 %v2211_v60, %v7027_v0  ;;  %v2216_v17 = vadd.f32 %v2191_v19, %v7028_v52  ;;  %v5946_v60 = vld [vmem:[#allocation15 + $0x1b8] sm:$0xff]  ;;  %v5949_v0 = vld [vmem:[#allocation15 + $0x180] sm:$0xff] }
 0x6ac   :  { %v5970_v19 = vld [vmem:[#allocation15 + $0x178] sm:$0xff] }
 0x6ad   :  { %v3467_v63 = vmul.f32 -1.442695, %v2217_v51  ;;  %v5952_v51 = vld [vmem:[#allocation15 + $0x188] sm:$0xff]  ;;  %v5982_v52 = vld [vmem:[#allocation15 + $0x158] sm:$0xff] }
 0x6ae   :  { %v3649_v13 = vpop.eup %3648 }
 0x6af   :  { %v3651_v11 = vpop.eup %3650  ;;  %v2221_v3 = vadd.f32 1.0, %v3649_v13  ;;  %3652 = vpow2.f32 %v3467_v63  ;;  %v5955_v63 = vld [vmem:[#allocation15 + $0x190] sm:$0xff]  ;;  %v5958_v13 = vld [vmem:[#allocation15 + $0x198] sm:$0xff] }
 0x6b0   :  { %v2240_v58 = vadd.f32 1.0, %v3651_v11  ;;  %v5961_v11 = vld [vmem:[#allocation15 + $0x160] sm:$0xff] }
 0x6b1   :  { %3654 = vrcp.f32 %v2221_v3  ;;  %v2233_v5 = vand.u32 2147483648, %v2221_v3  ;;  %v2231_v33 = vand.u32 2147483647, %v2221_v3  ;;  %vm2227_vm15 = vweird.f32 %v2221_v3 }
 0x6b2   :  { %3656 = vrcp.f32 %v2240_v58  ;;  %v2252_v27 = vand.u32 2147483648, %v2240_v58  ;;  %v2250_v56 = vand.u32 2147483647, %v2240_v58  ;;  %vm2246_vm0 = vweird.f32 %v2240_v58 }
 0x6b3   :  { %v2234_v7 = vor.u32 1.1754944e-38, %v2233_v5  ;;  %vm2232_vm3 = vcmp.eq.f32.partialorder %v2231_v33, 8.507059e+37  ;;  %v6003_v5 = vld [vmem:[#allocation15 + $0x110] sm:$0xff]  ;;  %v6012_v33 = vld [vmem:[#allocation15 + $0xe8] sm:$0xff] }
 0x6b4   :  { %v2253_v47 = vor.u32 1.1754944e-38, %v2252_v27  ;;  %vm2251_vm4 = vcmp.eq.f32.partialorder %v2250_v56, 8.507059e+37  ;;  %v6006_v27 = vld [vmem:[#allocation15 + $0x118] sm:$0xff] }
 0x6b5   :  { %v3653_v39 = vpop.eup %3652  ;;  %v6018_v56 = vld [vmem:[#allocation15 + $0xf8] sm:$0xff] }
 0x6b6   :  { %v2260_v18 = vadd.f32 1.0, %v3653_v39  ;;  %v5973_v39 = vld [vmem:[#allocation15 + $0x140] sm:$0xff] }
 0x6b7   :  { %v3655_v8 = vpop.eup %3654 }
 0x6b8   :  { %v3657_v61 = vpop.eup %3656  ;;  %v2223_v10 = vmul.f32 %v3655_v8, %v2221_v3  ;;  %3658 = vrcp.f32 %v2260_v18  ;;  %vm2228_vm13 = vweird.f32 %v3655_v8  ;;  %v2272_v24 = vand.u32 2147483648, %v2260_v18  ;;  %v5964_v3 = vld [vmem:[#allocation15 + $0x168] sm:$0xff] }
 0x6b9   :  { %v2242_v46 = vmul.f32 %v3657_v61, %v2240_v58  ;;  %3660 = vtanh.f32 %v2216_v17  ;;  %vm2247_vm14 = vweird.f32 %v3657_v61  ;;  %vm2229_vm1 = vmor %vm2227_vm15, %vm2228_vm13  ;;  %vm2266_vm6 = vweird.f32 %v2260_v18  ;;  %v5967_v58 = vld [vmem:[#allocation15 + $0x170] sm:$0xff]  ;;  %v5985_v17 = vld [vmem:[#allocation15 + $0x120] sm:$0xff] }
 0x6ba   :  { %v2224_v2 = vsub.f32 1.0, %v2223_v10  ;;  %vm2248_vm2 = vmor %vm2246_vm0, %vm2247_vm14  ;;  %v2270_v34 = vand.u32 2147483647, %v2260_v18  ;;  %v2273_v44 = vor.u32 1.1754944e-38, %v2272_v24  ;;  %v5991_v10 = vld [vmem:[#allocation15 + $0x130] sm:$0xff]  ;;  %v6069_v24 = vld [vmem:[#allocation15 + $0x40] sm:$0xff] }
 0x6bb   :  { %v2243_v55 = vsub.f32 1.0, %v2242_v46  ;;  %v5994_v46 = vld [vmem:[#allocation15 + $0x138] sm:$0xff]  ;;  %7044 = vst [vmem:[#allocation99_spill] sm:$0xff] %v6069_v24 }
 0x6bc   :  { %v2225_v32 = vmul.f32 %v3655_v8, %v2224_v2  ;;  %vm2271_vm8 = vcmp.eq.f32.partialorder %v2270_v34, 8.507059e+37  ;;  %v5997_v2 = vld [vmem:[#allocation15 + $0x100] sm:$0xff]  ;;  %v6072_v34 = vld [vmem:[#allocation15 + $0x48] sm:$0xff] }
 0x6bd   :  { %v2244_v57 = vmul.f32 %v3657_v61, %v2243_v55  ;;  %v6000_v55 = vld [vmem:[#allocation15 + $0x108] sm:$0xff]  ;;  %7045 = vst [vmem:[#allocation101_spill] sm:$0xff] %v6072_v34 }
 0x6be   :  { %v3659_v41 = vpop.eup %3658  ;;  %v2226_v43 = vadd.f32 %v3655_v8, %v2225_v32  ;;  %v6009_v32 = vld [vmem:[#allocation15 + $0xe0] sm:$0xff] }
 0x6bf   :  { %v2245_v4 = vadd.f32 %v3657_v61, %v2244_v57  ;;  %v2262_v36 = vmul.f32 %v3659_v41, %v2260_v18  ;;  %v3661_v31 = vpop.eup %3660  ;;  %vm2267_vm5 = vweird.f32 %v3659_v41  ;;  %v5976_v18 = vld [vmem:[#allocation15 + $0x148] sm:$0xff]  ;;  %v6015_v57 = vld [vmem:[#allocation15 + $0xf0] sm:$0xff] }
 0x6c0   :  { %v2230_v53 = vsel %vm2229_vm1, %v3655_v8, %v2226_v43  ;;  %vm2268_vm7 = vmor %vm2266_vm6, %vm2267_vm5  ;;  %v5979_v8 = vld [vmem:[#allocation15 + $0x150] sm:$0xff]  ;;  %v6024_v43 = vld [vmem:[#allocation15 + $0xc8] sm:$0xff] }
 0x6c1   :  { %v2235_v40 = vsel %vm2232_vm3, %v2234_v7, %v2230_v53  ;;  %v2249_v30 = vsel %vm2248_vm2, %v3657_v61, %v2245_v4  ;;  %v2263_v15 = vsub.f32 1.0, %v2262_v36  ;;  %v5988_v61 = vld [vmem:[#allocation15 + $0x128] sm:$0xff]  ;;  %v6027_v7 = vld [vmem:[#allocation15 + $0xd0] sm:$0xff]  ;;  %v6030_v4 = vld [vmem:[#allocation15 + $0xd8] sm:$0xff] }
 0x6c2   :  { %v2254_v29 = vsel %vm2251_vm4, %v2253_v47, %v2249_v30  ;;  %v2277_v9 = vmul.f32 %v3661_v31, %v2235_v40  ;;  %7030 = vst [vmem:[#allocation81_spill] sm:$0xff] %v6027_v7  ;;  %v6033_v36 = vld [vmem:[#allocation15 + $0xa0] sm:$0xff]  ;;  %v6036_v47 = vld [vmem:[#allocation15 + $0xa8] sm:$0xff]  ;;  %v6039_v53 = vld [vmem:[#allocation15 + $0xb0] sm:$0xff] }
 0x6c3   :  { %v2276_v23 = vmul.f32 %v2254_v29, %v5824_v38  ;;  %v2264_v25 = vmul.f32 %v3659_v41, %v2263_v15  ;;  %v5913_v38 = vld [vmem:[#allocation15 + $0x1e0] sm:$0xff]  ;;  %7031 = vst [vmem:[#allocation79_spill] sm:$0xff] %v6030_v4  ;;  %v6042_v31 = vld [vmem:[#allocation15 + $0xb8] sm:$0xff]  ;;  %v6048_v30 = vld [vmem:[#allocation15 + $0x88] sm:$0xff] }
 0x6c4   :  { %7032 = vst [vmem:[#allocation57_spill] sm:$0xff] %v6033_v36  ;;  %v6045_v40 = vld [vmem:[#allocation15 + $0x80] sm:$0xff]  ;;  %v6051_v15 = vld [vmem:[#allocation15 + $0x90] sm:$0xff]  ;;  %v6054_v29 = vld [vmem:[#allocation15 + $0x98] sm:$0xff] }
 0x6c5   :  { %v5904_v14 = vadd.f32 %v2277_v9, %v2276_v23  ;;  %v2265_v21 = vadd.f32 %v3659_v41, %v2264_v25  ;;  %7033 = vst [vmem:[#allocation58_spill] sm:$0xff] %v6036_v47  ;;  %v6057_v9 = vld [vmem:[#allocation15 + $0x60] sm:$0xff]  ;;  %v6060_v23 = vld [vmem:[#allocation15 + $0x68] sm:$0xff]  ;;  %v6063_v25 = vld [vmem:[#allocation15 + $0x70] sm:$0xff] }
 0x6c6   :  { %7034 = vst [vmem:[#allocation84_spill] sm:$0xff] %v6039_v53 }
 0x6c7   :  { %3662 = vtanh.f32 %v5904_v14  ;;  %v2269_v35 = vsel %vm2268_vm7, %v3659_v41, %v2265_v21  ;;  %v6021_v41 = vld [vmem:[#allocation15 + $0xc0] sm:$0xff]  ;;  %7035 = vst [vmem:[#allocation83_spill] sm:$0xff] %v6042_v31  ;;  %v6066_v21 = vld [vmem:[#allocation15 + $0x78] sm:$0xff] }
 0x6c8   :  { %v2274_v1 = vsel %vm2271_vm8, %v2273_v44, %v2269_v35  ;;  %7036 = vst [vmem:[#allocation104_spill] sm:$0xff] %v6045_v40  ;;  %v6075_v35 = vld [vmem:[#allocation15 + $0x50] sm:$0xff]  ;;  %v6078_v44 = vld [vmem:[#allocation15 + $0x58] sm:$0xff] }
 0x6c9   :  { %7037 = vst [vmem:[#allocation61_spill] sm:$0xff] %v6048_v30 }
 0x6ca   :  { %7038 = vst [vmem:[#allocation106_spill] sm:$0xff] %v6051_v15 }
 0x6cb   :  { %7039 = vst [vmem:[#allocation62_spill] sm:$0xff] %v6054_v29 }
 0x6cc   :  { %7040 = vst [vmem:[#allocation116_spill] sm:$0xff] %v6057_v9 }
 0x6cd   :  { %v3663_v59 = vpop.eup %3662  ;;  %7041 = vst [vmem:[#allocation87_spill] sm:$0xff] %v6060_v23 }
 0x6ce   :  { %v5907_v48 = vmul.f32 %v3663_v59, %v2274_v1  ;;  %7042 = vst [vmem:[#allocation115_spill] sm:$0xff] %v6063_v25  ;;  %v6081_v59 = vld [vmem:[#allocation15 + $0x20] sm:$0xff]  ;;  %v6084_v1 = vld [vmem:[#allocation15 + $0x28] sm:$0xff] }
 0x6cf   :  { %7043 = vst [vmem:[#allocation88_spill] sm:$0xff] %v6066_v21 }
 0x6d0   :  { %7029 = vst [vmem:[#allocation56_spill] sm:$0xff] %v5907_v48  ;;  %2304 = vmatmul.f32.vlgmr.msra.gmra.mxu0 %v5907_v48  ;;  %2324 = vmatmul.f32.vlgmr.msra.gmra.mxu1 %v5907_v48 }
 0x6d1   :  { %2344 = vmatmul.f32.vlgmr.msrb.gmra.mxu2 %v5907_v48  ;;  %2364 = vmatmul.f32.vlgmr.msrb.gmra.mxu3 %v5907_v48  ;;  %7046 = vst [vmem:[#allocation92_spill] sm:$0xff] %v6075_v35  ;;  %v6090_v48 = vld [vmem:[#allocation15 + $0x38] sm:$0xff] }
 0x6d2   :  { %2596 = vmatpush.msra.mxu0 %v5913_v38  ;;  %2616 = vmatpush.msra.mxu1 %v5916_v49  ;;  %7047 = vst [vmem:[#allocation114_spill] sm:$0xff] %v6078_v44 }
 0x6d3   :  { %2636 = vmatpush.msrb.mxu2 %v5919_v42  ;;  %2656 = vmatpush.msrb.mxu3 %v5922_v37  ;;  %7048 = vst [vmem:[#allocation90_spill] sm:$0xff] %v6081_v59 }
 0x6d4   :  { %2597 = vmatpush.msra.mxu0 %v5925_v45  ;;  %2617 = vmatpush.msra.mxu1 %v5928_v62  ;;  %7049 = vst [vmem:[#allocation113_spill] sm:$0xff] %v6084_v1 }
 0x6d5   :  { %2637 = vmatpush.msrb.mxu2 %v5931_v6  ;;  %2657 = vmatpush.msrb.mxu3 %v5934_v20  ;;  %7051 = vst [vmem:[#allocation69_spill] sm:$0xff] %v6090_v48 }
 0x6d6   :  { %2598 = vmatpush.msra.mxu0 %v5937_v12  ;;  %2618 = vmatpush.msra.mxu1 %v5940_v50 }
 0x6d7   :  { %2638 = vmatpush.msrb.mxu2 %v5943_v28  ;;  %2658 = vmatpush.msrb.mxu3 %v5946_v60 }
 0x6d8   :  { %2599 = vmatpush.msra.mxu0 %v5949_v0  ;;  %2619 = vmatpush.msra.mxu1 %v5952_v51 }
 0x6d9   :  { %2639 = vmatpush.msrb.mxu2 %v5955_v63  ;;  %2659 = vmatpush.msrb.mxu3 %v5958_v13 }
 0x6da   :  { %2600 = vmatpush.msra.mxu0 %v5961_v11  ;;  %2620 = vmatpush.msra.mxu1 %v5964_v3 }
 0x6db   :  { %2640 = vmatpush.msrb.mxu2 %v5967_v58  ;;  %2660 = vmatpush.msrb.mxu3 %v5970_v19 }
 0x6dc   :  { %2601 = vmatpush.msra.mxu0 %v5973_v39  ;;  %2621 = vmatpush.msra.mxu1 %v5976_v18 }
 0x6dd   :  { %2641 = vmatpush.msrb.mxu2 %v5979_v8  ;;  %2661 = vmatpush.msrb.mxu3 %v5982_v52 }
 0x6de   :  { %2602 = vmatpush.msra.mxu0 %v5985_v17  ;;  %2622 = vmatpush.msra.mxu1 %v5988_v61 }
 0x6df   :  { %2642 = vmatpush.msrb.mxu2 %v5991_v10  ;;  %2662 = vmatpush.msrb.mxu3 %v5994_v46 }
 0x6e0   :  { %2603 = vmatpush.msra.mxu0 %v5997_v2  ;;  %2623 = vmatpush.msra.mxu1 %v6000_v55 }
 0x6e1   :  { %2643 = vmatpush.msrb.mxu2 %v6003_v5  ;;  %2663 = vmatpush.msrb.mxu3 %v6006_v27 }
 0x6e2   :  { %2604 = vmatpush.msra.mxu0 %v6009_v32  ;;  %2624 = vmatpush.msra.mxu1 %v6012_v33 }
 0x6e3   :  { %2644 = vmatpush.msrb.mxu2 %v6015_v57  ;;  %2664 = vmatpush.msrb.mxu3 %v6018_v56 }
 0x6e4   :  { %2605 = vmatpush.msra.mxu0 %v6021_v41  ;;  %2625 = vmatpush.msra.mxu1 %v6024_v43 }
 0x6e5   :  { %2645 = vmatpush.msrb.mxu2 %v6027_v7  ;;  %2665 = vmatpush.msrb.mxu3 %v6030_v4 }
 0x6e6   :  { %2606 = vmatpush.msra.mxu0 %v6033_v36  ;;  %2626 = vmatpush.msra.mxu1 %v6036_v47 }
 0x6e7   :  { %2646 = vmatpush.msrb.mxu2 %v6039_v53  ;;  %2666 = vmatpush.msrb.mxu3 %v6042_v31 }
 0x6e8   :  { %2607 = vmatpush.msra.mxu0 %v6045_v40  ;;  %2627 = vmatpush.msra.mxu1 %v6048_v30 }
 0x6e9   :  { %2647 = vmatpush.msrb.mxu2 %v6051_v15  ;;  %2667 = vmatpush.msrb.mxu3 %v6054_v29 }
 0x6ea   :  { %2608 = vmatpush.msra.mxu0 %v6057_v9  ;;  %2628 = vmatpush.msra.mxu1 %v6060_v23 }
 0x6eb   :  { %2648 = vmatpush.msrb.mxu2 %v6063_v25  ;;  %2668 = vmatpush.msrb.mxu3 %v6066_v21 }
 0x6ec   :  { %2609 = vmatpush.msra.mxu0 %v6069_v24  ;;  %2629 = vmatpush.msra.mxu1 %v6072_v34 }
 0x6ed   :  { %2649 = vmatpush.msrb.mxu2 %v6075_v35  ;;  %2669 = vmatpush.msrb.mxu3 %v6078_v44  ;;  %v6096_v44 = vld [vmem:[#allocation15 + $0x8] sm:$0xff] }
 0x6ee   :  { %2610 = vmatpush.msra.mxu0 %v6081_v59  ;;  %2630 = vmatpush.msra.mxu1 %v6084_v1  ;;  %7053 = vst [vmem:[#allocation49_spill] sm:$0xff] %v6096_v44  ;;  %v6099_v59 = vld [vmem:[#allocation15 + $0x10] sm:$0xff]  ;;  %v6102_v1 = vld [vmem:[#allocation15 + $0x18] sm:$0xff] }
 0x6ef   :  { %2650 = vmatpush.msrb.mxu2 %v6087_v22  ;;  %2670 = vmatpush.msrb.mxu3 %v6090_v48  ;;  %7054 = vst [vmem:[#allocation74_spill] sm:$0xff] %v6099_v59  ;;  %v7056_v22 = vld [vmem:[#allocation89_spill] sm:$0xff]  ;;  %v7057_v48 = vld [vmem:[#allocation91_spill] sm:$0xff] }
 0x6f0   :  { %2611 = vmatpush.msra.mxu0 %v6093_v26  ;;  %2631 = vmatpush.msra.mxu1 %v6096_v44  ;;  %7055 = vst [vmem:[#allocation73_spill] sm:$0xff] %v6102_v1  ;;  %v454_v35 = vadd.f32 %v7056_v22, %v7023_v54  ;;  %v495_v34 = vadd.f32 %v7057_v48, %v7025_v16 }
 0x6f1   :  { %2651 = vmatpush.msrb.mxu2 %v6099_v59  ;;  %2671 = vmatpush.msrb.mxu3 %v6102_v1  ;;  %v7058_v59 = vld [vmem:[#allocation110_spill] sm:$0xff] }
 0x74d   :  { %v2305_v24 = vpop.f32.mrf.mxu0  ;;  %v2325_v26 = vpop.f32.mrf.mxu1 }
 0x74e   :  { %v2368_v21 = vadd.f32 %v2305_v24, %v454_v35  ;;  %v2369_v25 = vadd.f32 %v2325_v26, %v495_v34  ;;  %v7059_v26 = vld [vmem:[#allocation109_spill] sm:$0xff] }
 0x750   :  { %v3468_v23 = vmul.f32 -1.442695, %v2368_v21  ;;  %v3469_v44 = vmul.f32 -1.442695, %v2369_v25 }
 0x752   :  { %3664 = vpow2.f32 %v3468_v23 }
 0x753   :  { %3666 = vpow2.f32 %v3469_v44 }
 0x754   :  { %v2365_v9 = vpop.f32.mrf.mxu3  ;;  %v2345_v48 = vpop.f32.mrf.mxu2 }
 0x755   :  { %v2371_v29 = vadd.f32 %v2365_v9, %v7058_v59  ;;  %v2370_v21 = vadd.f32 %v2345_v48, %v7059_v26 }
 0x757   :  { %v3470_v15 = vmul.f32 -1.442695, %v2371_v29 }
 0x758   :  { %v3665_v30 = vpop.eup %3664 }
 0x759   :  { %v3667_v1 = vpop.eup %3666  ;;  %v2375_v40 = vadd.f32 1.0, %v3665_v30  ;;  %3668 = vpow2.f32 %v3470_v15 }
 0x75a   :  { %v2394_v22 = vadd.f32 1.0, %v3667_v1 }
 0x75b   :  { %3670 = vrcp.f32 %v2375_v40  ;;  %v2387_v29 = vand.u32 2147483648, %v2375_v40  ;;  %v2385_v15 = vand.u32 2147483647, %v2375_v40  ;;  %vm2381_vm11 = vweird.f32 %v2375_v40 }
 0x75c   :  { %3672 = vrcp.f32 %v2394_v22  ;;  %v2406_v44 = vand.u32 2147483648, %v2394_v22  ;;  %v2404_v1 = vand.u32 2147483647, %v2394_v22  ;;  %vm2400_vm12 = vweird.f32 %v2394_v22 }
 0x75d   :  { %v2388_v48 = vor.u32 1.1754944e-38, %v2387_v29  ;;  %vm2386_vm15 = vcmp.eq.f32.partialorder %v2385_v15, 8.507059e+37 }
 0x75e   :  { %vm2405_vm0 = vcmp.eq.f32.partialorder %v2404_v1, 8.507059e+37  ;;  %v7068_v1 = vld [vmem:[#allocation61_spill] sm:$0xff] }
 0x75f   :  { %v3669_v16 = vpop.eup %3668 }
 0x760   :  { %v2414_v54 = vadd.f32 1.0, %v3669_v16 }
 0x761   :  { %v3671_v24 = vpop.eup %3670 }
 0x762   :  { %v3673_v25 = vpop.eup %3672  ;;  %v2377_v23 = vmul.f32 %v3671_v24, %v2375_v40  ;;  %3674 = vrcp.f32 %v2414_v54  ;;  %vm2382_vm9 = vweird.f32 %v3671_v24  ;;  %v2426_v29 = vand.u32 2147483648, %v2414_v54 }
 0x763   :  { %v2396_v34 = vmul.f32 %v3673_v25, %v2394_v22  ;;  %3676 = vtanh.f32 %v2370_v21  ;;  %vm2401_vm10 = vweird.f32 %v3673_v25  ;;  %vm2383_vm13 = vmor %vm2381_vm11, %vm2382_vm9  ;;  %vm2420_vm2 = vweird.f32 %v2414_v54 }
 0x764   :  { %v2378_v35 = vsub.f32 1.0, %v2377_v23  ;;  %vm2402_vm14 = vmor %vm2400_vm12, %vm2401_vm10  ;;  %v2407_v23 = vor.u32 1.1754944e-38, %v2406_v44  ;;  %v2427_v15 = vor.u32 1.1754944e-38, %v2426_v29  ;;  %v7079_v29 = vld [vmem:[#allocation90_spill] sm:$0xff] }
 0x765   :  { %v2397_v9 = vsub.f32 1.0, %v2396_v34 }
 0x766   :  { %v2379_v30 = vmul.f32 %v3671_v24, %v2378_v35 }
 0x767   :  { %v2398_v59 = vmul.f32 %v3673_v25, %v2397_v9 }
 0x768   :  { %v3675_v31 = vpop.eup %3674  ;;  %v2380_v16 = vadd.f32 %v3671_v24, %v2379_v30 }
 0x769   :  { %v2399_v26 = vadd.f32 %v3673_v25, %v2398_v59  ;;  %v2416_v53 = vmul.f32 %v3675_v31, %v2414_v54  ;;  %v3677_v21 = vpop.eup %3676  ;;  %vm2421_vm1 = vweird.f32 %v3675_v31 }
 0x76a   :  { %v2384_v34 = vsel %vm2383_vm13, %v3671_v24, %v2380_v16  ;;  %v2424_v24 = vand.u32 2147483647, %v2414_v54  ;;  %vm2422_vm3 = vmor %vm2420_vm2, %vm2421_vm1  ;;  %v7061_v54 = vld [vmem:[#allocation81_spill] sm:$0xff]  ;;  %v7069_v16 = vld [vmem:[#allocation106_spill] sm:$0xff] }
 0x76b   :  { %v2389_v47 = vsel %vm2386_vm15, %v2388_v48, %v2384_v34  ;;  %v2403_v35 = vsel %vm2402_vm14, %v3673_v25, %v2399_v26  ;;  %v2417_v36 = vsub.f32 1.0, %v2416_v53  ;;  %v7070_v48 = vld [vmem:[#allocation62_spill] sm:$0xff]  ;;  %v7071_v26 = vld [vmem:[#allocation116_spill] sm:$0xff]  ;;  %v7073_v34 = vld [vmem:[#allocation115_spill] sm:$0xff] }
 0x76c   :  { %v2408_v9 = vsel %vm2405_vm0, %v2407_v23, %v2403_v35  ;;  %v2431_v4 = vmul.f32 %v3677_v21, %v2389_v47  ;;  %vm2425_vm4 = vcmp.eq.f32.partialorder %v2424_v24, 8.507059e+37  ;;  %v7066_v47 = vld [vmem:[#allocation83_spill] sm:$0xff]  ;;  %v7074_v21 = vld [vmem:[#allocation88_spill] sm:$0xff]  ;;  %v7080_v24 = vld [vmem:[#allocation113_spill] sm:$0xff] }
 0x76d   :  { %v2430_v7 = vmul.f32 %v2408_v9, %v5904_v14  ;;  %v2418_v30 = vmul.f32 %v3675_v31, %v2417_v36  ;;  %v7062_v14 = vld [vmem:[#allocation79_spill] sm:$0xff]  ;;  %v7065_v36 = vld [vmem:[#allocation84_spill] sm:$0xff]  ;;  %v7076_v9 = vld [vmem:[#allocation101_spill] sm:$0xff] }
 0x76e   :  { %v7072_v23 = vld [vmem:[#allocation87_spill] sm:$0xff] }
 0x76f   :  { %v6112_v40 = vadd.f32 %v2431_v4, %v2430_v7  ;;  %v2419_v22 = vadd.f32 %v3675_v31, %v2418_v30  ;;  %v7063_v7 = vld [vmem:[#allocation57_spill] sm:$0xff]  ;;  %v7064_v4 = vld [vmem:[#allocation58_spill] sm:$0xff]  ;;  %v7075_v35 = vld [vmem:[#allocation99_spill] sm:$0xff] }
 0x770   :  { %v7077_v30 = vld [vmem:[#allocation92_spill] sm:$0xff] }
 0x771   :  { %3678 = vtanh.f32 %v6112_v40  ;;  %v2423_v44 = vsel %vm2422_vm3, %v3675_v31, %v2419_v22  ;;  %v7067_v31 = vld [vmem:[#allocation104_spill] sm:$0xff]  ;;  %v7078_v22 = vld [vmem:[#allocation114_spill] sm:$0xff] }
 0x772   :  { %v2428_v53 = vsel %vm2425_vm4, %v2427_v15, %v2423_v44  ;;  %v7081_v44 = vld [vmem:[#allocation60_spill] sm:$0xff]  ;;  %v7082_v15 = vld [vmem:[#allocation69_spill] sm:$0xff] }
 0x777   :  { %v3679_v25 = vpop.eup %3678 }
 0x778   :  { %v6115_v59 = vmul.f32 %v3679_v25, %v2428_v53  ;;  %v7083_v25 = vld [vmem:[#allocation47_spill] sm:$0xff]  ;;  %v7084_v53 = vld [vmem:[#allocation49_spill] sm:$0xff] }
 0x77a   :  { %7060 = vst [vmem:[#allocation53_spill] sm:$0xff] %v6115_v59  ;;  %2458 = vmatmul.f32.vlgmr.msrb.gmra.mxu0 %v6115_v59  ;;  %2478 = vmatmul.f32.vlgmr.msrb.gmra.mxu1 %v6115_v59 }
 0x77b   :  { %2498 = vmatmul.f32.vlgmr.msra.gmra.mxu2 %v6115_v59  ;;  %2518 = vmatmul.f32.vlgmr.msra.gmra.mxu3 %v6115_v59  ;;  %v7085_v59 = vld [vmem:[#allocation74_spill] sm:$0xff] }
 0x77c   :  { %2750 = vmatpush.msrb.mxu0 %v5913_v38  ;;  %2770 = vmatpush.msrb.mxu1 %v5916_v49 }
 0x77d   :  { %2790 = vmatpush.msra.mxu2 %v5919_v42  ;;  %2810 = vmatpush.msra.mxu3 %v5922_v37 }
 0x77e   :  { %2751 = vmatpush.msrb.mxu0 %v5925_v45  ;;  %2771 = vmatpush.msrb.mxu1 %v5928_v62 }
 0x77f   :  { %2791 = vmatpush.msra.mxu2 %v5931_v6  ;;  %2811 = vmatpush.msra.mxu3 %v5934_v20 }
 0x780   :  { %2752 = vmatpush.msrb.mxu0 %v5937_v12  ;;  %2772 = vmatpush.msrb.mxu1 %v5940_v50 }
 0x781   :  { %2792 = vmatpush.msra.mxu2 %v5943_v28  ;;  %2812 = vmatpush.msra.mxu3 %v5946_v60 }
 0x782   :  { %2753 = vmatpush.msrb.mxu0 %v5949_v0  ;;  %2773 = vmatpush.msrb.mxu1 %v5952_v51 }
 0x783   :  { %2793 = vmatpush.msra.mxu2 %v5955_v63  ;;  %2813 = vmatpush.msra.mxu3 %v5958_v13 }
 0x784   :  { %2754 = vmatpush.msrb.mxu0 %v5961_v11  ;;  %2774 = vmatpush.msrb.mxu1 %v5964_v3 }
 0x785   :  { %2794 = vmatpush.msra.mxu2 %v5967_v58  ;;  %2814 = vmatpush.msra.mxu3 %v5970_v19 }
 0x786   :  { %2755 = vmatpush.msrb.mxu0 %v5973_v39  ;;  %2775 = vmatpush.msrb.mxu1 %v5976_v18 }
 0x787   :  { %2795 = vmatpush.msra.mxu2 %v5979_v8  ;;  %2815 = vmatpush.msra.mxu3 %v5982_v52 }
 0x788   :  { %2756 = vmatpush.msrb.mxu0 %v5985_v17  ;;  %2776 = vmatpush.msrb.mxu1 %v5988_v61 }
 0x789   :  { %2796 = vmatpush.msra.mxu2 %v5991_v10  ;;  %2816 = vmatpush.msra.mxu3 %v5994_v46 }
 0x78a   :  { %2757 = vmatpush.msrb.mxu0 %v5997_v2  ;;  %2777 = vmatpush.msrb.mxu1 %v6000_v55 }
 0x78b   :  { %2797 = vmatpush.msra.mxu2 %v6003_v5  ;;  %2817 = vmatpush.msra.mxu3 %v6006_v27 }
 0x78c   :  { %2758 = vmatpush.msrb.mxu0 %v6009_v32  ;;  %2778 = vmatpush.msrb.mxu1 %v6012_v33 }
 0x78d   :  { %2798 = vmatpush.msra.mxu2 %v6015_v57  ;;  %2818 = vmatpush.msra.mxu3 %v6018_v56 }
 0x78e   :  { %2759 = vmatpush.msrb.mxu0 %v6021_v41  ;;  %2779 = vmatpush.msrb.mxu1 %v6024_v43 }
 0x78f   :  { %2799 = vmatpush.msra.mxu2 %v7061_v54  ;;  %2819 = vmatpush.msra.mxu3 %v7062_v14 }
 0x790   :  { %2760 = vmatpush.msrb.mxu0 %v7063_v7  ;;  %2780 = vmatpush.msrb.mxu1 %v7064_v4 }
 0x791   :  { %2800 = vmatpush.msra.mxu2 %v7065_v36  ;;  %2820 = vmatpush.msra.mxu3 %v7066_v47 }
 0x792   :  { %2761 = vmatpush.msrb.mxu0 %v7067_v31  ;;  %2781 = vmatpush.msrb.mxu1 %v7068_v1 }
 0x793   :  { %2801 = vmatpush.msra.mxu2 %v7069_v16  ;;  %2821 = vmatpush.msra.mxu3 %v7070_v48 }
 0x794   :  { %2762 = vmatpush.msrb.mxu0 %v7071_v26  ;;  %2782 = vmatpush.msrb.mxu1 %v7072_v23 }
 0x795   :  { %2802 = vmatpush.msra.mxu2 %v7073_v34  ;;  %2822 = vmatpush.msra.mxu3 %v7074_v21  ;;  %v7090_v34 = vld [vmem:[#allocation86_spill] sm:$0xff] }
 0x796   :  { %2763 = vmatpush.msrb.mxu0 %v7075_v35  ;;  %2783 = vmatpush.msrb.mxu1 %v7076_v9  ;;  %v7086_v35 = vld [vmem:[#allocation73_spill] sm:$0xff]  ;;  %v7087_v9 = vld [vmem:[#allocation35_spill] sm:$0xff] }
 0x797   :  { %2803 = vmatpush.msra.mxu2 %v7077_v30  ;;  %2823 = vmatpush.msra.mxu3 %v7078_v22  ;;  %v7088_v30 = vld [vmem:[#allocation85_spill] sm:$0xff]  ;;  %v7089_v22 = vld [vmem:[#allocation66_spill] sm:$0xff] }
 0x798   :  { %2764 = vmatpush.msrb.mxu0 %v7079_v29  ;;  %2784 = vmatpush.msrb.mxu1 %v7080_v24  ;;  %v451_v21 = vadd.f32 %v7088_v30, %v7087_v9  ;;  %v492_v29 = vadd.f32 %v7090_v34, %v7089_v22 }
 0x799   :  { %2804 = vmatpush.msra.mxu2 %v7081_v44  ;;  %2824 = vmatpush.msra.mxu3 %v7082_v15 }
 0x79a   :  { %2765 = vmatpush.msrb.mxu0 %v7083_v25  ;;  %2785 = vmatpush.msrb.mxu1 %v7084_v53  ;;  %v7091_v53 = vld [vmem:[#allocation108_spill] sm:$0xff] }
 0x79b   :  { %2805 = vmatpush.msra.mxu2 %v7085_v59  ;;  %2825 = vmatpush.msra.mxu3 %v7086_v35 }
 0x7f7   :  { %v2459_v23 = vpop.f32.mrf.mxu0  ;;  %v2479_v24 = vpop.f32.mrf.mxu1 }
 0x7f8   :  { %v2522_v26 = vadd.f32 %v2459_v23, %v451_v21  ;;  %v2523_v44 = vadd.f32 %v2479_v24, %v492_v29  ;;  %v7092_v21 = vld [vmem:[#allocation107_spill] sm:$0xff] }
 0x7fa   :  { %v3471_v48 = vmul.f32 -1.442695, %v2522_v26  ;;  %v3472_v15 = vmul.f32 -1.442695, %v2523_v44 }
 0x7fc   :  { %3680 = vpow2.f32 %v3471_v48 }
 0x7fd   :  { %3682 = vpow2.f32 %v3472_v15 }
 0x7fe   :  { %v2519_v25 = vpop.f32.mrf.mxu3  ;;  %v2499_v34 = vpop.f32.mrf.mxu2 }
 0x7ff   :  { %v2525_v16 = vadd.f32 %v2519_v25, %v7091_v53  ;;  %v2524_v26 = vadd.f32 %v2499_v34, %v7092_v21 }
 0x801   :  { %v3473_v59 = vmul.f32 -1.442695, %v2525_v16 }
 0x802   :  { %v3681_v1 = vpop.eup %3680 }
 0x803   :  { %v3683_v35 = vpop.eup %3682  ;;  %v2529_v31 = vadd.f32 1.0, %v3681_v1  ;;  %3684 = vpow2.f32 %v3473_v59 }
 0x804   :  { %v2548_v30 = vadd.f32 1.0, %v3683_v35 }
 0x805   :  { %3686 = vrcp.f32 %v2529_v31  ;;  %v2541_v16 = vand.u32 2147483648, %v2529_v31  ;;  %v2539_v59 = vand.u32 2147483647, %v2529_v31  ;;  %vm2535_vm7 = vweird.f32 %v2529_v31 }
 0x806   :  { %3688 = vrcp.f32 %v2548_v30  ;;  %v2560_v25 = vand.u32 2147483648, %v2548_v30  ;;  %v2558_v53 = vand.u32 2147483647, %v2548_v30  ;;  %vm2554_vm8 = vweird.f32 %v2548_v30 }
 0x807   :  { %v2542_v34 = vor.u32 1.1754944e-38, %v2541_v16  ;;  %vm2540_vm11 = vcmp.eq.f32.partialorder %v2539_v59, 8.507059e+37 }
 0x808   :  { %vm2559_vm12 = vcmp.eq.f32.partialorder %v2558_v53, 8.507059e+37  ;;  %v7101_v53 = vld [vmem:[#allocation61_spill] sm:$0xff] }
 0x809   :  { %v3685_v22 = vpop.eup %3684 }
 0x80a   :  { %v2568_v9 = vadd.f32 1.0, %v3685_v22 }
 0x80b   :  { %v3687_v23 = vpop.eup %3686 }
 0x80c   :  { %v3689_v29 = vpop.eup %3688  ;;  %v2531_v48 = vmul.f32 %v3687_v23, %v2529_v31  ;;  %3690 = vrcp.f32 %v2568_v9  ;;  %vm2536_vm5 = vweird.f32 %v3687_v23  ;;  %v2580_v16 = vand.u32 2147483648, %v2568_v9 }
 0x80d   :  { %v2550_v24 = vmul.f32 %v3689_v29, %v2548_v30  ;;  %3692 = vtanh.f32 %v2524_v26  ;;  %vm2555_vm6 = vweird.f32 %v3689_v29  ;;  %vm2537_vm9 = vmor %vm2535_vm7, %vm2536_vm5  ;;  %vm2574_vm14 = vweird.f32 %v2568_v9 }
 0x80e   :  { %v2532_v44 = vsub.f32 1.0, %v2531_v48  ;;  %vm2556_vm10 = vmor %vm2554_vm8, %vm2555_vm6  ;;  %v2561_v48 = vor.u32 1.1754944e-38, %v2560_v25  ;;  %v2581_v59 = vor.u32 1.1754944e-38, %v2580_v16  ;;  %v7112_v16 = vld [vmem:[#allocation90_spill] sm:$0xff] }
 0x80f   :  { %v2551_v15 = vsub.f32 1.0, %v2550_v24 }
 0x810   :  { %v2533_v1 = vmul.f32 %v3687_v23, %v2532_v44 }
 0x811   :  { %v2552_v35 = vmul.f32 %v3689_v29, %v2551_v15 }
 0x812   :  { %v3691_v47 = vpop.eup %3690  ;;  %v2534_v22 = vadd.f32 %v3687_v23, %v2533_v1 }
 0x813   :  { %v2553_v21 = vadd.f32 %v3689_v29, %v2552_v35  ;;  %v2570_v36 = vmul.f32 %v3691_v47, %v2568_v9  ;;  %v3693_v26 = vpop.eup %3692  ;;  %vm2575_vm13 = vweird.f32 %v3691_v47 }
 0x814   :  { %v2538_v24 = vsel %vm2537_vm9, %v3687_v23, %v2534_v22  ;;  %v2578_v23 = vand.u32 2147483647, %v2568_v9  ;;  %vm2576_vm15 = vmor %vm2574_vm14, %vm2575_vm13  ;;  %v7100_v9 = vld [vmem:[#allocation104_spill] sm:$0xff]  ;;  %v7102_v22 = vld [vmem:[#allocation106_spill] sm:$0xff] }
 0x815   :  { %v2543_v4 = vsel %vm2540_vm11, %v2542_v34, %v2538_v24  ;;  %v2557_v44 = vsel %vm2556_vm10, %v3689_v29, %v2553_v21  ;;  %v2571_v7 = vsub.f32 1.0, %v2570_v36  ;;  %v7103_v34 = vld [vmem:[#allocation62_spill] sm:$0xff]  ;;  %v7104_v21 = vld [vmem:[#allocation116_spill] sm:$0xff]  ;;  %v7106_v24 = vld [vmem:[#allocation115_spill] sm:$0xff] }
 0x816   :  { %v2562_v15 = vsel %vm2559_vm12, %v2561_v48, %v2557_v44  ;;  %v2585_v14 = vmul.f32 %v3693_v26, %v2543_v4  ;;  %vm2579_vm0 = vcmp.eq.f32.partialorder %v2578_v23, 8.507059e+37  ;;  %v7098_v4 = vld [vmem:[#allocation84_spill] sm:$0xff]  ;;  %v7105_v48 = vld [vmem:[#allocation87_spill] sm:$0xff]  ;;  %v7113_v23 = vld [vmem:[#allocation113_spill] sm:$0xff] }
 0x817   :  { %v2584_v54 = vmul.f32 %v2562_v15, %v6112_v40  ;;  %v2572_v1 = vmul.f32 %v3691_v47, %v2571_v7  ;;  %v7094_v40 = vld [vmem:[#allocation81_spill] sm:$0xff]  ;;  %v7097_v7 = vld [vmem:[#allocation58_spill] sm:$0xff]  ;;  %v7107_v26 = vld [vmem:[#allocation88_spill] sm:$0xff] }
 0x818   :  { %v7108_v44 = vld [vmem:[#allocation99_spill] sm:$0xff]  ;;  %v7109_v15 = vld [vmem:[#allocation101_spill] sm:$0xff] }
 0x819   :  { %v6192_v31 = vadd.f32 %v2585_v14, %v2584_v54  ;;  %v2573_v30 = vadd.f32 %v3691_v47, %v2572_v1  ;;  %v7095_v54 = vld [vmem:[#allocation79_spill] sm:$0xff]  ;;  %v7096_v14 = vld [vmem:[#allocation57_spill] sm:$0xff]  ;;  %v7110_v1 = vld [vmem:[#allocation92_spill] sm:$0xff] }
 0x81b   :  { %3694 = vtanh.f32 %v6192_v31  ;;  %v2577_v25 = vsel %vm2576_vm15, %v3691_v47, %v2573_v30  ;;  %v7099_v47 = vld [vmem:[#allocation83_spill] sm:$0xff]  ;;  %v7111_v30 = vld [vmem:[#allocation114_spill] sm:$0xff] }
 0x81c   :  { %v2582_v36 = vsel %vm2579_vm0, %v2581_v59, %v2577_v25  ;;  %v7114_v25 = vld [vmem:[#allocation60_spill] sm:$0xff]  ;;  %v7115_v59 = vld [vmem:[#allocation69_spill] sm:$0xff] }
 0x821   :  { %v3695_v29 = vpop.eup %3694 }
 0x822   :  { %v6195_v35 = vmul.f32 %v3695_v29, %v2582_v36  ;;  %v7116_v29 = vld [vmem:[#allocation47_spill] sm:$0xff]  ;;  %v7117_v36 = vld [vmem:[#allocation49_spill] sm:$0xff] }
 0x824   :  { %7093 = vst [vmem:[#allocation54_spill] sm:$0xff] %v6195_v35  ;;  %2612 = vmatmul.f32.vlgmr.msra.gmra.mxu0 %v6195_v35  ;;  %2632 = vmatmul.f32.vlgmr.msra.gmra.mxu1 %v6195_v35 }
 0x825   :  { %2652 = vmatmul.f32.vlgmr.msrb.gmra.mxu2 %v6195_v35  ;;  %2672 = vmatmul.f32.vlgmr.msrb.gmra.mxu3 %v6195_v35  ;;  %v7118_v35 = vld [vmem:[#allocation74_spill] sm:$0xff] }
 0x826   :  { %2904 = vmatpush.msra.mxu0 %v5913_v38  ;;  %2924 = vmatpush.msra.mxu1 %v5916_v49 }
 0x827   :  { %2944 = vmatpush.msrb.mxu2 %v5919_v42  ;;  %2964 = vmatpush.msrb.mxu3 %v5922_v37 }
 0x828   :  { %2905 = vmatpush.msra.mxu0 %v5925_v45  ;;  %2925 = vmatpush.msra.mxu1 %v5928_v62 }
 0x829   :  { %2945 = vmatpush.msrb.mxu2 %v5931_v6  ;;  %2965 = vmatpush.msrb.mxu3 %v5934_v20 }
 0x82a   :  { %2906 = vmatpush.msra.mxu0 %v5937_v12  ;;  %2926 = vmatpush.msra.mxu1 %v5940_v50 }
 0x82b   :  { %2946 = vmatpush.msrb.mxu2 %v5943_v28  ;;  %2966 = vmatpush.msrb.mxu3 %v5946_v60 }
 0x82c   :  { %2907 = vmatpush.msra.mxu0 %v5949_v0  ;;  %2927 = vmatpush.msra.mxu1 %v5952_v51 }
 0x82d   :  { %2947 = vmatpush.msrb.mxu2 %v5955_v63  ;;  %2967 = vmatpush.msrb.mxu3 %v5958_v13 }
 0x82e   :  { %2908 = vmatpush.msra.mxu0 %v5961_v11  ;;  %2928 = vmatpush.msra.mxu1 %v5964_v3 }
 0x82f   :  { %2948 = vmatpush.msrb.mxu2 %v5967_v58  ;;  %2968 = vmatpush.msrb.mxu3 %v5970_v19 }
 0x830   :  { %2909 = vmatpush.msra.mxu0 %v5973_v39  ;;  %2929 = vmatpush.msra.mxu1 %v5976_v18 }
 0x831   :  { %2949 = vmatpush.msrb.mxu2 %v5979_v8  ;;  %2969 = vmatpush.msrb.mxu3 %v5982_v52 }
 0x832   :  { %2910 = vmatpush.msra.mxu0 %v5985_v17  ;;  %2930 = vmatpush.msra.mxu1 %v5988_v61 }
 0x833   :  { %2950 = vmatpush.msrb.mxu2 %v5991_v10  ;;  %2970 = vmatpush.msrb.mxu3 %v5994_v46 }
 0x834   :  { %2911 = vmatpush.msra.mxu0 %v5997_v2  ;;  %2931 = vmatpush.msra.mxu1 %v6000_v55 }
 0x835   :  { %2951 = vmatpush.msrb.mxu2 %v6003_v5  ;;  %2971 = vmatpush.msrb.mxu3 %v6006_v27 }
 0x836   :  { %2912 = vmatpush.msra.mxu0 %v6009_v32  ;;  %2932 = vmatpush.msra.mxu1 %v6012_v33 }
 0x837   :  { %2952 = vmatpush.msrb.mxu2 %v6015_v57  ;;  %2972 = vmatpush.msrb.mxu3 %v6018_v56 }
 0x838   :  { %2913 = vmatpush.msra.mxu0 %v6021_v41  ;;  %2933 = vmatpush.msra.mxu1 %v6024_v43 }
 0x839   :  { %2953 = vmatpush.msrb.mxu2 %v7094_v40  ;;  %2973 = vmatpush.msrb.mxu3 %v7095_v54 }
 0x83a   :  { %2914 = vmatpush.msra.mxu0 %v7096_v14  ;;  %2934 = vmatpush.msra.mxu1 %v7097_v7 }
 0x83b   :  { %2954 = vmatpush.msrb.mxu2 %v7098_v4  ;;  %2974 = vmatpush.msrb.mxu3 %v7099_v47 }
 0x83c   :  { %2915 = vmatpush.msra.mxu0 %v7100_v9  ;;  %2935 = vmatpush.msra.mxu1 %v7101_v53 }
 0x83d   :  { %2955 = vmatpush.msrb.mxu2 %v7102_v22  ;;  %2975 = vmatpush.msrb.mxu3 %v7103_v34 }
 0x83e   :  { %2916 = vmatpush.msra.mxu0 %v7104_v21  ;;  %2936 = vmatpush.msra.mxu1 %v7105_v48 }
 0x83f   :  { %2956 = vmatpush.msrb.mxu2 %v7106_v24  ;;  %2976 = vmatpush.msrb.mxu3 %v7107_v26  ;;  %v7123_v24 = vld [vmem:[#allocation82_spill] sm:$0xff] }
 0x840   :  { %2917 = vmatpush.msra.mxu0 %v7108_v44  ;;  %2937 = vmatpush.msra.mxu1 %v7109_v15  ;;  %v7119_v44 = vld [vmem:[#allocation73_spill] sm:$0xff]  ;;  %v7120_v15 = vld [vmem:[#allocation35_spill] sm:$0xff] }
 0x841   :  { %2957 = vmatpush.msrb.mxu2 %v7110_v1  ;;  %2977 = vmatpush.msrb.mxu3 %v7111_v30  ;;  %v7121_v1 = vld [vmem:[#allocation80_spill] sm:$0xff]  ;;  %v7122_v30 = vld [vmem:[#allocation66_spill] sm:$0xff] }
 0x842   :  { %2918 = vmatpush.msra.mxu0 %v7112_v16  ;;  %2938 = vmatpush.msra.mxu1 %v7113_v23  ;;  %v448_v26 = vadd.f32 %v7121_v1, %v7120_v15  ;;  %v489_v16 = vadd.f32 %v7123_v24, %v7122_v30 }
 0x843   :  { %2958 = vmatpush.msrb.mxu2 %v7114_v25  ;;  %2978 = vmatpush.msrb.mxu3 %v7115_v59 }
 0x844   :  { %2919 = vmatpush.msra.mxu0 %v7116_v29  ;;  %2939 = vmatpush.msra.mxu1 %v7117_v36  ;;  %v7124_v36 = vld [vmem:[#allocation105_spill] sm:$0xff] }
 0x845   :  { %2959 = vmatpush.msrb.mxu2 %v7118_v35  ;;  %2979 = vmatpush.msrb.mxu3 %v7119_v44 }
 0x8a1   :  { %v2613_v21 = vpop.f32.mrf.mxu0  ;;  %v2633_v23 = vpop.f32.mrf.mxu1 }
 0x8a2   :  { %v2676_v48 = vadd.f32 %v2613_v21, %v448_v26  ;;  %v2677_v25 = vadd.f32 %v2633_v23, %v489_v16  ;;  %v7125_v26 = vld [vmem:[#allocation103_spill] sm:$0xff] }
 0x8a4   :  { %v3474_v34 = vmul.f32 -1.442695, %v2676_v48  ;;  %v3475_v59 = vmul.f32 -1.442695, %v2677_v25 }
 0x8a6   :  { %3696 = vpow2.f32 %v3474_v34 }
 0x8a7   :  { %3698 = vpow2.f32 %v3475_v59 }
 0x8a8   :  { %v2673_v29 = vpop.f32.mrf.mxu3  ;;  %v2653_v24 = vpop.f32.mrf.mxu2 }
 0x8a9   :  { %v2679_v22 = vadd.f32 %v2673_v29, %v7124_v36  ;;  %v2678_v48 = vadd.f32 %v2653_v24, %v7125_v26 }
 0x8ab   :  { %v3476_v35 = vmul.f32 -1.442695, %v2679_v22 }
 0x8ac   :  { %v3697_v9 = vpop.eup %3696 }
 0x8ad   :  { %v3699_v44 = vpop.eup %3698  ;;  %v2683_v53 = vadd.f32 1.0, %v3697_v9  ;;  %3700 = vpow2.f32 %v3476_v35 }
 0x8ae   :  { %v2702_v1 = vadd.f32 1.0, %v3699_v44 }
 0x8af   :  { %3702 = vrcp.f32 %v2683_v53  ;;  %v2695_v22 = vand.u32 2147483648, %v2683_v53  ;;  %v2693_v35 = vand.u32 2147483647, %v2683_v53  ;;  %vm2689_vm3 = vweird.f32 %v2683_v53 }
 0x8b0   :  { %3704 = vrcp.f32 %v2702_v1  ;;  %v2714_v29 = vand.u32 2147483648, %v2702_v1  ;;  %v2712_v36 = vand.u32 2147483647, %v2702_v1  ;;  %vm2708_vm4 = vweird.f32 %v2702_v1 }
 0x8b1   :  { %v2696_v24 = vor.u32 1.1754944e-38, %v2695_v22  ;;  %vm2694_vm7 = vcmp.eq.f32.partialorder %v2693_v35, 8.507059e+37 }
 0x8b2   :  { %vm2713_vm8 = vcmp.eq.f32.partialorder %v2712_v36, 8.507059e+37 }
 0x8b3   :  { %v3701_v30 = vpop.eup %3700 }
 0x8b4   :  { %v2722_v15 = vadd.f32 1.0, %v3701_v30 }
 0x8b5   :  { %v3703_v21 = vpop.eup %3702 }
 0x8b6   :  { %v3705_v16 = vpop.eup %3704  ;;  %v2685_v34 = vmul.f32 %v3703_v21, %v2683_v53  ;;  %3706 = vrcp.f32 %v2722_v15  ;;  %vm2690_vm1 = vweird.f32 %v3703_v21  ;;  %v2734_v22 = vand.u32 2147483648, %v2722_v15 }
 0x8b7   :  { %v2704_v23 = vmul.f32 %v3705_v16, %v2702_v1  ;;  %3708 = vtanh.f32 %v2678_v48  ;;  %vm2709_vm2 = vweird.f32 %v3705_v16  ;;  %vm2691_vm5 = vmor %vm2689_vm3, %vm2690_vm1  ;;  %vm2728_vm10 = vweird.f32 %v2722_v15 }
 0x8b8   :  { %v2686_v25 = vsub.f32 1.0, %v2685_v34  ;;  %vm2710_vm6 = vmor %vm2708_vm4, %vm2709_vm2  ;;  %v2715_v34 = vor.u32 1.1754944e-38, %v2714_v29  ;;  %v2735_v35 = vor.u32 1.1754944e-38, %v2734_v22 }
 0x8b9   :  { %v2705_v59 = vsub.f32 1.0, %v2704_v23 }
 0x8ba   :  { %v2687_v9 = vmul.f32 %v3703_v21, %v2686_v25 }
 0x8bb   :  { %v2706_v44 = vmul.f32 %v3705_v16, %v2705_v59 }
 0x8bc   :  { %v3707_v47 = vpop.eup %3706  ;;  %v2688_v30 = vadd.f32 %v3703_v21, %v2687_v9 }
 0x8bd   :  { %v2707_v26 = vadd.f32 %v3705_v16, %v2706_v44  ;;  %v2724_v4 = vmul.f32 %v3707_v47, %v2722_v15  ;;  %v3709_v48 = vpop.eup %3708  ;;  %vm2729_vm9 = vweird.f32 %v3707_v47 }
 0x8be   :  { %v2692_v23 = vsel %vm2691_vm5, %v3703_v21, %v2688_v30  ;;  %v2732_v21 = vand.u32 2147483647, %v2722_v15  ;;  %vm2730_vm11 = vmor %vm2728_vm10, %vm2729_vm9 }
 0x8bf   :  { %v2697_v14 = vsel %vm2694_vm7, %v2696_v24, %v2692_v23  ;;  %v2711_v25 = vsel %vm2710_vm6, %v3705_v16, %v2707_v26  ;;  %v2725_v7 = vsub.f32 1.0, %v2724_v4  ;;  %v7157_v23 = vld [vmem:[#allocation100_spill] sm:$0xff] }
 0x8c0   :  { %v2716_v59 = vsel %vm2713_vm8, %v2715_v34, %v2711_v25  ;;  %v2739_v54 = vmul.f32 %v3709_v48, %v2697_v14  ;;  %vm2733_vm12 = vcmp.eq.f32.partialorder %v2732_v21, 8.507059e+37 }
 0x8c1   :  { %v2738_v40 = vmul.f32 %v2716_v59, %v6192_v31  ;;  %v2726_v9 = vmul.f32 %v3707_v47, %v2725_v7 }
 0x8c3   :  { %v6272_v53 = vadd.f32 %v2739_v54, %v2738_v40  ;;  %v2727_v1 = vadd.f32 %v3707_v47, %v2726_v9  ;;  %v7156_v40 = vld [vmem:[#allocation102_spill] sm:$0xff] }
 0x8c5   :  { %3710 = vtanh.f32 %v6272_v53  ;;  %v2731_v29 = vsel %vm2730_vm11, %v3707_v47, %v2727_v1 }
 0x8c6   :  { %v2736_v4 = vsel %vm2733_vm12, %v2735_v35, %v2731_v29 }
 0x8cb   :  { %v3711_v16 = vpop.eup %3710 }
 0x8cc   :  { %v6275_v44 = vmul.f32 %v3711_v16, %v2736_v4 }
 0x8ce   :  { %2766 = vmatmul.f32.vlgmr.msrb.gmra.mxu0 %v6275_v44  ;;  %2786 = vmatmul.f32.vlgmr.msrb.gmra.mxu1 %v6275_v44 }
 0x8cf   :  { %2806 = vmatmul.f32.vlgmr.msra.gmra.mxu2 %v6275_v44  ;;  %2826 = vmatmul.f32.vlgmr.msra.gmra.mxu3 %v6275_v44 }
 0x8d0   :  { %3077 = vmatpush.msrb.mxu1 %v5916_v49  ;;  %3057 = vmatpush.msrb.mxu0 %v5913_v38  ;;  %v7126_v38 = vld [vmem:[#allocation81_spill] sm:$0xff]  ;;  %v7127_v49 = vld [vmem:[#allocation79_spill] sm:$0xff] }
 0x8d1   :  { %3097 = vmatpush.msra.mxu2 %v5919_v42  ;;  %3117 = vmatpush.msra.mxu3 %v5922_v37  ;;  %v7128_v42 = vld [vmem:[#allocation58_spill] sm:$0xff]  ;;  %v7129_v37 = vld [vmem:[#allocation57_spill] sm:$0xff] }
 0x8d2   :  { %3078 = vmatpush.msrb.mxu1 %v5928_v62  ;;  %3058 = vmatpush.msrb.mxu0 %v5925_v45  ;;  %v7130_v45 = vld [vmem:[#allocation84_spill] sm:$0xff]  ;;  %v7131_v62 = vld [vmem:[#allocation83_spill] sm:$0xff] }
 0x8d3   :  { %3098 = vmatpush.msra.mxu2 %v5931_v6  ;;  %3118 = vmatpush.msra.mxu3 %v5934_v20  ;;  %v7132_v6 = vld [vmem:[#allocation61_spill] sm:$0xff]  ;;  %v7133_v20 = vld [vmem:[#allocation104_spill] sm:$0xff] }
 0x8d4   :  { %3079 = vmatpush.msrb.mxu1 %v5940_v50  ;;  %3059 = vmatpush.msrb.mxu0 %v5937_v12  ;;  %v7134_v12 = vld [vmem:[#allocation106_spill] sm:$0xff] }
 0x8d5   :  { %3099 = vmatpush.msra.mxu2 %v5943_v28  ;;  %3119 = vmatpush.msra.mxu3 %v5946_v60  ;;  %v7135_v50 = vld [vmem:[#allocation62_spill] sm:$0xff]  ;;  %v7136_v28 = vld [vmem:[#allocation87_spill] sm:$0xff]  ;;  %v7137_v60 = vld [vmem:[#allocation116_spill] sm:$0xff] }
 0x8d6   :  { %3080 = vmatpush.msrb.mxu1 %v5952_v51  ;;  %3060 = vmatpush.msrb.mxu0 %v5949_v0  ;;  %v7138_v0 = vld [vmem:[#allocation115_spill] sm:$0xff]  ;;  %v7139_v51 = vld [vmem:[#allocation88_spill] sm:$0xff] }
 0x8d7   :  { %3100 = vmatpush.msra.mxu2 %v5955_v63  ;;  %3120 = vmatpush.msra.mxu3 %v5958_v13  ;;  %v7140_v63 = vld [vmem:[#allocation101_spill] sm:$0xff]  ;;  %v7141_v13 = vld [vmem:[#allocation99_spill] sm:$0xff] }
 0x8d8   :  { %3081 = vmatpush.msrb.mxu1 %v5964_v3  ;;  %3061 = vmatpush.msrb.mxu0 %v5961_v11  ;;  %v7142_v11 = vld [vmem:[#allocation92_spill] sm:$0xff]  ;;  %v7143_v3 = vld [vmem:[#allocation114_spill] sm:$0xff] }
 0x8d9   :  { %3101 = vmatpush.msra.mxu2 %v5967_v58  ;;  %3121 = vmatpush.msra.mxu3 %v5970_v19  ;;  %v7144_v58 = vld [vmem:[#allocation113_spill] sm:$0xff]  ;;  %v7145_v19 = vld [vmem:[#allocation90_spill] sm:$0xff] }
 0x8da   :  { %3082 = vmatpush.msrb.mxu1 %v5976_v18  ;;  %3062 = vmatpush.msrb.mxu0 %v5973_v39  ;;  %v7146_v39 = vld [vmem:[#allocation60_spill] sm:$0xff]  ;;  %v7147_v18 = vld [vmem:[#allocation69_spill] sm:$0xff] }
 0x8db   :  { %3102 = vmatpush.msra.mxu2 %v5979_v8  ;;  %3122 = vmatpush.msra.mxu3 %v5982_v52  ;;  %v7148_v8 = vld [vmem:[#allocation49_spill] sm:$0xff]  ;;  %v7149_v52 = vld [vmem:[#allocation47_spill] sm:$0xff] }
 0x8dc   :  { %3083 = vmatpush.msrb.mxu1 %v5988_v61  ;;  %3063 = vmatpush.msrb.mxu0 %v5985_v17  ;;  %v7150_v17 = vld [vmem:[#allocation74_spill] sm:$0xff]  ;;  %v7151_v61 = vld [vmem:[#allocation73_spill] sm:$0xff] }
 0x8dd   :  { %3103 = vmatpush.msra.mxu2 %v5991_v10  ;;  %3123 = vmatpush.msra.mxu3 %v5994_v46  ;;  %v7152_v10 = vld [vmem:[#allocation35_spill] sm:$0xff] }
 0x8de   :  { %3084 = vmatpush.msrb.mxu1 %v6000_v55  ;;  %3064 = vmatpush.msrb.mxu0 %v5997_v2  ;;  %v7153_v46 = vld [vmem:[#allocation75_spill] sm:$0xff]  ;;  %v7154_v55 = vld [vmem:[#allocation66_spill] sm:$0xff] }
 0x8df   :  { %3104 = vmatpush.msra.mxu2 %v6003_v5  ;;  %3124 = vmatpush.msra.mxu3 %v6006_v27  ;;  %v445_v2 = vadd.f32 %v7153_v46, %v7152_v10  ;;  %v7155_v5 = vld [vmem:[#allocation76_spill] sm:$0xff] }
 0x8e0   :  { %3085 = vmatpush.msrb.mxu1 %v6012_v33  ;;  %3065 = vmatpush.msrb.mxu0 %v6009_v32  ;;  %v486_v27 = vadd.f32 %v7155_v5, %v7154_v55  ;;  %v3234_v46 = vld [vmem:[#allocation17 + $0x68] sm:$0xff]  ;;  %v3232_v5 = vld [vmem:[#allocation17 + $0x58] sm:$0xff] }
 0x8e1   :  { %3105 = vmatpush.msra.mxu2 %v6015_v57  ;;  %3125 = vmatpush.msra.mxu3 %v6018_v56 }
 0x8e2   :  { %3086 = vmatpush.msrb.mxu1 %v6024_v43  ;;  %3066 = vmatpush.msrb.mxu0 %v6021_v41 }
 0x8e3   :  { %3106 = vmatpush.msra.mxu2 %v7126_v38  ;;  %3126 = vmatpush.msra.mxu3 %v7127_v49 }
 0x8e4   :  { %3087 = vmatpush.msrb.mxu1 %v7128_v42  ;;  %3067 = vmatpush.msrb.mxu0 %v7129_v37 }
 0x8e5   :  { %3107 = vmatpush.msra.mxu2 %v7130_v45  ;;  %3127 = vmatpush.msra.mxu3 %v7131_v62 }
 0x8e6   :  { %3088 = vmatpush.msrb.mxu1 %v7132_v6  ;;  %3068 = vmatpush.msrb.mxu0 %v7133_v20 }
 0x8e7   :  { %3108 = vmatpush.msra.mxu2 %v7134_v12  ;;  %3128 = vmatpush.msra.mxu3 %v7135_v50 }
 0x8e8   :  { %3089 = vmatpush.msrb.mxu1 %v7136_v28  ;;  %3069 = vmatpush.msrb.mxu0 %v7137_v60 }
 0x8e9   :  { %3109 = vmatpush.msra.mxu2 %v7138_v0  ;;  %3129 = vmatpush.msra.mxu3 %v7139_v51 }
 0x8ea   :  { %3090 = vmatpush.msrb.mxu1 %v7140_v63  ;;  %3070 = vmatpush.msrb.mxu0 %v7141_v13 }
 0x8eb   :  { %3110 = vmatpush.msra.mxu2 %v7142_v11  ;;  %3130 = vmatpush.msra.mxu3 %v7143_v3 }
 0x8ec   :  { %3091 = vmatpush.msrb.mxu1 %v7144_v58  ;;  %3071 = vmatpush.msrb.mxu0 %v7145_v19 }
 0x8ed   :  { %3111 = vmatpush.msra.mxu2 %v7146_v39  ;;  %3131 = vmatpush.msra.mxu3 %v7147_v18 }
 0x8ee   :  { %3092 = vmatpush.msrb.mxu1 %v7148_v8  ;;  %3072 = vmatpush.msrb.mxu0 %v7149_v52 }
 0x8ef   :  { %3112 = vmatpush.msra.mxu2 %v7150_v17  ;;  %3132 = vmatpush.msra.mxu3 %v7151_v61  ;;  %v3235_v61 = vld [vmem:[#allocation17 + $0x70] sm:$0xff] }
 0x94b   :  { %v2767_v32 = vpop.f32.mrf.mxu0  ;;  %v2787_v33 = vpop.f32.mrf.mxu1 }
 0x94c   :  { %v2830_v57 = vadd.f32 %v2767_v32, %v445_v2  ;;  %v2831_v56 = vadd.f32 %v2787_v33, %v486_v27  ;;  %v3233_v2 = vld [vmem:[#allocation17 + $0x60] sm:$0xff]  ;;  %v7159_v33 = vld [vmem:[#allocation72_spill] sm:$0xff] }
 0x94d   :  { %v7158_v27 = vld [vmem:[#allocation71_spill] sm:$0xff] }
 0x94e   :  { %v3477_v41 = vmul.f32 -1.442695, %v2830_v57  ;;  %v3478_v43 = vmul.f32 -1.442695, %v2831_v56  ;;  %v442_v32 = vadd.f32 %v7158_v27, %v7152_v10  ;;  %v483_v57 = vadd.f32 %v7159_v33, %v7154_v55 }
 0x950   :  { %3712 = vpow2.f32 %v3477_v41 }
 0x951   :  { %3714 = vpow2.f32 %v3478_v43  ;;  %v3231_v43 = vld [vmem:[#allocation17 + $0x50] sm:$0xff] }
 0x952   :  { %v2827_v31 = vpop.f32.mrf.mxu3  ;;  %v2807_v30 = vpop.f32.mrf.mxu2 }
 0x953   :  { %v2833_v54 = vadd.f32 %v2827_v31, %v7156_v40  ;;  %v2832_v48 = vadd.f32 %v2807_v30, %v7157_v23 }
 0x955   :  { %v3479_v14 = vmul.f32 -1.442695, %v2833_v54  ;;  %v3230_v54 = vld [vmem:[#allocation17 + $0x48] sm:$0xff] }
 0x956   :  { %v3713_v7 = vpop.eup %3712 }
 0x957   :  { %v3715_v47 = vpop.eup %3714  ;;  %v2837_v15 = vadd.f32 1.0, %v3713_v7  ;;  %3716 = vpow2.f32 %v3479_v14 }
 0x958   :  { %v2856_v36 = vadd.f32 1.0, %v3715_v47  ;;  %v3229_v47 = vld [vmem:[#allocation17 + $0x40] sm:$0xff] }
 0x959   :  { %3718 = vrcp.f32 %v2837_v15  ;;  %v2849_v21 = vand.u32 2147483648, %v2837_v15  ;;  %v2847_v16 = vand.u32 2147483647, %v2837_v15  ;;  %vm2843_vm15 = vweird.f32 %v2837_v15 }
 0x95a   :  { %3720 = vrcp.f32 %v2856_v36  ;;  %v2868_v29 = vand.u32 2147483648, %v2856_v36  ;;  %v2866_v38 = vand.u32 2147483647, %v2856_v36  ;;  %vm2862_vm0 = vweird.f32 %v2856_v36 }
 0x95b   :  { %v2850_v37 = vor.u32 1.1754944e-38, %v2849_v21  ;;  %vm2848_vm3 = vcmp.eq.f32.partialorder %v2847_v16, 8.507059e+37  ;;  %v3223_v21 = vld [vmem:[#allocation17 + $0x10] sm:$0xff] }
 0x95c   :  { %v2869_v6 = vor.u32 1.1754944e-38, %v2868_v29  ;;  %vm2867_vm4 = vcmp.eq.f32.partialorder %v2866_v38, 8.507059e+37  ;;  %v3222_v29 = vld [vmem:[#allocation17 + $0x8] sm:$0xff] }
 0x95d   :  { %v3717_v24 = vpop.eup %3716 }
 0x95e   :  { %v2876_v26 = vadd.f32 1.0, %v3717_v24  ;;  %v7160_v24 = vld [vmem:[#allocation98_spill] sm:$0xff] }
 0x95f   :  { %v3719_v34 = vpop.eup %3718 }
 0x960   :  { %v3721_v25 = vpop.eup %3720  ;;  %v2839_v59 = vmul.f32 %v3719_v34, %v2837_v15  ;;  %3722 = vrcp.f32 %v2876_v26  ;;  %vm2844_vm13 = vweird.f32 %v3719_v34  ;;  %v2888_v58 = vand.u32 2147483648, %v2876_v26  ;;  %v3228_v15 = vld [vmem:[#allocation17 + $0x38] sm:$0xff] }
 0x961   :  { %v2858_v9 = vmul.f32 %v3721_v25, %v2856_v36  ;;  %3724 = vtanh.f32 %v2832_v48  ;;  %vm2863_vm14 = vweird.f32 %v3721_v25  ;;  %vm2845_vm1 = vmor %vm2843_vm15, %vm2844_vm13  ;;  %vm2882_vm6 = vweird.f32 %v2876_v26  ;;  %v3227_v36 = vld [vmem:[#allocation17 + $0x30] sm:$0xff]  ;;  %v3225_v48 = vld [vmem:[#allocation17 + $0x20] sm:$0xff] }
 0x962   :  { %v2840_v1 = vsub.f32 1.0, %v2839_v59  ;;  %vm2864_vm2 = vmor %vm2862_vm0, %vm2863_vm14  ;;  %v2886_v19 = vand.u32 2147483647, %v2876_v26  ;;  %v2889_v18 = vor.u32 1.1754944e-38, %v2888_v58 }
 0x963   :  { %v2859_v22 = vsub.f32 1.0, %v2858_v9 }
 0x964   :  { %v2841_v35 = vmul.f32 %v3719_v34, %v2840_v1  ;;  %vm2887_vm8 = vcmp.eq.f32.partialorder %v2886_v19, 8.507059e+37 }
 0x965   :  { %v2860_v4 = vmul.f32 %v3721_v25, %v2859_v22  ;;  %v3224_v22 = vld [vmem:[#allocation17 + $0x18] sm:$0xff] }
 0x966   :  { %v3723_v49 = vpop.eup %3722  ;;  %v2842_v42 = vadd.f32 %v3719_v34, %v2841_v35 }
 0x967   :  { %v2861_v45 = vadd.f32 %v3721_v25, %v2860_v4  ;;  %v2878_v62 = vmul.f32 %v3723_v49, %v2876_v26  ;;  %v3725_v12 = vpop.eup %3724  ;;  %vm2883_vm5 = vweird.f32 %v3723_v49  ;;  %v3221_v4 = vld [vmem:[#allocation17] sm:$0xff] }
 0x968   :  { %v2846_v20 = vsel %vm2845_vm1, %v3719_v34, %v2842_v42  ;;  %vm2884_vm7 = vmor %vm2882_vm6, %vm2883_vm5  ;;  %v3226_v34 = vld [vmem:[#allocation17 + $0x28] sm:$0xff]  ;;  %v7161_v42 = vld [vmem:[#allocation97_spill] sm:$0xff] }
 0x969   :  { %v2851_v50 = vsel %vm2848_vm3, %v2850_v37, %v2846_v20  ;;  %v2865_v28 = vsel %vm2864_vm2, %v3721_v25, %v2861_v45  ;;  %v2879_v60 = vsub.f32 1.0, %v2878_v62 }
 0x96a   :  { %v2870_v0 = vsel %vm2867_vm4, %v2869_v6, %v2865_v28  ;;  %v2893_v51 = vmul.f32 %v3725_v12, %v2851_v50 }
 0x96b   :  { %v2892_v63 = vmul.f32 %v2870_v0, %v6272_v53  ;;  %v2880_v13 = vmul.f32 %v3723_v49, %v2879_v60  ;;  %v3236_v53 = vld [vmem:[#allocation17 + $0x78] sm:$0xff] }
 0x96d   :  { %v6352_v11 = vadd.f32 %v2893_v51, %v2892_v63  ;;  %v2881_v3 = vadd.f32 %v3723_v49, %v2880_v13 }
 0x96f   :  { %3726 = vtanh.f32 %v6352_v11  ;;  %v2885_v39 = vsel %vm2884_vm7, %v3723_v49, %v2881_v3 }
 0x970   :  { %v2890_v52 = vsel %vm2887_vm8, %v2889_v18, %v2885_v39 }
 0x975   :  { %v3727_v8 = vpop.eup %3726 }
 0x976   :  { %v6355_v17 = vmul.f32 %v3727_v8, %v2890_v52 }
 0x978   :  { %2920 = vmatmul.f32.vlgmr.msra.gmra.mxu0 %v6355_v17  ;;  %2940 = vmatmul.f32.vlgmr.msra.gmra.mxu1 %v6355_v17 }
 0x979   :  { %2960 = vmatmul.f32.vlgmr.msrb.gmra.mxu2 %v6355_v17  ;;  %2980 = vmatmul.f32.vlgmr.msrb.gmra.mxu3 %v6355_v17 }
 0x97a   :  { %3294 = vmatpush.msra.mxu1 %v3236_v53 }
 0x97c   :  { %3295 = vmatpush.msra.mxu1 %v3235_v61 }
 0x97e   :  { %3296 = vmatpush.msra.mxu1 %v3234_v46 }
 0x980   :  { %3297 = vmatpush.msra.mxu1 %v3233_v2 }
 0x982   :  { %3298 = vmatpush.msra.mxu1 %v3232_v5 }
 0x984   :  { %3299 = vmatpush.msra.mxu1 %v3231_v43 }
 0x986   :  { %3300 = vmatpush.msra.mxu1 %v3230_v54 }
 0x988   :  { %3301 = vmatpush.msra.mxu1 %v3229_v47  ;;  %v7164_v47 = vld [vmem:[#allocation36_spill] sm:$0xff] }
 0x98a   :  { %3302 = vmatpush.msra.mxu1 %v3228_v15  ;;  %v7165_v15 = vld [vmem:[#allocation63_spill] sm:$0xff] }
 0x98c   :  { %3303 = vmatpush.msra.mxu1 %v3227_v36  ;;  %v7166_v36 = vld [vmem:[#allocation64_spill] sm:$0xff] }
 0x98e   :  { %3304 = vmatpush.msra.mxu1 %v3226_v34  ;;  %v3252_v34 = vld [vmem:[#allocation18 + $0x78] sm:$0xff] }
 0x98f   :  { %3253 = vmatpush.msra.mxu0 %v3252_v34 }
 0x990   :  { %3305 = vmatpush.msra.mxu1 %v3225_v48  ;;  %v3250_v48 = vld [vmem:[#allocation18 + $0x68] sm:$0xff] }
 0x992   :  { %3306 = vmatpush.msra.mxu1 %v3224_v22  ;;  %v3245_v22 = vld [vmem:[#allocation18 + $0x40] sm:$0xff] }
 0x994   :  { %3307 = vmatpush.msra.mxu1 %v3223_v21  ;;  %v3244_v21 = vld [vmem:[#allocation18 + $0x38] sm:$0xff] }
 0x996   :  { %3308 = vmatpush.msra.mxu1 %v3222_v29  ;;  %v7170_v29 = vld [vmem:[#allocation67_spill] sm:$0xff] }
 0x998   :  { %3309 = vmatpush.msra.mxu1 %v3221_v4 }
 0x9f5   :  { %v2921_v56 = vpop.f32.mrf.mxu0  ;;  %v2941_v41 = vpop.f32.mrf.mxu1 }
 0x9f6   :  { %v2984_v31 = vadd.f32 %v2921_v56, %v442_v32  ;;  %v2985_v40 = vadd.f32 %v2941_v41, %v483_v57 }
 0x9f8   :  { %v3480_v14 = vmul.f32 -1.442695, %v2984_v31  ;;  %v3481_v7 = vmul.f32 -1.442695, %v2985_v40 }
 0x9fa   :  { %3728 = vpow2.f32 %v3480_v14 }
 0x9fb   :  { %3730 = vpow2.f32 %v3481_v7  ;;  %v7163_v7 = vld [vmem:[#allocation27_spill] sm:$0xff] }
 0x9fc   :  { %v2981_v30 = vpop.f32.mrf.mxu3  ;;  %v2961_v35 = vpop.f32.mrf.mxu2 }
 0x9fd   :  { %v2987_v26 = vadd.f32 %v2981_v30, %v7160_v24  ;;  %v2986_v37 = vadd.f32 %v2961_v35, %v7161_v42  ;;  %v7167_v30 = vld [vmem:[#allocation70_spill] sm:$0xff]  ;;  %v439_v35 = vadd.f32 %v7170_v29, %v7152_v10  ;;  %v3243_v42 = vld [vmem:[#allocation18 + $0x30] sm:$0xff] }
 0x9fe   :  { %v7168_v24 = vld [vmem:[#allocation42_spill] sm:$0xff]  ;;  %v3239_v10 = vld [vmem:[#allocation18 + $0x10] sm:$0xff] }
 0x9ff   :  { %v3482_v23 = vmul.f32 -1.442695, %v2987_v26  ;;  %v7169_v26 = vld [vmem:[#allocation65_spill] sm:$0xff] }
 0xa00   :  { %v3729_v25 = vpop.eup %3728 }
 0xa01   :  { %v3731_v59 = vpop.eup %3730  ;;  %v2991_v9 = vadd.f32 1.0, %v3729_v25  ;;  %3732 = vpow2.f32 %v3482_v23  ;;  %v3251_v23 = vld [vmem:[#allocation18 + $0x70] sm:$0xff]  ;;  %v3249_v25 = vld [vmem:[#allocation18 + $0x60] sm:$0xff] }
 0xa02   :  { %v3010_v1 = vadd.f32 1.0, %v3731_v59  ;;  %3254 = vmatpush.msra.mxu0 %v3251_v23  ;;  %v3248_v59 = vld [vmem:[#allocation18 + $0x58] sm:$0xff] }
 0xa03   :  { %3734 = vrcp.f32 %v2991_v9  ;;  %v3003_v50 = vand.u32 2147483648, %v2991_v9  ;;  %v3001_v0 = vand.u32 2147483647, %v2991_v9  ;;  %vm2997_vm11 = vweird.f32 %v2991_v9 }
 0xa04   :  { %3736 = vrcp.f32 %v3010_v1  ;;  %v3022_v28 = vand.u32 2147483648, %v3010_v1  ;;  %v3020_v63 = vand.u32 2147483647, %v3010_v1  ;;  %vm3016_vm12 = vweird.f32 %v3010_v1  ;;  %3255 = vmatpush.msra.mxu0 %v3250_v48 }
 0xa05   :  { %v3004_v58 = vor.u32 1.1754944e-38, %v3003_v50  ;;  %vm3002_vm15 = vcmp.eq.f32.partialorder %v3001_v0, 8.507059e+37  ;;  %v3240_v50 = vld [vmem:[#allocation18 + $0x18] sm:$0xff]  ;;  %v3238_v0 = vld [vmem:[#allocation18 + $0x8] sm:$0xff] }
 0xa06   :  { %v3023_v18 = vor.u32 1.1754944e-38, %v3022_v28  ;;  %vm3021_vm0 = vcmp.eq.f32.partialorder %v3020_v63, 8.507059e+37  ;;  %3256 = vmatpush.msra.mxu0 %v3249_v25  ;;  %v3237_v63 = vld [vmem:[#allocation18] sm:$0xff] }
 0xa07   :  { %v3733_v16 = vpop.eup %3732 }
 0xa08   :  { %v3030_v38 = vadd.f32 1.0, %v3733_v16  ;;  %3257 = vmatpush.msra.mxu0 %v3248_v59  ;;  %v7171_v16 = vld [vmem:[#allocation68_spill] sm:$0xff] }
 0xa09   :  { %v3735_v49 = vpop.eup %3734  ;;  %v480_v4 = vadd.f32 %v7171_v16, %v7154_v55  ;;  %v7172_v55 = vld [vmem:[#allocation94_spill] sm:$0xff] }
 0xa0a   :  { %v3737_v45 = vpop.eup %3736  ;;  %v2993_v62 = vmul.f32 %v3735_v49, %v2991_v9  ;;  %3738 = vrcp.f32 %v3030_v38  ;;  %vm2998_vm9 = vweird.f32 %v3735_v49  ;;  %v3042_v56 = vand.u32 2147483648, %v3030_v38  ;;  %v3247_v9 = vld [vmem:[#allocation18 + $0x50] sm:$0xff] }
 0xa0b   :  { %v3012_v6 = vmul.f32 %v3737_v45, %v3010_v1  ;;  %3740 = vtanh.f32 %v2986_v37  ;;  %vm3017_vm10 = vweird.f32 %v3737_v45  ;;  %vm2999_vm13 = vmor %vm2997_vm11, %vm2998_vm9  ;;  %vm3036_vm2 = vweird.f32 %v3030_v38  ;;  %3258 = vmatpush.msra.mxu0 %v3247_v9  ;;  %v3246_v1 = vld [vmem:[#allocation18 + $0x48] sm:$0xff] }
 0xa0c   :  { %v2994_v20 = vsub.f32 1.0, %v2993_v62  ;;  %vm3018_vm14 = vmor %vm3016_vm12, %vm3017_vm10  ;;  %v3040_v41 = vand.u32 2147483647, %v3030_v38  ;;  %v3043_v31 = vor.u32 1.1754944e-38, %v3042_v56  ;;  %v3242_v62 = vld [vmem:[#allocation18 + $0x28] sm:$0xff] }
 0xa0d   :  { %v3013_v12 = vsub.f32 1.0, %v3012_v6  ;;  %3259 = vmatpush.msra.mxu0 %v3246_v1 }
 0xa0e   :  { %v2995_v60 = vmul.f32 %v3735_v49, %v2994_v20  ;;  %vm3041_vm4 = vcmp.eq.f32.partialorder %v3040_v41, 8.507059e+37 }
 0xa0f   :  { %v3014_v51 = vmul.f32 %v3737_v45, %v3013_v12  ;;  %3260 = vmatpush.msra.mxu0 %v3245_v22  ;;  %v3241_v12 = vld [vmem:[#allocation18 + $0x20] sm:$0xff] }
 0xa10   :  { %v3739_v13 = vpop.eup %3738  ;;  %v2996_v3 = vadd.f32 %v3735_v49, %v2995_v60 }
 0xa11   :  { %v3015_v19 = vadd.f32 %v3737_v45, %v3014_v51  ;;  %v3032_v39 = vmul.f32 %v3739_v13, %v3030_v38  ;;  %v3741_v52 = vpop.eup %3740  ;;  %vm3037_vm1 = vweird.f32 %v3739_v13  ;;  %3261 = vmatpush.msra.mxu0 %v3244_v21 }
 0xa12   :  { %v3000_v8 = vsel %vm2999_vm13, %v3735_v49, %v2996_v3  ;;  %vm3038_vm3 = vmor %vm3036_vm2, %vm3037_vm1 }
 0xa13   :  { %v3005_v53 = vsel %vm3002_vm15, %v3004_v58, %v3000_v8  ;;  %v3019_v61 = vsel %vm3018_vm14, %v3737_v45, %v3015_v19  ;;  %v3033_v46 = vsub.f32 1.0, %v3032_v39  ;;  %3262 = vmatpush.msra.mxu0 %v3243_v42  ;;  %v7175_v42 = vld [vmem:[#allocation53_spill] sm:$0xff] }
 0xa14   :  { %v3024_v2 = vsel %vm3021_vm0, %v3023_v18, %v3019_v61  ;;  %v3047_v5 = vmul.f32 %v3741_v52, %v3005_v53  ;;  %v7173_v53 = vld [vmem:[#allocation93_spill] sm:$0xff] }
 0xa15   :  { %v3046_v27 = vmul.f32 %v3024_v2, %v6352_v11  ;;  %v3034_v32 = vmul.f32 %v3739_v13, %v3033_v46  ;;  %v7162_v11 = vld [vmem:[#allocation117_spill] sm:$0xff]  ;;  %3263 = vmatpush.msra.mxu0 %v3242_v62 }
 0xa17   :  { %v6368_v33 = vadd.f32 %v3047_v5, %v3046_v27  ;;  %v3035_v57 = vadd.f32 %v3739_v13, %v3034_v32  ;;  %3264 = vmatpush.msra.mxu0 %v3241_v12 }
 0xa19   :  { %3742 = vtanh.f32 %v6368_v33  ;;  %v3039_v43 = vsel %vm3038_vm3, %v3739_v13, %v3035_v57  ;;  %3265 = vmatpush.msra.mxu0 %v3240_v50 }
 0xa1a   :  { %v3044_v54 = vsel %vm3041_vm4, %v3043_v31, %v3039_v43 }
 0xa1b   :  { %3266 = vmatpush.msra.mxu0 %v3239_v10 }
 0xa1d   :  { %3267 = vmatpush.msra.mxu0 %v3238_v0 }
 0xa1f   :  { %v3743_v40 = vpop.eup %3742  ;;  %3268 = vmatpush.msra.mxu0 %v3237_v63 }
 0xa20   :  { %v6371_v14 = vmul.f32 %v3743_v40, %v3044_v54 }
 0xa22   :  { %3073 = vmatmul.f32.vlgmr.msrb.gmra.mxu0 %v6371_v14  ;;  %3093 = vmatmul.f32.vlgmr.msrb.gmra.mxu1 %v6371_v14 }
 0xa23   :  { %3113 = vmatmul.f32.vlgmr.msra.gmra.mxu2 %v6371_v14  ;;  %3133 = vmatmul.f32.vlgmr.msra.gmra.mxu3 %v6371_v14 }
 0xa2a   :  { %3310 = vmatmul.f32.vlgmr.msra.gmra.mxu1 %v7162_v11 }
 0xa32   :  { %3313 = vmatmul.f32.gmra.mxu1 %v7163_v7 }
 0xa3a   :  { %3316 = vmatmul.f32.gmra.mxu1 %v7164_v47 }
 0xa42   :  { %3319 = vmatmul.f32.gmra.mxu1 %v7165_v15 }
 0xa4a   :  { %3322 = vmatmul.f32.gmra.mxu1 %v7166_v36 }
 0xa52   :  { %3325 = vmatmul.f32.gmra.mxu1 %v7167_v30 }
 0xa5a   :  { %3328 = vmatmul.f32.gmra.mxu1 %v7168_v24 }
 0xa62   :  { %3331 = vmatmul.f32.gmra.mxu1 %v7169_v26 }
 0xa9f   :  { %v3074_v38 = vpop.f32.mrf.mxu0  ;;  %v3094_v49 = vpop.f32.mrf.mxu1 }
 0xaa0   :  { %v3137_v37 = vadd.f32 %v3074_v38, %v439_v35  ;;  %v3138_v45 = vadd.f32 %v3094_v49, %v480_v4 }
 0xaa2   :  { %v3483_v6 = vmul.f32 -1.442695, %v3137_v37  ;;  %v3484_v20 = vmul.f32 -1.442695, %v3138_v45  ;;  %v7176_v37 = vld [vmem:[#allocation56_spill] sm:$0xff]  ;;  %v7177_v45 = vld [vmem:[#allocation55_spill] sm:$0xff] }
 0xaa4   :  { %3744 = vpow2.f32 %v3483_v6 }
 0xaa5   :  { %3746 = vpow2.f32 %v3484_v20 }
 0xaa6   :  { %v3134_v28 = vpop.f32.mrf.mxu3  ;;  %v3114_v39 = vpop.f32.mrf.mxu2 }
 0xaa7   :  { %v3140_v60 = vadd.f32 %v3134_v28, %v7172_v55  ;;  %v3139_v61 = vadd.f32 %v3114_v39, %v7173_v53  ;;  %v3311_v62 = vpop.f32.mrf.mxu1 }
 0xaa9   :  { %v3485_v51 = vmul.f32 -1.442695, %v3140_v60 }
 0xaaa   :  { %v3745_v13 = vpop.eup %3744 }
 0xaab   :  { %v3747_v3 = vpop.eup %3746  ;;  %v3144_v58 = vadd.f32 1.0, %v3745_v13  ;;  %3748 = vpow2.f32 %v3485_v51 }
 0xaac   :  { %v3163_v19 = vadd.f32 1.0, %v3747_v3 }
 0xaad   :  { %3750 = vrcp.f32 %v3144_v58  ;;  %v3156_v57 = vand.u32 2147483648, %v3144_v58  ;;  %v3154_v43 = vand.u32 2147483647, %v3144_v58  ;;  %vm3150_vm7 = vweird.f32 %v3144_v58 }
 0xaae   :  { %3752 = vrcp.f32 %v3163_v19  ;;  %v3175_v56 = vand.u32 2147483648, %v3163_v19  ;;  %v3173_v40 = vand.u32 2147483647, %v3163_v19  ;;  %vm3169_vm8 = vweird.f32 %v3163_v19 }
 0xaaf   :  { %v3157_v7 = vor.u32 1.1754944e-38, %v3156_v57  ;;  %vm3155_vm11 = vcmp.eq.f32.partialorder %v3154_v43, 8.507059e+37  ;;  %v3314_v6 = vpop.f32.mrf.mxu1 }
 0xab0   :  { %v3176_v36 = vor.u32 1.1754944e-38, %v3175_v56  ;;  %vm3174_vm12 = vcmp.eq.f32.partialorder %v3173_v40, 8.507059e+37 }
 0xab1   :  { %v3749_v18 = vpop.eup %3748 }
 0xab2   :  { %v3183_v8 = vadd.f32 1.0, %v3749_v18 }
 0xab3   :  { %v3751_v52 = vpop.eup %3750 }
 0xab4   :  { %v3753_v46 = vpop.eup %3752  ;;  %v3146_v2 = vmul.f32 %v3751_v52, %v3144_v58  ;;  %3754 = vrcp.f32 %v3183_v8  ;;  %vm3151_vm5 = vweird.f32 %v3751_v52  ;;  %v3195_v21 = vand.u32 2147483648, %v3183_v8 }
 0xab5   :  { %v3165_v5 = vmul.f32 %v3753_v46, %v3163_v19  ;;  %3756 = vtanh.f32 %v3139_v61  ;;  %vm3170_vm6 = vweird.f32 %v3753_v46  ;;  %vm3152_vm9 = vmor %vm3150_vm7, %vm3151_vm5  ;;  %vm3189_vm14 = vweird.f32 %v3183_v8 }
 0xab6   :  { %v3147_v27 = vsub.f32 1.0, %v3146_v2  ;;  %vm3171_vm10 = vmor %vm3169_vm8, %vm3170_vm6  ;;  %v3193_v29 = vand.u32 2147483647, %v3183_v8  ;;  %v3196_v16 = vor.u32 1.1754944e-38, %v3195_v21 }
 0xab7   :  { %v3166_v32 = vsub.f32 1.0, %v3165_v5  ;;  %v3317_v10 = vpop.f32.mrf.mxu1 }
 0xab8   :  { %v3148_v41 = vmul.f32 %v3751_v52, %v3147_v27  ;;  %vm3194_vm0 = vcmp.eq.f32.partialorder %v3193_v29, 8.507059e+37 }
 0xab9   :  { %v3167_v31 = vmul.f32 %v3753_v46, %v3166_v32 }
 0xaba   :  { %v3755_v54 = vpop.eup %3754  ;;  %v3149_v11 = vadd.f32 %v3751_v52, %v3148_v41 }
 0xabb   :  { %v3168_v47 = vadd.f32 %v3753_v46, %v3167_v31  ;;  %v3185_v15 = vmul.f32 %v3755_v54, %v3183_v8  ;;  %v3757_v24 = vpop.eup %3756  ;;  %vm3190_vm13 = vweird.f32 %v3755_v54 }
 0xabc   :  { %v3153_v30 = vsel %vm3152_vm9, %v3751_v52, %v3149_v11  ;;  %vm3191_vm15 = vmor %vm3189_vm14, %vm3190_vm13 }
 0xabd   :  { %v3158_v26 = vsel %vm3155_vm11, %v3157_v7, %v3153_v30  ;;  %v3172_v34 = vsel %vm3171_vm10, %v3753_v46, %v3168_v47  ;;  %v3186_v23 = vsub.f32 1.0, %v3185_v15 }
 0xabe   :  { %v3177_v48 = vsel %vm3174_vm12, %v3176_v36, %v3172_v34  ;;  %v3200_v25 = vmul.f32 %v3757_v24, %v3158_v26 }
 0xabf   :  { %v3199_v59 = vmul.f32 %v3177_v48, %v6368_v33  ;;  %v3187_v9 = vmul.f32 %v3755_v54, %v3186_v23  ;;  %v7174_v33 = vld [vmem:[#allocation54_spill] sm:$0xff] }
 0xac1   :  { %v3201_v1 = vadd.f32 %v3200_v25, %v3199_v59  ;;  %v3188_v22 = vadd.f32 %v3755_v54, %v3187_v9 }
 0xac3   :  { %3758 = vtanh.f32 %v3201_v1  ;;  %v3192_v35 = vsel %vm3191_vm15, %v3755_v54, %v3188_v22 }
 0xac4   :  { %v3197_v38 = vsel %vm3194_vm0, %v3196_v16, %v3192_v35 }
 0xac9   :  { %v3759_v4 = vpop.eup %3758 }
 0xaca   :  { %v3203_v49 = vmul.f32 %v3759_v4, %v3197_v38 }
 0xacc   :  { %3269 = vmatmul.f32.vlgmr.msra.gmra.mxu0 %v3203_v49 }
 0xad4   :  { %3272 = vmatmul.f32.gmra.mxu0 %v6371_v14 }
 0xadc   :  { %3275 = vmatmul.f32.gmra.mxu0 %v6355_v17 }
 0xae4   :  { %3278 = vmatmul.f32.gmra.mxu0 %v6275_v44  ;;  %v3320_v44 = vpop.f32.mrf.mxu1 }
 0xaec   :  { %3281 = vmatmul.f32.gmra.mxu0 %v7174_v33  ;;  %v3323_v13 = vpop.f32.mrf.mxu1 }
 0xaf4   :  { %3284 = vmatmul.f32.gmra.mxu0 %v7175_v42  ;;  %v3326_v18 = vpop.f32.mrf.mxu1 }
 0xafc   :  { %3287 = vmatmul.f32.gmra.mxu0 %v7176_v37  ;;  %v3329_v61 = vpop.f32.mrf.mxu1 }
 0xb04   :  { %3290 = vmatmul.f32.gmra.mxu0 %v7177_v45  ;;  %v3332_v27 = vpop.f32.mrf.mxu1 }
 0xb49   :  { %v3270_v20 = vpop.f32.mrf.mxu0 }
 0xb4a   :  { %v3312_v12 = vadd.f32 %v3311_v62, %v3270_v20 }
 0xb4c   :  { %v3335_v50 = vmax.f32 %v3312_v12, 0.0 }
 0xb4e   :  { %3343 = vst [vmem:[#allocation20] sm:$0xff] %v3335_v50 }
 0xb51   :  { %v3273_v14 = vpop.f32.mrf.mxu0 }
 0xb52   :  { %v3315_v28 = vadd.f32 %v3314_v6, %v3273_v14 }
 0xb54   :  { %v3336_v17 = vmax.f32 %v3315_v28, 0.0 }
 0xb56   :  { %3344 = vst [vmem:[#allocation20 + $0x8] sm:$0xff] %v3336_v17 }
 0xb59   :  { %v3276_v55 = vpop.f32.mrf.mxu0 }
 0xb5a   :  { %v3318_v60 = vadd.f32 %v3317_v10, %v3276_v55 }
 0xb5c   :  { %v3337_v0 = vmax.f32 %v3318_v60, 0.0 }
 0xb5e   :  { %3345 = vst [vmem:[#allocation20 + $0x10] sm:$0xff] %v3337_v0 }
 0xb61   :  { %v3279_v51 = vpop.f32.mrf.mxu0 }
 0xb62   :  { %v3321_v63 = vadd.f32 %v3320_v44, %v3279_v51 }
 0xb64   :  { %v3338_v3 = vmax.f32 %v3321_v63, 0.0 }
 0xb66   :  { %3346 = vst [vmem:[#allocation20 + $0x18] sm:$0xff] %v3338_v3 }
 0xb69   :  { %v3282_v58 = vpop.f32.mrf.mxu0 }
 0xb6a   :  { %v3324_v19 = vadd.f32 %v3323_v13, %v3282_v58 }
 0xb6c   :  { %v3339_v39 = vmax.f32 %v3324_v19, 0.0 }
 0xb6e   :  { %3347 = vst [vmem:[#allocation20 + $0x20] sm:$0xff] %v3339_v39 }
 0xb71   :  { %v3285_v8 = vpop.f32.mrf.mxu0 }
 0xb72   :  { %v3327_v52 = vadd.f32 %v3326_v18, %v3285_v8 }
 0xb74   :  { %v3340_v53 = vmax.f32 %v3327_v52, 0.0 }
 0xb76   :  { %3348 = vst [vmem:[#allocation20 + $0x28] sm:$0xff] %v3340_v53 }
 0xb79   :  { %v3288_v46 = vpop.f32.mrf.mxu0 }
 0xb7a   :  { %v3330_v2 = vadd.f32 %v3329_v61, %v3288_v46 }
 0xb7c   :  { %v3341_v5 = vmax.f32 %v3330_v2, 0.0 }
 0xb7e   :  { %3349 = vst [vmem:[#allocation20 + $0x30] sm:$0xff] %v3341_v5 }
 0xb81   :  { %v3291_v32 = vpop.f32.mrf.mxu0 }
 0xb82   :  { %v3333_v57 = vadd.f32 %v3332_v27, %v3291_v32 }
 0xb84   :  { %v3342_v56 = vmax.f32 %v3333_v57, 0.0 }
 0xb86   :  { %3350 = vst [vmem:[#allocation20 + $0x38] sm:$0xff] %v3342_v56 }
 0xb87   :  { %3363 = dma.vmem_to_hbm [thread:$0]  %s3356_s26, 1024, %s3358_s30, [#allocation8], %s4123_s28, %s4123_s28, %s4124_s29  }
 0xb88   :  { %4115 = dma.done.wait [#allocation8], 1024  }
 0xb89   :  { %4116 = vsyncadd [#allocation8], 4294966272 }
 0xb8a   :  { %3368 = vsyncpa [#allocation7], 1 }
 0xb8b   :  { %3369 = vsyncpa [#allocation10], 1 }
 0xb8c   :  { %3370 = vsyncpa [#allocation13], 1 }
 0xb8d   :  { %3371 = vsyncpa [#allocation16], 1 }
 0xb8e   :  { %3372 = vsyncpa [#allocation19], 1 }
 0xb8f   :  { %3373 = vsyncpa [#allocation8], 1 }

</bundles_post_ra>
